<compile_context>
chip_gen: v6e
topology: v6e:2x2x1
jax: 0.10.0
libtpu: 0.0.40
codegen_flags: <defaults>
</compile_context>

<pallas_src>
import functools

import jax
import jax.numpy as jnp
from jax.experimental import pallas as pl
from jax.experimental.pallas import tpu as pltpu


# ----------------------------------------------------------------------------
# helpers
# ----------------------------------------------------------------------------
def _round_up(v, m):
    return (v + m - 1) // m * m


def _plan_dim(dim, mult, max_tile):
    """Pad `dim` to a multiple of `mult`; pick the largest tile that is a
    multiple of `mult`, divides the padded dim and is <= max_tile."""
    p = _round_up(dim, mult)
    if p <= max_tile:
        return p, p
    tile = mult
    c = mult
    while c <= max_tile:
        if p % c == 0:
            tile = c
        c += mult
    return p, tile


# ----------------------------------------------------------------------------
# Pallas kernel: tiled  acc += x @ w  over the K grid axis, with bias + ReLU
# and the output store only on the last K step.  x/w tiles are bf16
# (MXU-native), accumulation is f32 in a VMEM scratch.
# ----------------------------------------------------------------------------
def _matmul_bias_act_kernel(x_ref, w_ref, b_ref, o_ref, acc_ref, *, relu):
    k = pl.program_id(2)

    @pl.when(k == 0)
    def _init():
        acc_ref[...] = jnp.zeros_like(acc_ref)

    acc_ref[...] += jnp.dot(x_ref[...], w_ref[...],
                            preferred_element_type=jnp.float32)

    @pl.when(k == pl.num_programs(2) - 1)
    def _finalize():
        acc = acc_ref[...] + b_ref[...]          # (1, tn) f32 bias broadcast
        if relu:
            acc = jnp.maximum(acc, 0.0)
        o_ref[...] = acc.astype(o_ref.dtype)


def linear_pallas(x, layer, *, relu, out_dtype):
    """y = act(x @ W + b) with pre-padded bf16 W (Kp, Np) / f32 b (1, Np)."""
    wp, bp, n_out = layer["w"], layer["b"], layer["n"]
    M, K = x.shape
    Kp, Np = wp.shape
    assert K <= Kp

    Mp, tm = _plan_dim(M, 16, 512)       # 16: bf16 sublane packing
    _, tk = _plan_dim(Kp, 128, 1024)     # weights already padded to 128
    _, tn = _plan_dim(Np, 128, 256)

    # Only the activation needs per-call padding (weights padded at init).
    if (M, K) == (Mp, Kp) and x.dtype == jnp.bfloat16:
        xp = x
    else:
        xp = jnp.zeros((Mp, Kp), jnp.bfloat16).at[:M, :K].set(
            x.astype(jnp.bfloat16))

    grid = (Mp // tm, Np // tn, Kp // tk)
    out = pl.pallas_call(
        functools.partial(_matmul_bias_act_kernel, relu=relu),
        out_shape=jax.ShapeDtypeStruct((Mp, Np), out_dtype),
        grid_spec=pltpu.PrefetchScalarGridSpec(
            num_scalar_prefetch=0,
            grid=grid,
            in_specs=[
                pl.BlockSpec((tm, tk), lambda i, j, k: (i, k)),
                pl.BlockSpec((tk, tn), lambda i, j, k: (k, j)),
                pl.BlockSpec((1, tn), lambda i, j, k: (0, j)),
            ],
            out_specs=pl.BlockSpec((tm, tn), lambda i, j, k: (i, j)),
            scratch_shapes=[pltpu.VMEM((tm, tn), jnp.float32)],
        ),
        compiler_params=pltpu.CompilerParams(
            dimension_semantics=("parallel", "parallel", "arbitrary"),
            vmem_limit_bytes=48 * 1024 * 1024,   # fits v7x's 64 MiB VMEM
        ),
    )(xp, wp, bp)
    return out[:M, :n_out]


# ----------------------------------------------------------------------------
# Conv2d (valid padding, square stride) = im2col (JAX glue, bf16) + the tiled
# Pallas matmul kernel above.
# TODO(synk): fuse the patch gather into the kernel (manual DMA / Element
# block specs over output rows) to remove conv1's im2col HBM round trip.
# ----------------------------------------------------------------------------
def conv2d_pallas(x_nhwc, layer, *, stride, relu):
    B, H, W, Cin = x_nhwc.shape
    KH, KW = layer["kh"], layer["kw"]
    oh = (H - KH) // stride + 1
    ow = (W - KW) // stride + 1

    cols = []
    for i in range(KH):
        for j in range(KW):
            cols.append(x_nhwc[:, i:i + stride * oh:stride,
                               j:j + stride * ow:stride, :])
    patches = jnp.stack(cols, axis=3)                      # (B, oh, ow, KH*KW, Cin)
    patches = patches.reshape(B * oh * ow, KH * KW * Cin)  # (M, K), (i, j, c) order

    y = linear_pallas(patches, layer, relu=relu, out_dtype=jnp.bfloat16)
    return y.reshape(B, oh, ow, layer["n"])                # NHWC


# ----------------------------------------------------------------------------
# Parameter init (PyTorch-default-style uniform, fan_in bound).  All layout
# conversion / padding / bf16 casting happens ONCE here, not per forward.
# ----------------------------------------------------------------------------
def _uniform_init(key, fan_in, w_shape, b_shape):
    kw, kb = jax.random.split(key)
    bound = 1.0 / float(fan_in) ** 0.5
    w = jax.random.uniform(kw, w_shape, jnp.float32, -bound, bound)
    b = jax.random.uniform(kb, b_shape, jnp.float32, -bound, bound)
    return w, b


def _prep_linear(w_mat, b, extra=None):
    K, N = w_mat.shape
    Kp, Np = _round_up(K, 128), _round_up(N, 128)
    wp = jnp.zeros((Kp, Np), jnp.bfloat16).at[:K, :N].set(
        w_mat.astype(jnp.bfloat16))
    bp = jnp.zeros((1, Np), jnp.float32).at[0, :N].set(b.astype(jnp.float32))
    layer = {"w": wp, "b": bp, "n": N}
    if extra:
        layer.update(extra)
    return layer


def _prep_conv(w_oihw, b, *, scale=1.0):
    Cout, Cin, KH, KW = w_oihw.shape
    # OIHW -> (KH, KW, Cin, Cout) -> (KH*KW*Cin, Cout): matches im2col order.
    w_mat = jnp.transpose(w_oihw, (2, 3, 1, 0)).reshape(KH * KW * Cin, Cout)
    w_mat = w_mat * scale                    # fold x/255 into conv1's weights
    return _prep_linear(w_mat, b, extra={"kh": KH, "kw": KW})


def init_qnetwork_params(key, action_dim):
    k1, k2, k3, k4, k5 = jax.random.split(key, 5)
    p = {}
    c1_w, c1_b = _uniform_init(k1, 4 * 8 * 8, (32, 4, 8, 8), (32,))
    c2_w, c2_b = _uniform_init(k2, 32 * 4 * 4, (64, 32, 4, 4), (64,))
    c3_w, c3_b = _uniform_init(k3, 64 * 3 * 3, (64, 64, 3, 3), (64,))
    p["c1"] = _prep_conv(c1_w, c1_b, scale=1.0 / 255.0)   # (x/255) folded here
    p["c2"] = _prep_conv(c2_w, c2_b)
    p["c3"] = _prep_conv(c3_w, c3_b)

    # fc1: PyTorch's flatten of an NCHW tensor is (c, h, w) order.  We keep the
    # conv activations in NHWC and flatten in (h, w, c) order, so permute the
    # weight rows once here (numerically identical to transposing the
    # activation every forward).
    fc1_w, fc1_b = _uniform_init(k4, 64 * 7 * 7, (64 * 7 * 7, 512), (512,))
    perm = jnp.arange(64 * 7 * 7).reshape(64, 7, 7).transpose(1, 2, 0).reshape(-1)
    p["fc1"] = _prep_linear(fc1_w[perm, :], fc1_b)

    fc2_w, fc2_b = _uniform_init(k5, 512, (512, action_dim), (action_dim,))
    p["fc2"] = _prep_linear(fc2_w, fc2_b)
    return p


# ----------------------------------------------------------------------------
# Forward: x/255 -> conv8s4 -> ReLU -> conv4s2 -> ReLU -> conv3s1 -> ReLU
#          -> flatten -> fc(3136,512) -> ReLU -> fc(512, action_dim)
# ----------------------------------------------------------------------------
def qnetwork_forward(params, x_nchw):
    # Accept NCHW like PyTorch; run convs in NHWC (channels on the lane axis).
    x = jnp.transpose(x_nchw, (0, 2, 3, 1)).astype(jnp.bfloat16)   # (B,84,84,4)

    y = conv2d_pallas(x, params["c1"], stride=4, relu=True)        # (B,20,20,32)
    y = conv2d_pallas(y, params["c2"], stride=2, relu=True)        # (B, 9, 9,64)
    y = conv2d_pallas(y, params["c3"], stride=1, relu=True)        # (B, 7, 7,64)

    B = y.shape[0]
    y = y.reshape(B, -1)            # (h,w,c) flatten; fc1 rows pre-permuted
    y = linear_pallas(y, params["fc1"], relu=True, out_dtype=jnp.bfloat16)
    q = linear_pallas(y, params["fc2"], relu=False, out_dtype=jnp.float32)
    return q


if __name__ == "__main__":
    key = jax.random.PRNGKey(0)
    k_params, k_x = jax.random.split(key)

    # Spatial size must be 84x84 so the conv stack yields 7x7 and matches the
    # fixed Linear(64*7*7, 512); batch kept small.
    B, action_dim = 2, 4
    params = init_qnetwork_params(k_params, action_dim)
    x = jax.random.uniform(k_x, (B, 4, 84, 84), jnp.float32, 0.0, 255.0)

    fwd = jax.jit(lambda inp: qnetwork_forward(params, inp))
    q_values = jax.block_until_ready(fwd(x))
    assert q_values.shape == (B, action_dim)
    assert bool(jnp.all(jnp.isfinite(q_values)))
    print("KERNEL_OK")
</pallas_src>

<mosaic_0001>
module attributes {stable_mosaic.version = 11 : i64} {
  func.func @_matmul_bias_act_kernel(%arg0: i32, %arg1: i32, %arg2: i32, %arg3: memref<400x256xbf16, #tpu.memory_space<vmem>>, %arg4: memref<256x128xbf16, #tpu.memory_space<vmem>>, %arg5: memref<1x128xf32, #tpu.memory_space<vmem>>, %arg6: memref<400x128xbf16, #tpu.memory_space<vmem>>, %arg7: memref<400x128xf32, #tpu.memory_space<vmem>>) attributes {dimension_semantics = [#tpu.dimension_semantics<parallel>, #tpu.dimension_semantics<parallel>, #tpu.dimension_semantics<arbitrary>], iteration_bounds = array<i64: 2, 1, 1>, scalar_prefetch = 0 : i64, scratch_operands = 1 : i64, tpu.core_type = #tpu.core_type<tc>, window_params = [{transform_indices = @transform_0, window_bounds = array<i64: 400, 256>}, {transform_indices = @transform_1, window_bounds = array<i64: 256, 128>}, {transform_indices = @transform_2, window_bounds = array<i64: 1, 128>}, {transform_indices = @transform_3, window_bounds = array<i64: 400, 128>}]} {
    %c0_i32 = arith.constant 0 : i32
    %0 = arith.cmpi eq, %arg2, %c0_i32 : i32
    %1 = arith.extui %0 : i1 to i32
    %c0_i32_0 = arith.constant 0 : i32
    %2 = arith.cmpi ne, %1, %c0_i32_0 : i32
    scf.if %2 {
      %cst_10 = arith.constant 0.000000e+00 : f32
      %12 = vector.broadcast %cst_10 : f32 to vector<400x128xf32>
      %c0_11 = arith.constant 0 : index
      %c0_12 = arith.constant 0 : index
      %13 = vector.load %arg7[%c0_11, %c0_12] : memref<400x128xf32, #tpu.memory_space<vmem>>, vector<400x128xf32>
      tpu.vector_store %arg7[%c0_11, %c0_12], %12 {strides = array<i32>} : memref<400x128xf32, #tpu.memory_space<vmem>>, vector<400x128xf32>,
    } else {
    }
    %c0 = arith.constant 0 : index
    %c0_1 = arith.constant 0 : index
    %3 = vector.load %arg7[%c0, %c0_1] : memref<400x128xf32, #tpu.memory_space<vmem>>, vector<400x128xf32>
    %c0_2 = arith.constant 0 : index
    %c0_3 = arith.constant 0 : index
    %4 = vector.load %arg3[%c0_2, %c0_3] : memref<400x256xbf16, #tpu.memory_space<vmem>>, vector<400x256xbf16>
    %c0_4 = arith.constant 0 : index
    %c0_5 = arith.constant 0 : index
    %5 = vector.load %arg4[%c0_4, %c0_5] : memref<256x128xbf16, #tpu.memory_space<vmem>>, vector<256x128xbf16>
    %cst = arith.constant dense<0.000000e+00> : vector<400x128xf32>
    %6 = tpu.matmul %4, %5, %cst {dimension_numbers = #tpu.dot_dimension_numbers<[1], [0], [0], [1], [0, 0, 1, 1], [], []>} : vector<400x256xbf16>, vector<256x128xbf16>, vector<400x128xf32> -> vector<400x128xf32>
    %7 = arith.addf %3, %6 : vector<400x128xf32>
    %c0_6 = arith.constant 0 : index
    %c0_7 = arith.constant 0 : index
    %8 = vector.load %arg7[%c0_6, %c0_7] : memref<400x128xf32, #tpu.memory_space<vmem>>, vector<400x128xf32>
    tpu.vector_store %arg7[%c0_6, %c0_7], %7 {strides = array<i32>} : memref<400x128xf32, #tpu.memory_space<vmem>>, vector<400x128xf32>,
    %c0_i32_8 = arith.constant 0 : i32
    %9 = arith.cmpi eq, %arg2, %c0_i32_8 : i32
    %10 = arith.extui %9 : i1 to i32
    %c0_i32_9 = arith.constant 0 : i32
    %11 = arith.cmpi ne, %10, %c0_i32_9 : i32
    scf.if %11 {
      %c0_10 = arith.constant 0 : index
      %c0_11 = arith.constant 0 : index
      %12 = vector.load %arg7[%c0_10, %c0_11] : memref<400x128xf32, #tpu.memory_space<vmem>>, vector<400x128xf32>
      %c0_12 = arith.constant 0 : index
      %c0_13 = arith.constant 0 : index
      %13 = vector.load %arg5[%c0_12, %c0_13] : memref<1x128xf32, #tpu.memory_space<vmem>>, vector<1x128xf32>
      %14 = vector.broadcast %13 : vector<1x128xf32> to vector<400x128xf32>
      %15 = arith.addf %12, %14 : vector<400x128xf32>
      %cst_14 = arith.constant 0.000000e+00 : f32
      %16 = vector.broadcast %cst_14 : f32 to vector<400x128xf32>
      %17 = arith.maximumf %15, %16 : vector<400x128xf32>
      %18 = arith.truncf %17 : vector<400x128xf32> to vector<400x128xbf16>
      %c0_15 = arith.constant 0 : index
      %c0_16 = arith.constant 0 : index
      %19 = vector.load %arg6[%c0_15, %c0_16] : memref<400x128xbf16, #tpu.memory_space<vmem>>, vector<400x128xbf16>
      tpu.vector_store %arg6[%c0_15, %c0_16], %18 {strides = array<i32>} : memref<400x128xbf16, #tpu.memory_space<vmem>>, vector<400x128xbf16>,
    } else {
    }
    return
  }
  func.func @transform_0(%arg0: i32, %arg1: i32, %arg2: i32) -> (i32, i32) {
    %c0_i32 = arith.constant 0 : i32
    return %arg0, %arg2 : i32, i32
  }
  func.func @transform_1(%arg0: i32, %arg1: i32, %arg2: i32) -> (i32, i32) {
    %c0_i32 = arith.constant 0 : i32
    return %arg2, %arg1 : i32, i32
  }
  func.func @transform_2(%arg0: i32, %arg1: i32, %arg2: i32) -> (i32, i32) {
    %c0_i32 = arith.constant 0 : i32
    %c0_i32_0 = arith.constant 0 : i32
    return %c0_i32, %arg1 : i32, i32
  }
  func.func @transform_3(%arg0: i32, %arg1: i32, %arg2: i32) -> (i32, i32) {
    %c0_i32 = arith.constant 0 : i32
    return %arg0, %arg1 : i32, i32
  }
}

module attributes {stable_mosaic.version = 11 : i64} {
  func.func @_matmul_bias_act_kernel(%arg0: i32, %arg1: i32, %arg2: i32, %arg3: memref<176x512xbf16, #tpu.memory_space<vmem>>, %arg4: memref<512x128xbf16, #tpu.memory_space<vmem>>, %arg5: memref<1x128xf32, #tpu.memory_space<vmem>>, %arg6: memref<176x128xbf16, #tpu.memory_space<vmem>>, %arg7: memref<176x128xf32, #tpu.memory_space<vmem>>) attributes {dimension_semantics = [#tpu.dimension_semantics<parallel>, #tpu.dimension_semantics<parallel>, #tpu.dimension_semantics<arbitrary>], iteration_bounds = array<i64: 1, 1, 1>, scalar_prefetch = 0 : i64, scratch_operands = 1 : i64, tpu.core_type = #tpu.core_type<tc>, window_params = [{transform_indices = @transform_0, window_bounds = array<i64: 176, 512>}, {transform_indices = @transform_1, window_bounds = array<i64: 512, 128>}, {transform_indices = @transform_2, window_bounds = array<i64: 1, 128>}, {transform_indices = @transform_3, window_bounds = array<i64: 176, 128>}]} {
    %c0_i32 = arith.constant 0 : i32
    %0 = arith.cmpi eq, %arg2, %c0_i32 : i32
    %1 = arith.extui %0 : i1 to i32
    %c0_i32_0 = arith.constant 0 : i32
    %2 = arith.cmpi ne, %1, %c0_i32_0 : i32
    scf.if %2 {
      %cst_10 = arith.constant 0.000000e+00 : f32
      %12 = vector.broadcast %cst_10 : f32 to vector<176x128xf32>
      %c0_11 = arith.constant 0 : index
      %c0_12 = arith.constant 0 : index
      %13 = vector.load %arg7[%c0_11, %c0_12] : memref<176x128xf32, #tpu.memory_space<vmem>>, vector<176x128xf32>
      tpu.vector_store %arg7[%c0_11, %c0_12], %12 {strides = array<i32>} : memref<176x128xf32, #tpu.memory_space<vmem>>, vector<176x128xf32>,
    } else {
    }
    %c0 = arith.constant 0 : index
    %c0_1 = arith.constant 0 : index
    %3 = vector.load %arg7[%c0, %c0_1] : memref<176x128xf32, #tpu.memory_space<vmem>>, vector<176x128xf32>
    %c0_2 = arith.constant 0 : index
    %c0_3 = arith.constant 0 : index
    %4 = vector.load %arg3[%c0_2, %c0_3] : memref<176x512xbf16, #tpu.memory_space<vmem>>, vector<176x512xbf16>
    %c0_4 = arith.constant 0 : index
    %c0_5 = arith.constant 0 : index
    %5 = vector.load %arg4[%c0_4, %c0_5] : memref<512x128xbf16, #tpu.memory_space<vmem>>, vector<512x128xbf16>
    %cst = arith.constant dense<0.000000e+00> : vector<176x128xf32>
    %6 = tpu.matmul %4, %5, %cst {dimension_numbers = #tpu.dot_dimension_numbers<[1], [0], [0], [1], [0, 0, 1, 1], [], []>} : vector<176x512xbf16>, vector<512x128xbf16>, vector<176x128xf32> -> vector<176x128xf32>
    %7 = arith.addf %3, %6 : vector<176x128xf32>
    %c0_6 = arith.constant 0 : index
    %c0_7 = arith.constant 0 : index
    %8 = vector.load %arg7[%c0_6, %c0_7] : memref<176x128xf32, #tpu.memory_space<vmem>>, vector<176x128xf32>
    tpu.vector_store %arg7[%c0_6, %c0_7], %7 {strides = array<i32>} : memref<176x128xf32, #tpu.memory_space<vmem>>, vector<176x128xf32>,
    %c0_i32_8 = arith.constant 0 : i32
    %9 = arith.cmpi eq, %arg2, %c0_i32_8 : i32
    %10 = arith.extui %9 : i1 to i32
    %c0_i32_9 = arith.constant 0 : i32
    %11 = arith.cmpi ne, %10, %c0_i32_9 : i32
    scf.if %11 {
      %c0_10 = arith.constant 0 : index
      %c0_11 = arith.constant 0 : index
      %12 = vector.load %arg7[%c0_10, %c0_11] : memref<176x128xf32, #tpu.memory_space<vmem>>, vector<176x128xf32>
      %c0_12 = arith.constant 0 : index
      %c0_13 = arith.constant 0 : index
      %13 = vector.load %arg5[%c0_12, %c0_13] : memref<1x128xf32, #tpu.memory_space<vmem>>, vector<1x128xf32>
      %14 = vector.broadcast %13 : vector<1x128xf32> to vector<176x128xf32>
      %15 = arith.addf %12, %14 : vector<176x128xf32>
      %cst_14 = arith.constant 0.000000e+00 : f32
      %16 = vector.broadcast %cst_14 : f32 to vector<176x128xf32>
      %17 = arith.maximumf %15, %16 : vector<176x128xf32>
      %18 = arith.truncf %17 : vector<176x128xf32> to vector<176x128xbf16>
      %c0_15 = arith.constant 0 : index
      %c0_16 = arith.constant 0 : index
      %19 = vector.load %arg6[%c0_15, %c0_16] : memref<176x128xbf16, #tpu.memory_space<vmem>>, vector<176x128xbf16>
      tpu.vector_store %arg6[%c0_15, %c0_16], %18 {strides = array<i32>} : memref<176x128xbf16, #tpu.memory_space<vmem>>, vector<176x128xbf16>,
    } else {
    }
    return
  }
  func.func @transform_0(%arg0: i32, %arg1: i32, %arg2: i32) -> (i32, i32) {
    %c0_i32 = arith.constant 0 : i32
    return %arg0, %arg2 : i32, i32
  }
  func.func @transform_1(%arg0: i32, %arg1: i32, %arg2: i32) -> (i32, i32) {
    %c0_i32 = arith.constant 0 : i32
    return %arg2, %arg1 : i32, i32
  }
  func.func @transform_2(%arg0: i32, %arg1: i32, %arg2: i32) -> (i32, i32) {
    %c0_i32 = arith.constant 0 : i32
    %c0_i32_0 = arith.constant 0 : i32
    return %c0_i32, %arg1 : i32, i32
  }
  func.func @transform_3(%arg0: i32, %arg1: i32, %arg2: i32) -> (i32, i32) {
    %c0_i32 = arith.constant 0 : i32
    return %arg0, %arg1 : i32, i32
  }
}

module attributes {stable_mosaic.version = 11 : i64} {
  func.func @_matmul_bias_act_kernel(%arg0: i32, %arg1: i32, %arg2: i32, %arg3: memref<112x640xbf16, #tpu.memory_space<vmem>>, %arg4: memref<640x128xbf16, #tpu.memory_space<vmem>>, %arg5: memref<1x128xf32, #tpu.memory_space<vmem>>, %arg6: memref<112x128xbf16, #tpu.memory_space<vmem>>, %arg7: memref<112x128xf32, #tpu.memory_space<vmem>>) attributes {dimension_semantics = [#tpu.dimension_semantics<parallel>, #tpu.dimension_semantics<parallel>, #tpu.dimension_semantics<arbitrary>], iteration_bounds = array<i64: 1, 1, 1>, scalar_prefetch = 0 : i64, scratch_operands = 1 : i64, tpu.core_type = #tpu.core_type<tc>, window_params = [{transform_indices = @transform_0, window_bounds = array<i64: 112, 640>}, {transform_indices = @transform_1, window_bounds = array<i64: 640, 128>}, {transform_indices = @transform_2, window_bounds = array<i64: 1, 128>}, {transform_indices = @transform_3, window_bounds = array<i64: 112, 128>}]} {
    %c0_i32 = arith.constant 0 : i32
    %0 = arith.cmpi eq, %arg2, %c0_i32 : i32
    %1 = arith.extui %0 : i1 to i32
    %c0_i32_0 = arith.constant 0 : i32
    %2 = arith.cmpi ne, %1, %c0_i32_0 : i32
    scf.if %2 {
      %cst_10 = arith.constant 0.000000e+00 : f32
      %12 = vector.broadcast %cst_10 : f32 to vector<112x128xf32>
      %c0_11 = arith.constant 0 : index
      %c0_12 = arith.constant 0 : index
      %13 = vector.load %arg7[%c0_11, %c0_12] : memref<112x128xf32, #tpu.memory_space<vmem>>, vector<112x128xf32>
      tpu.vector_store %arg7[%c0_11, %c0_12], %12 {strides = array<i32>} : memref<112x128xf32, #tpu.memory_space<vmem>>, vector<112x128xf32>,
    } else {
    }
    %c0 = arith.constant 0 : index
    %c0_1 = arith.constant 0 : index
    %3 = vector.load %arg7[%c0, %c0_1] : memref<112x128xf32, #tpu.memory_space<vmem>>, vector<112x128xf32>
    %c0_2 = arith.constant 0 : index
    %c0_3 = arith.constant 0 : index
    %4 = vector.load %arg3[%c0_2, %c0_3] : memref<112x640xbf16, #tpu.memory_space<vmem>>, vector<112x640xbf16>
    %c0_4 = arith.constant 0 : index
    %c0_5 = arith.constant 0 : index
    %5 = vector.load %arg4[%c0_4, %c0_5] : memref<640x128xbf16, #tpu.memory_space<vmem>>, vector<640x128xbf16>
    %cst = arith.constant dense<0.000000e+00> : vector<112x128xf32>
    %6 = tpu.matmul %4, %5, %cst {dimension_numbers = #tpu.dot_dimension_numbers<[1], [0], [0], [1], [0, 0, 1, 1], [], []>} : vector<112x640xbf16>, vector<640x128xbf16>, vector<112x128xf32> -> vector<112x128xf32>
    %7 = arith.addf %3, %6 : vector<112x128xf32>
    %c0_6 = arith.constant 0 : index
    %c0_7 = arith.constant 0 : index
    %8 = vector.load %arg7[%c0_6, %c0_7] : memref<112x128xf32, #tpu.memory_space<vmem>>, vector<112x128xf32>
    tpu.vector_store %arg7[%c0_6, %c0_7], %7 {strides = array<i32>} : memref<112x128xf32, #tpu.memory_space<vmem>>, vector<112x128xf32>,
    %c0_i32_8 = arith.constant 0 : i32
    %9 = arith.cmpi eq, %arg2, %c0_i32_8 : i32
    %10 = arith.extui %9 : i1 to i32
    %c0_i32_9 = arith.constant 0 : i32
    %11 = arith.cmpi ne, %10, %c0_i32_9 : i32
    scf.if %11 {
      %c0_10 = arith.constant 0 : index
      %c0_11 = arith.constant 0 : index
      %12 = vector.load %arg7[%c0_10, %c0_11] : memref<112x128xf32, #tpu.memory_space<vmem>>, vector<112x128xf32>
      %c0_12 = arith.constant 0 : index
      %c0_13 = arith.constant 0 : index
      %13 = vector.load %arg5[%c0_12, %c0_13] : memref<1x128xf32, #tpu.memory_space<vmem>>, vector<1x128xf32>
      %14 = vector.broadcast %13 : vector<1x128xf32> to vector<112x128xf32>
      %15 = arith.addf %12, %14 : vector<112x128xf32>
      %cst_14 = arith.constant 0.000000e+00 : f32
      %16 = vector.broadcast %cst_14 : f32 to vector<112x128xf32>
      %17 = arith.maximumf %15, %16 : vector<112x128xf32>
      %18 = arith.truncf %17 : vector<112x128xf32> to vector<112x128xbf16>
      %c0_15 = arith.constant 0 : index
      %c0_16 = arith.constant 0 : index
      %19 = vector.load %arg6[%c0_15, %c0_16] : memref<112x128xbf16, #tpu.memory_space<vmem>>, vector<112x128xbf16>
      tpu.vector_store %arg6[%c0_15, %c0_16], %18 {strides = array<i32>} : memref<112x128xbf16, #tpu.memory_space<vmem>>, vector<112x128xbf16>,
    } else {
    }
    return
  }
  func.func @transform_0(%arg0: i32, %arg1: i32, %arg2: i32) -> (i32, i32) {
    %c0_i32 = arith.constant 0 : i32
    return %arg0, %arg2 : i32, i32
  }
  func.func @transform_1(%arg0: i32, %arg1: i32, %arg2: i32) -> (i32, i32) {
    %c0_i32 = arith.constant 0 : i32
    return %arg2, %arg1 : i32, i32
  }
  func.func @transform_2(%arg0: i32, %arg1: i32, %arg2: i32) -> (i32, i32) {
    %c0_i32 = arith.constant 0 : i32
    %c0_i32_0 = arith.constant 0 : i32
    return %c0_i32, %arg1 : i32, i32
  }
  func.func @transform_3(%arg0: i32, %arg1: i32, %arg2: i32) -> (i32, i32) {
    %c0_i32 = arith.constant 0 : i32
    return %arg0, %arg1 : i32, i32
  }
}

module attributes {stable_mosaic.version = 11 : i64} {
  func.func @_matmul_bias_act_kernel(%arg0: i32, %arg1: i32, %arg2: i32, %arg3: memref<16x640xbf16, #tpu.memory_space<vmem>>, %arg4: memref<640x256xbf16, #tpu.memory_space<vmem>>, %arg5: memref<1x256xf32, #tpu.memory_space<vmem>>, %arg6: memref<16x256xbf16, #tpu.memory_space<vmem>>, %arg7: memref<16x256xf32, #tpu.memory_space<vmem>>) attributes {dimension_semantics = [#tpu.dimension_semantics<parallel>, #tpu.dimension_semantics<parallel>, #tpu.dimension_semantics<arbitrary>], iteration_bounds = array<i64: 1, 2, 5>, scalar_prefetch = 0 : i64, scratch_operands = 1 : i64, tpu.core_type = #tpu.core_type<tc>, window_params = [{transform_indices = @transform_0, window_bounds = array<i64: 16, 640>}, {transform_indices = @transform_1, window_bounds = array<i64: 640, 256>}, {transform_indices = @transform_2, window_bounds = array<i64: 1, 256>}, {transform_indices = @transform_3, window_bounds = array<i64: 16, 256>}]} {
    %c0_i32 = arith.constant 0 : i32
    %0 = arith.cmpi eq, %arg2, %c0_i32 : i32
    %1 = arith.extui %0 : i1 to i32
    %c0_i32_0 = arith.constant 0 : i32
    %2 = arith.cmpi ne, %1, %c0_i32_0 : i32
    scf.if %2 {
      %cst_9 = arith.constant 0.000000e+00 : f32
      %12 = vector.broadcast %cst_9 : f32 to vector<16x256xf32>
      %c0_10 = arith.constant 0 : index
      %c0_11 = arith.constant 0 : index
      %13 = vector.load %arg7[%c0_10, %c0_11] : memref<16x256xf32, #tpu.memory_space<vmem>>, vector<16x256xf32>
      tpu.vector_store %arg7[%c0_10, %c0_11], %12 {strides = array<i32>} : memref<16x256xf32, #tpu.memory_space<vmem>>, vector<16x256xf32>,
    } else {
    }
    %c0 = arith.constant 0 : index
    %c0_1 = arith.constant 0 : index
    %3 = vector.load %arg7[%c0, %c0_1] : memref<16x256xf32, #tpu.memory_space<vmem>>, vector<16x256xf32>
    %c0_2 = arith.constant 0 : index
    %c0_3 = arith.constant 0 : index
    %4 = vector.load %arg3[%c0_2, %c0_3] : memref<16x640xbf16, #tpu.memory_space<vmem>>, vector<16x640xbf16>
    %c0_4 = arith.constant 0 : index
    %c0_5 = arith.constant 0 : index
    %5 = vector.load %arg4[%c0_4, %c0_5] : memref<640x256xbf16, #tpu.memory_space<vmem>>, vector<640x256xbf16>
    %cst = arith.constant dense<0.000000e+00> : vector<16x256xf32>
    %6 = tpu.matmul %4, %5, %cst {dimension_numbers = #tpu.dot_dimension_numbers<[1], [0], [0], [1], [0, 0, 1, 1], [], []>} : vector<16x640xbf16>, vector<640x256xbf16>, vector<16x256xf32> -> vector<16x256xf32>
    %7 = arith.addf %3, %6 : vector<16x256xf32>
    %c0_6 = arith.constant 0 : index
    %c0_7 = arith.constant 0 : index
    %8 = vector.load %arg7[%c0_6, %c0_7] : memref<16x256xf32, #tpu.memory_space<vmem>>, vector<16x256xf32>
    tpu.vector_store %arg7[%c0_6, %c0_7], %7 {strides = array<i32>} : memref<16x256xf32, #tpu.memory_space<vmem>>, vector<16x256xf32>,
    %c4_i32 = arith.constant 4 : i32
    %9 = arith.cmpi eq, %arg2, %c4_i32 : i32
    %10 = arith.extui %9 : i1 to i32
    %c0_i32_8 = arith.constant 0 : i32
    %11 = arith.cmpi ne, %10, %c0_i32_8 : i32
    scf.if %11 {
      %c0_9 = arith.constant 0 : index
      %c0_10 = arith.constant 0 : index
      %12 = vector.load %arg7[%c0_9, %c0_10] : memref<16x256xf32, #tpu.memory_space<vmem>>, vector<16x256xf32>
      %c0_11 = arith.constant 0 : index
      %c0_12 = arith.constant 0 : index
      %13 = vector.load %arg5[%c0_11, %c0_12] : memref<1x256xf32, #tpu.memory_space<vmem>>, vector<1x256xf32>
      %14 = vector.broadcast %13 : vector<1x256xf32> to vector<16x256xf32>
      %15 = arith.addf %12, %14 : vector<16x256xf32>
      %cst_13 = arith.constant 0.000000e+00 : f32
      %16 = vector.broadcast %cst_13 : f32 to vector<16x256xf32>
      %17 = arith.maximumf %15, %16 : vector<16x256xf32>
      %18 = arith.truncf %17 : vector<16x256xf32> to vector<16x256xbf16>
      %c0_14 = arith.constant 0 : index
      %c0_15 = arith.constant 0 : index
      %19 = vector.load %arg6[%c0_14, %c0_15] : memref<16x256xbf16, #tpu.memory_space<vmem>>, vector<16x256xbf16>
      tpu.vector_store %arg6[%c0_14, %c0_15], %18 {strides = array<i32>} : memref<16x256xbf16, #tpu.memory_space<vmem>>, vector<16x256xbf16>,
    } else {
    }
    return
  }
  func.func @transform_0(%arg0: i32, %arg1: i32, %arg2: i32) -> (i32, i32) {
    %c0_i32 = arith.constant 0 : i32
    return %arg0, %arg2 : i32, i32
  }
  func.func @transform_1(%arg0: i32, %arg1: i32, %arg2: i32) -> (i32, i32) {
    %c0_i32 = arith.constant 0 : i32
    return %arg2, %arg1 : i32, i32
  }
  func.func @transform_2(%arg0: i32, %arg1: i32, %arg2: i32) -> (i32, i32) {
    %c0_i32 = arith.constant 0 : i32
    %c0_i32_0 = arith.constant 0 : i32
    return %c0_i32, %arg1 : i32, i32
  }
  func.func @transform_3(%arg0: i32, %arg1: i32, %arg2: i32) -> (i32, i32) {
    %c0_i32 = arith.constant 0 : i32
    return %arg0, %arg1 : i32, i32
  }
}

module attributes {stable_mosaic.version = 11 : i64} {
  func.func @_matmul_bias_act_kernel(%arg0: i32, %arg1: i32, %arg2: i32, %arg3: memref<16x512xbf16, #tpu.memory_space<vmem>>, %arg4: memref<512x128xbf16, #tpu.memory_space<vmem>>, %arg5: memref<1x128xf32, #tpu.memory_space<vmem>>, %arg6: memref<16x128xf32, #tpu.memory_space<vmem>>, %arg7: memref<16x128xf32, #tpu.memory_space<vmem>>) attributes {dimension_semantics = [#tpu.dimension_semantics<parallel>, #tpu.dimension_semantics<parallel>, #tpu.dimension_semantics<arbitrary>], iteration_bounds = array<i64: 1, 1, 1>, scalar_prefetch = 0 : i64, scratch_operands = 1 : i64, tpu.core_type = #tpu.core_type<tc>, window_params = [{transform_indices = @transform_0, window_bounds = array<i64: 16, 512>}, {transform_indices = @transform_1, window_bounds = array<i64: 512, 128>}, {transform_indices = @transform_2, window_bounds = array<i64: 1, 128>}, {transform_indices = @transform_3, window_bounds = array<i64: 16, 128>}]} {
    %c0_i32 = arith.constant 0 : i32
    %0 = arith.cmpi eq, %arg2, %c0_i32 : i32
    %1 = arith.extui %0 : i1 to i32
    %c0_i32_0 = arith.constant 0 : i32
    %2 = arith.cmpi ne, %1, %c0_i32_0 : i32
    scf.if %2 {
      %cst_10 = arith.constant 0.000000e+00 : f32
      %12 = vector.broadcast %cst_10 : f32 to vector<16x128xf32>
      %c0_11 = arith.constant 0 : index
      %c0_12 = arith.constant 0 : index
      %13 = vector.load %arg7[%c0_11, %c0_12] : memref<16x128xf32, #tpu.memory_space<vmem>>, vector<16x128xf32>
      tpu.vector_store %arg7[%c0_11, %c0_12], %12 {strides = array<i32>} : memref<16x128xf32, #tpu.memory_space<vmem>>, vector<16x128xf32>,
    } else {
    }
    %c0 = arith.constant 0 : index
    %c0_1 = arith.constant 0 : index
    %3 = vector.load %arg7[%c0, %c0_1] : memref<16x128xf32, #tpu.memory_space<vmem>>, vector<16x128xf32>
    %c0_2 = arith.constant 0 : index
    %c0_3 = arith.constant 0 : index
    %4 = vector.load %arg3[%c0_2, %c0_3] : memref<16x512xbf16, #tpu.memory_space<vmem>>, vector<16x512xbf16>
    %c0_4 = arith.constant 0 : index
    %c0_5 = arith.constant 0 : index
    %5 = vector.load %arg4[%c0_4, %c0_5] : memref<512x128xbf16, #tpu.memory_space<vmem>>, vector<512x128xbf16>
    %cst = arith.constant dense<0.000000e+00> : vector<16x128xf32>
    %6 = tpu.matmul %4, %5, %cst {dimension_numbers = #tpu.dot_dimension_numbers<[1], [0], [0], [1], [0, 0, 1, 1], [], []>} : vector<16x512xbf16>, vector<512x128xbf16>, vector<16x128xf32> -> vector<16x128xf32>
    %7 = arith.addf %3, %6 : vector<16x128xf32>
    %c0_6 = arith.constant 0 : index
    %c0_7 = arith.constant 0 : index
    %8 = vector.load %arg7[%c0_6, %c0_7] : memref<16x128xf32, #tpu.memory_space<vmem>>, vector<16x128xf32>
    tpu.vector_store %arg7[%c0_6, %c0_7], %7 {strides = array<i32>} : memref<16x128xf32, #tpu.memory_space<vmem>>, vector<16x128xf32>,
    %c0_i32_8 = arith.constant 0 : i32
    %9 = arith.cmpi eq, %arg2, %c0_i32_8 : i32
    %10 = arith.extui %9 : i1 to i32
    %c0_i32_9 = arith.constant 0 : i32
    %11 = arith.cmpi ne, %10, %c0_i32_9 : i32
    scf.if %11 {
      %c0_10 = arith.constant 0 : index
      %c0_11 = arith.constant 0 : index
      %12 = vector.load %arg7[%c0_10, %c0_11] : memref<16x128xf32, #tpu.memory_space<vmem>>, vector<16x128xf32>
      %c0_12 = arith.constant 0 : index
      %c0_13 = arith.constant 0 : index
      %13 = vector.load %arg5[%c0_12, %c0_13] : memref<1x128xf32, #tpu.memory_space<vmem>>, vector<1x128xf32>
      %14 = vector.broadcast %13 : vector<1x128xf32> to vector<16x128xf32>
      %15 = arith.addf %12, %14 : vector<16x128xf32>
      %c0_14 = arith.constant 0 : index
      %c0_15 = arith.constant 0 : index
      %16 = vector.load %arg6[%c0_14, %c0_15] : memref<16x128xf32, #tpu.memory_space<vmem>>, vector<16x128xf32>
      tpu.vector_store %arg6[%c0_14, %c0_15], %15 {strides = array<i32>} : memref<16x128xf32, #tpu.memory_space<vmem>>, vector<16x128xf32>,
    } else {
    }
    return
  }
  func.func @transform_0(%arg0: i32, %arg1: i32, %arg2: i32) -> (i32, i32) {
    %c0_i32 = arith.constant 0 : i32
    return %arg0, %arg2 : i32, i32
  }
  func.func @transform_1(%arg0: i32, %arg1: i32, %arg2: i32) -> (i32, i32) {
    %c0_i32 = arith.constant 0 : i32
    return %arg2, %arg1 : i32, i32
  }
  func.func @transform_2(%arg0: i32, %arg1: i32, %arg2: i32) -> (i32, i32) {
    %c0_i32 = arith.constant 0 : i32
    %c0_i32_0 = arith.constant 0 : i32
    return %c0_i32, %arg1 : i32, i32
  }
  func.func @transform_3(%arg0: i32, %arg1: i32, %arg2: i32) -> (i32, i32) {
    %c0_i32 = arith.constant 0 : i32
    return %arg0, %arg1 : i32, i32
  }
}

</mosaic_0001>

<bundles_post_ra>
// kernel: _lambda_.5
= control target key start
LH: loop header
LB: loop body
LE: loop exit
PB: predicated region body
PF: predicated region fallthrough
CT: control target
= control target key end

     0   :  { %s2179_s12 = smov 0   ;;  %s2181_s13 = smov 0   ;;  %s2430_s0 = inlined_call_operand.vmem [shape: bf16[800,256], index: 0, kind: input, shape index: {}]   ;;  %s2431_s1 = inlined_call_operand.vmem [shape: bf16[256,128], index: 1, kind: input, shape index: {}]   ;;  %s2432_s2 = inlined_call_operand.vmem [shape: f32[1,128], index: 2, kind: input, shape index: {}]   ;;  %s2433_s3 = inlined_call_operand.vmem [shape: bf16[800,128], index: 3, kind: output, shape index: {}]  }
   0x1   :  { %s2183_s14 = smov 0  }
   0x2 LB: > { %s32_s15 = sadd.s32 1, %s2152_s13  ;;  %p1663_p0 = scmp.ge.s32.totalorder %s2156_s14, 1  ;;  %s2156_s14 = sphi %s2183_s14, %s13_s14   ;;  %s2152_s13 = sphi %s2181_s13, %s2435_s13   ;;  %s2148_s12 = sphi %s2179_s12, %s2434_s12  }
   0x3   : > { %p34_p1 = scmp.ge.s32.totalorder %s32_s15, 2  ;;  %p191_p2 = scmp.lt.s32.totalorder %s2156_s14, 3 }
   0x5   : > { %s2437_s15 = smov (%p34_p1, %s32_s15), 0  ;;  %p192_p3 = pnand %p1663_p0, %p191_p2 }
   0x6   : > { %s234_s18 = smul.u32 (!%p192_p3), 50, %s2148_s12 }
   0x7   : > { %195 = sbr.rel (%p192_p3) target bundleno = 377 (0x179), region = 32 }
   0x8   : > { %p236_p4 = scmp.lt.s32.totalorder (!%p192_p3), %s234_s18, 99 }
   0xc   : > { %v2043_v0 = vld [vmem:[%s2431_s1 + $0x38] sm:$0xff]   ;;  %v2158_v1 = vmov 0   ;;  %v2044_v2 = vld [vmem:[%s2431_s1 + $0x30] sm:$0xff]   ;;  %v2045_v3 = vld [vmem:[%s2431_s1 + $0x28] sm:$0xff]   ;;  %s2439_s18 = smov (!%p236_p4, %s234_s18), 99 }
   0xd   : > { %800 = vmatprep.subr.bf16.mxu0 %v2158_v1  ;;  %1986 = vmatprep.subr.bf16.mxu1 %v2158_v1  ;;  %v2046_v4 = vld [vmem:[%s2431_s1 + $0x20] sm:$0xff]   ;;  %s1786_s25 = sshll.u32 %s2439_s18, 3  ;;  %v2047_v5 = vld [vmem:[%s2431_s1 + $0x18] sm:$0xff]   ;;  %v2048_v7 = vld [vmem:[%s2431_s1 + $0x10] sm:$0xff]   ;;  %s1666_s6 = sshll.u32 %s2439_s18, 2 }
   0xe   : > { %801 = vmatpush1.bf16.msra.mxu0 %v2043_v0  ;;  %2002 = vmatpush1.bf16.msra.mxu1 %v2043_v0  ;;  %s2226_s30 = scalar_lea.vmem %s2430_s0, %s1786_s25  ;;  %v2049_v9 = vld [vmem:[%s2431_s1 + $0x8] sm:$0xff]   ;;  %v2050_v10 = vld [vmem:[%s2431_s1] sm:$0xff]   ;;  %v2051_v11 = vld [vmem:[%s2431_s1 + $0x78] sm:$0xff]   ;;  %s2348_s8 = scalar_lea.vmem %s2433_s3, %s1666_s6 }
   0xf   : > { %802 = vmatprep.subr.bf16.mxu0 %v2158_v1  ;;  %1987 = vmatprep.subr.bf16.mxu1 %v2158_v1  ;;  %v2061_v6 = vld [vmem:[%s2226_s30 + $0x4] ss:$8 sps:$4 sm:$0xff]   ;;  %v2064_v8 = vld [vmem:[%s2226_s30 + $0xd4] ss:$8 sps:$4 sm:$0xff]   ;;  %v2059_v19 = vld [vmem:[%s2226_s30] ss:$8 sps:$4 sm:$0xff]  }
  0x10   : > { %832 = vmatprep.mubr.bf16.mxu0 %v2061_v6  ;;  %936 = vmatprep.mubr.bf16.mxu1 %v2064_v8  ;;  %v2052_v12 = vld [vmem:[%s2431_s1 + $0x70] sm:$0xff]   ;;  %v2053_v13 = vld [vmem:[%s2431_s1 + $0x68] sm:$0xff]   ;;  %v2054_v14 = vld [vmem:[%s2431_s1 + $0x60] sm:$0xff]  }
  0x11   : > { %v2055_v15 = vld [vmem:[%s2431_s1 + $0x58] sm:$0xff]   ;;  %v2056_v16 = vld [vmem:[%s2431_s1 + $0x50] sm:$0xff]   ;;  %v2057_v17 = vld [vmem:[%s2431_s1 + $0x48] sm:$0xff]  }
  0x12   : > { %803 = vmatpush1.bf16.msra.mxu0 %v2044_v2  ;;  %2003 = vmatpush1.bf16.msra.mxu1 %v2044_v2  ;;  %v2058_v18 = vld [vmem:[%s2431_s1 + $0x40] sm:$0xff]   ;;  %v2062_v20 = vld [vmem:[%s2226_s30 + $0xd0] ss:$8 sps:$4 sm:$0xff]   ;;  %v2065_v21 = vld [vmem:[%s2226_s30 + $0x14] ss:$8 sps:$4 sm:$0xff]  }
  0x13   : > { %804 = vmatprep.subr.bf16.mxu0 %v2158_v1  ;;  %1988 = vmatprep.subr.bf16.mxu1 %v2158_v1  ;;  %v2068_v22 = vld [vmem:[%s2226_s30 + $0xe4] ss:$8 sps:$4 sm:$0xff]   ;;  %v2067_v23 = vld [vmem:[%s2226_s30 + $0x10] ss:$8 sps:$4 sm:$0xff]   ;;  %v2070_v24 = vld [vmem:[%s2226_s30 + $0xe0] ss:$8 sps:$4 sm:$0xff]  }
  0x14   : > { %v2071_v25 = vld [vmem:[%s2226_s30 + $0x24] ss:$8 sps:$4 sm:$0xff]   ;;  %v2074_v26 = vld [vmem:[%s2226_s30 + $0xf4] ss:$8 sps:$4 sm:$0xff]   ;;  %v2073_v27 = vld [vmem:[%s2226_s30 + $0x20] ss:$8 sps:$4 sm:$0xff]  }
  0x15   : > { %v2076_v28 = vld [vmem:[%s2226_s30 + $0xf0] ss:$8 sps:$4 sm:$0xff]   ;;  %v2077_v29 = vld [vmem:[%s2226_s30 + $0x34] ss:$8 sps:$4 sm:$0xff]   ;;  %v2080_v30 = vld [vmem:[%s2226_s30 + $0x104] ss:$8 sps:$4 sm:$0xff]  }
  0x16   : > { %805 = vmatpush1.bf16.msra.mxu0 %v2045_v3  ;;  %2004 = vmatpush1.bf16.msra.mxu1 %v2045_v3  ;;  %v2079_v31 = vld [vmem:[%s2226_s30 + $0x30] ss:$8 sps:$4 sm:$0xff]   ;;  %v2082_v32 = vld [vmem:[%s2226_s30 + $0x100] ss:$8 sps:$4 sm:$0xff]   ;;  %v2083_v33 = vld [vmem:[%s2226_s30 + $0x44] ss:$8 sps:$4 sm:$0xff]  }
  0x17   : > { %806 = vmatprep.subr.bf16.mxu0 %v2158_v1  ;;  %1989 = vmatprep.subr.bf16.mxu1 %v2158_v1  ;;  %v2086_v34 = vld [vmem:[%s2226_s30 + $0x114] ss:$8 sps:$4 sm:$0xff]   ;;  %v2085_v35 = vld [vmem:[%s2226_s30 + $0x40] ss:$8 sps:$4 sm:$0xff]   ;;  %v2088_v36 = vld [vmem:[%s2226_s30 + $0x110] ss:$8 sps:$4 sm:$0xff]  }
  0x18   : > { %v2089_v37 = vld [vmem:[%s2226_s30 + $0x54] ss:$8 sps:$4 sm:$0xff]   ;;  %v2092_v38 = vld [vmem:[%s2226_s30 + $0x124] ss:$8 sps:$4 sm:$0xff]   ;;  %v2091_v39 = vld [vmem:[%s2226_s30 + $0x50] ss:$8 sps:$4 sm:$0xff]  }
  0x19   : > { %v2094_v40 = vld [vmem:[%s2226_s30 + $0x120] ss:$8 sps:$4 sm:$0xff]   ;;  %v2095_v41 = vld [vmem:[%s2226_s30 + $0x64] ss:$8 sps:$4 sm:$0xff]   ;;  %v2098_v42 = vld [vmem:[%s2226_s30 + $0x134] ss:$8 sps:$4 sm:$0xff]  }
  0x1a   : > { %807 = vmatpush1.bf16.msra.mxu0 %v2046_v4  ;;  %2005 = vmatpush1.bf16.msra.mxu1 %v2046_v4  ;;  %v2097_v43 = vld [vmem:[%s2226_s30 + $0x60] ss:$8 sps:$4 sm:$0xff]   ;;  %v2100_v44 = vld [vmem:[%s2226_s30 + $0x130] ss:$8 sps:$4 sm:$0xff]   ;;  %v2101_v45 = vld [vmem:[%s2226_s30 + $0x74] ss:$8 sps:$4 sm:$0xff]  }
  0x1b   : > { %808 = vmatprep.subr.bf16.mxu0 %v2158_v1  ;;  %1990 = vmatprep.subr.bf16.mxu1 %v2158_v1  ;;  %v2104_v46 = vld [vmem:[%s2226_s30 + $0x144] ss:$8 sps:$4 sm:$0xff]   ;;  %v2103_v47 = vld [vmem:[%s2226_s30 + $0x70] ss:$8 sps:$4 sm:$0xff]   ;;  %v2106_v48 = vld [vmem:[%s2226_s30 + $0x140] ss:$8 sps:$4 sm:$0xff]  }
  0x1c   : > { %v2107_v49 = vld [vmem:[%s2226_s30 + $0x84] ss:$8 sps:$4 sm:$0xff]   ;;  %v2110_v50 = vld [vmem:[%s2226_s30 + $0x154] ss:$8 sps:$4 sm:$0xff]   ;;  %v2109_v51 = vld [vmem:[%s2226_s30 + $0x80] ss:$8 sps:$4 sm:$0xff]  }
  0x1d   : > { %v2112_v52 = vld [vmem:[%s2226_s30 + $0x150] ss:$8 sps:$4 sm:$0xff]   ;;  %v2113_v53 = vld [vmem:[%s2226_s30 + $0x94] ss:$8 sps:$4 sm:$0xff]   ;;  %v2116_v54 = vld [vmem:[%s2226_s30 + $0x164] ss:$8 sps:$4 sm:$0xff]  }
  0x1e   : > { %809 = vmatpush1.bf16.msra.mxu0 %v2047_v5  ;;  %2006 = vmatpush1.bf16.msra.mxu1 %v2047_v5  ;;  %v2115_v55 = vld [vmem:[%s2226_s30 + $0x90] ss:$8 sps:$4 sm:$0xff]   ;;  %v2118_v56 = vld [vmem:[%s2226_s30 + $0x160] ss:$8 sps:$4 sm:$0xff]   ;;  %v2119_v57 = vld [vmem:[%s2226_s30 + $0xa4] ss:$8 sps:$4 sm:$0xff]  }
  0x1f   : > { %810 = vmatprep.subr.bf16.mxu0 %v2158_v1  ;;  %1991 = vmatprep.subr.bf16.mxu1 %v2158_v1  ;;  %v2122_v58 = vld [vmem:[%s2226_s30 + $0x174] ss:$8 sps:$4 sm:$0xff]   ;;  %v2121_v59 = vld [vmem:[%s2226_s30 + $0xa0] ss:$8 sps:$4 sm:$0xff]   ;;  %v2124_v60 = vld [vmem:[%s2226_s30 + $0x170] ss:$8 sps:$4 sm:$0xff]  }
  0x20   : > { %v2125_v61 = vld [vmem:[%s2226_s30 + $0xb4] ss:$8 sps:$4 sm:$0xff]   ;;  %v2128_v62 = vld [vmem:[%s2226_s30 + $0x184] ss:$8 sps:$4 sm:$0xff]   ;;  %v2127_v63 = vld [vmem:[%s2226_s30 + $0xb0] ss:$8 sps:$4 sm:$0xff]  }
  0x21   : > { %v2130_v0 = vld [vmem:[%s2226_s30 + $0x180] ss:$8 sps:$4 sm:$0xff]  }
  0x22   : > { %811 = vmatpush1.bf16.msra.mxu0 %v2048_v7  ;;  %2007 = vmatpush1.bf16.msra.mxu1 %v2048_v7  ;;  %v2133_v2 = vld [vmem:[%s2226_s30 + $0xc0] ss:$8 sps:$4 sm:$0xff]  }
  0x23   : > { %812 = vmatprep.subr.bf16.mxu0 %v2158_v1  ;;  %1992 = vmatprep.subr.bf16.mxu1 %v2158_v1  ;;  %v2338_v4 = vld [vmem:[%s2432_s2] ss:$0 sm:$0xff] }
  0x26   : > { %813 = vmatpush1.bf16.msra.mxu0 %v2049_v9  ;;  %2008 = vmatpush1.bf16.msra.mxu1 %v2049_v9 }
  0x27   : > { %814 = vmatprep.subr.bf16.mxu0 %v2158_v1  ;;  %1993 = vmatprep.subr.bf16.mxu1 %v2158_v1 }
  0x2a   : > { %815 = vmatpush1.bf16.msra.mxu0 %v2050_v10  ;;  %2009 = vmatpush1.bf16.msra.mxu1 %v2050_v10 }
  0x2b   : > { %816 = vmatprep.subr.bf16.mxu0 %v2158_v1  ;;  %1994 = vmatprep.subr.bf16.mxu1 %v2158_v1 }
  0x2e   : > { %817 = vmatpush2.bf16.msra.mxu0 %v2051_v11  ;;  %2010 = vmatpush2.bf16.msra.mxu1 %v2051_v11 }
  0x2f   : > { %818 = vmatprep.subr.bf16.mxu0 %v2158_v1  ;;  %1995 = vmatprep.subr.bf16.mxu1 %v2158_v1 }
  0x32   : > { %819 = vmatpush2.bf16.msra.mxu0 %v2052_v12  ;;  %2011 = vmatpush2.bf16.msra.mxu1 %v2052_v12 }
  0x33   : > { %820 = vmatprep.subr.bf16.mxu0 %v2158_v1  ;;  %1996 = vmatprep.subr.bf16.mxu1 %v2158_v1 }
  0x36   : > { %821 = vmatpush2.bf16.msra.mxu0 %v2053_v13  ;;  %2012 = vmatpush2.bf16.msra.mxu1 %v2053_v13 }
  0x37   : > { %822 = vmatprep.subr.bf16.mxu0 %v2158_v1  ;;  %1997 = vmatprep.subr.bf16.mxu1 %v2158_v1 }
  0x3a   : > { %823 = vmatpush2.bf16.msra.mxu0 %v2054_v14  ;;  %2013 = vmatpush2.bf16.msra.mxu1 %v2054_v14 }
  0x3b   : > { %824 = vmatprep.subr.bf16.mxu0 %v2158_v1  ;;  %1998 = vmatprep.subr.bf16.mxu1 %v2158_v1 }
  0x3e   : > { %825 = vmatpush2.bf16.msra.mxu0 %v2055_v15  ;;  %2014 = vmatpush2.bf16.msra.mxu1 %v2055_v15 }
  0x3f   : > { %826 = vmatprep.subr.bf16.mxu0 %v2158_v1  ;;  %1999 = vmatprep.subr.bf16.mxu1 %v2158_v1 }
  0x42   : > { %827 = vmatpush2.bf16.msra.mxu0 %v2056_v16  ;;  %2015 = vmatpush2.bf16.msra.mxu1 %v2056_v16 }
  0x43   : > { %828 = vmatprep.subr.bf16.mxu0 %v2158_v1  ;;  %2000 = vmatprep.subr.bf16.mxu1 %v2158_v1 }
  0x46   : > { %829 = vmatpush2.bf16.msra.mxu0 %v2057_v17  ;;  %2016 = vmatpush2.bf16.msra.mxu1 %v2057_v17 }
  0x47   : > { %830 = vmatprep.subr.bf16.mxu0 %v2158_v1  ;;  %2001 = vmatprep.subr.bf16.mxu1 %v2158_v1  ;;  %v2131_v1 = vld [vmem:[%s2226_s30 + $0xc4] ss:$8 sps:$4 sm:$0xff]  }
  0x4a   : > { %831 = vmatpush2.bf16.msra.mxu0 %v2058_v18  ;;  %2017 = vmatpush2.bf16.msra.mxu1 %v2058_v18 }
  0x4d   : > { %833 = vmatmul.mubr.bf16.vlgmr.msra.gmra.mxu0 %v2059_v19  ;;  %937 = vmatmul.mubr.bf16.vlgmr.msra.gmra.mxu1 %v2062_v20 }
  0x4e   : > { %840 = vmatprep.mubr.bf16.mxu0 %v2065_v21  ;;  %944 = vmatprep.mubr.bf16.mxu1 %v2068_v22 }
  0x55   : > { %841 = vmatmul.mubr.bf16.gmra.mxu0 %v2067_v23  ;;  %945 = vmatmul.mubr.bf16.gmra.mxu1 %v2070_v24 }
  0x56   : > { %848 = vmatprep.mubr.bf16.mxu0 %v2071_v25  ;;  %952 = vmatprep.mubr.bf16.mxu1 %v2074_v26 }
  0x5d   : > { %849 = vmatmul.mubr.bf16.gmra.mxu0 %v2073_v27  ;;  %953 = vmatmul.mubr.bf16.gmra.mxu1 %v2076_v28 }
  0x5e   : > { %856 = vmatprep.mubr.bf16.mxu0 %v2077_v29  ;;  %960 = vmatprep.mubr.bf16.mxu1 %v2080_v30 }
  0x65   : > { %857 = vmatmul.mubr.bf16.gmra.mxu0 %v2079_v31  ;;  %961 = vmatmul.mubr.bf16.gmra.mxu1 %v2082_v32 }
  0x66   : > { %864 = vmatprep.mubr.bf16.mxu0 %v2083_v33  ;;  %968 = vmatprep.mubr.bf16.mxu1 %v2086_v34 }
  0x6d   : > { %865 = vmatmul.mubr.bf16.gmra.mxu0 %v2085_v35  ;;  %969 = vmatmul.mubr.bf16.gmra.mxu1 %v2088_v36 }
  0x6e   : > { %872 = vmatprep.mubr.bf16.mxu0 %v2089_v37  ;;  %976 = vmatprep.mubr.bf16.mxu1 %v2092_v38 }
  0x75   : > { %873 = vmatmul.mubr.bf16.gmra.mxu0 %v2091_v39  ;;  %977 = vmatmul.mubr.bf16.gmra.mxu1 %v2094_v40 }
  0x76   : > { %880 = vmatprep.mubr.bf16.mxu0 %v2095_v41  ;;  %984 = vmatprep.mubr.bf16.mxu1 %v2098_v42 }
  0x7d   : > { %881 = vmatmul.mubr.bf16.gmra.mxu0 %v2097_v43  ;;  %985 = vmatmul.mubr.bf16.gmra.mxu1 %v2100_v44 }
  0x7e   : > { %888 = vmatprep.mubr.bf16.mxu0 %v2101_v45  ;;  %992 = vmatprep.mubr.bf16.mxu1 %v2104_v46 }
  0x85   : > { %889 = vmatmul.mubr.bf16.gmra.mxu0 %v2103_v47  ;;  %993 = vmatmul.mubr.bf16.gmra.mxu1 %v2106_v48 }
  0x86   : > { %896 = vmatprep.mubr.bf16.mxu0 %v2107_v49  ;;  %1000 = vmatprep.mubr.bf16.mxu1 %v2110_v50 }
  0x8d   : > { %897 = vmatmul.mubr.bf16.gmra.mxu0 %v2109_v51  ;;  %1001 = vmatmul.mubr.bf16.gmra.mxu1 %v2112_v52 }
  0x8e   : > { %904 = vmatprep.mubr.bf16.mxu0 %v2113_v53  ;;  %1008 = vmatprep.mubr.bf16.mxu1 %v2116_v54 }
  0x95   : > { %905 = vmatmul.mubr.bf16.gmra.mxu0 %v2115_v55  ;;  %1009 = vmatmul.mubr.bf16.gmra.mxu1 %v2118_v56 }
  0x96   : > { %912 = vmatprep.mubr.bf16.mxu0 %v2119_v57  ;;  %1016 = vmatprep.mubr.bf16.mxu1 %v2122_v58 }
  0x9d   : > { %913 = vmatmul.mubr.bf16.gmra.mxu0 %v2121_v59  ;;  %1017 = vmatmul.mubr.bf16.gmra.mxu1 %v2124_v60 }
  0x9e   : > { %920 = vmatprep.mubr.bf16.mxu0 %v2125_v61  ;;  %1024 = vmatprep.mubr.bf16.mxu1 %v2128_v62 }
  0xa5   : > { %921 = vmatmul.mubr.bf16.gmra.mxu0 %v2127_v63  ;;  %1025 = vmatmul.mubr.bf16.gmra.mxu1 %v2130_v0 }
  0xa6   : > { %928 = vmatprep.mubr.bf16.mxu0 %v2131_v1 }
  0xad   : > { %929 = vmatmul.mubr.bf16.gmra.mxu0 %v2133_v2 }
 0x10d   : > { %v834_v3 = vpop.f32.mrf.mxu0  ;;  %v938_v5 = vpop.f32.mrf.mxu1 }
 0x10e   : > { %v1219_v6 = vadd.f32 %v2338_v4, %v938_v5  ;;  %v1193_v9 = vadd.f32 %v2338_v4, %v834_v3 }
 0x10f   : > { %v836_v7 = vpop.f32.mrf.mxu0  ;;  %v940_v8 = vpop.f32.mrf.mxu1 }
 0x110   : > { %v1269_v12 = vmax.f32 %v1219_v6, 0.0  ;;  %v1243_v17 = vmax.f32 %v1193_v9, 0.0 }
 0x111   : > { %v837_v10 = vpop.f32.mrf.mxu0  ;;  %v941_v11 = vpop.f32.mrf.mxu1 }
 0x112   : > { %v1194_v13 = vadd.f32 %v2338_v4, %v837_v10  ;;  %v1220_v14 = vadd.f32 %v2338_v4, %v941_v11 }
 0x113   : > { %v839_v15 = vpop.f32.mrf.mxu0  ;;  %v943_v16 = vpop.f32.mrf.mxu1 }
 0x114   : > { %v1244_v18 = vmax.f32 %v1194_v13, 0.0  ;;  %v1270_v19 = vmax.f32 %v1220_v14, 0.0 }
 0x115   : > { %v842_v20 = vpop.f32.mrf.mxu0  ;;  %v946_v21 = vpop.f32.mrf.mxu1 }
 0x116   : > { %v1840_v22 = vpack.c.bf16 %v1244_v18, %v1243_v17  ;;  %v1905_v23 = vpack.c.bf16 %v1270_v19, %v1269_v12  ;;  %v1221_v24 = vadd.f32 %v2338_v4, %v946_v21  ;;  %v1195_v27 = vadd.f32 %v2338_v4, %v842_v20 }
 0x117   : > { %v844_v25 = vpop.f32.mrf.mxu0  ;;  %v948_v26 = vpop.f32.mrf.mxu1 }
 0x118   : > { %1841 = vst [vmem:[%s2348_s8] sm:$0xff] %v1840_v22   ;;  %1974 = vst [vmem:[%s2348_s8 + $0x68] sm:$0xff] %v1905_v23   ;;  %v1271_v30 = vmax.f32 %v1221_v24, 0.0  ;;  %v1245_v35 = vmax.f32 %v1195_v27, 0.0 }
 0x119   : > { %v845_v28 = vpop.f32.mrf.mxu0  ;;  %v949_v29 = vpop.f32.mrf.mxu1 }
 0x11a   : > { %v1196_v31 = vadd.f32 %v2338_v4, %v845_v28  ;;  %v1222_v32 = vadd.f32 %v2338_v4, %v949_v29 }
 0x11b   : > { %v847_v33 = vpop.f32.mrf.mxu0  ;;  %v951_v34 = vpop.f32.mrf.mxu1 }
 0x11c   : > { %v1246_v36 = vmax.f32 %v1196_v31, 0.0  ;;  %v1272_v37 = vmax.f32 %v1222_v32, 0.0 }
 0x11d   : > { %v850_v38 = vpop.f32.mrf.mxu0  ;;  %v954_v39 = vpop.f32.mrf.mxu1 }
 0x11e   : > { %v1845_v40 = vpack.c.bf16 %v1246_v36, %v1245_v35  ;;  %v1910_v41 = vpack.c.bf16 %v1272_v37, %v1271_v30  ;;  %v1223_v42 = vadd.f32 %v2338_v4, %v954_v39  ;;  %v1197_v45 = vadd.f32 %v2338_v4, %v850_v38 }
 0x11f   : > { %v852_v43 = vpop.f32.mrf.mxu0  ;;  %v956_v44 = vpop.f32.mrf.mxu1 }
 0x120   : > { %1962 = vst [vmem:[%s2348_s8 + $0x8] sm:$0xff] %v1845_v40   ;;  %1975 = vst [vmem:[%s2348_s8 + $0x70] sm:$0xff] %v1910_v41   ;;  %v1273_v48 = vmax.f32 %v1223_v42, 0.0  ;;  %v1247_v53 = vmax.f32 %v1197_v45, 0.0 }
 0x121   : > { %v853_v46 = vpop.f32.mrf.mxu0  ;;  %v957_v47 = vpop.f32.mrf.mxu1 }
 0x122   : > { %v1198_v49 = vadd.f32 %v2338_v4, %v853_v46  ;;  %v1224_v50 = vadd.f32 %v2338_v4, %v957_v47 }
 0x123   : > { %v855_v51 = vpop.f32.mrf.mxu0  ;;  %v959_v52 = vpop.f32.mrf.mxu1 }
 0x124   : > { %v1248_v54 = vmax.f32 %v1198_v49, 0.0  ;;  %v1274_v55 = vmax.f32 %v1224_v50, 0.0 }
 0x125   : > { %v858_v56 = vpop.f32.mrf.mxu0  ;;  %v962_v57 = vpop.f32.mrf.mxu1 }
 0x126   : > { %v1850_v58 = vpack.c.bf16 %v1248_v54, %v1247_v53  ;;  %v1915_v59 = vpack.c.bf16 %v1274_v55, %v1273_v48  ;;  %v1225_v60 = vadd.f32 %v2338_v4, %v962_v57  ;;  %v1199_v63 = vadd.f32 %v2338_v4, %v858_v56 }
 0x127   : > { %v860_v61 = vpop.f32.mrf.mxu0  ;;  %v964_v62 = vpop.f32.mrf.mxu1 }
 0x128   : > { %1963 = vst [vmem:[%s2348_s8 + $0x10] sm:$0xff] %v1850_v58   ;;  %1976 = vst [vmem:[%s2348_s8 + $0x78] sm:$0xff] %v1915_v59   ;;  %v1275_v2 = vmax.f32 %v1225_v60, 0.0  ;;  %v1249_v8 = vmax.f32 %v1199_v63, 0.0 }
 0x129   : > { %v861_v0 = vpop.f32.mrf.mxu0  ;;  %v965_v1 = vpop.f32.mrf.mxu1 }
 0x12a   : > { %v1200_v3 = vadd.f32 %v2338_v4, %v861_v0  ;;  %v1226_v5 = vadd.f32 %v2338_v4, %v965_v1 }
 0x12b   : > { %v863_v6 = vpop.f32.mrf.mxu0  ;;  %v967_v7 = vpop.f32.mrf.mxu1 }
 0x12c   : > { %v1250_v9 = vmax.f32 %v1200_v3, 0.0  ;;  %v1276_v10 = vmax.f32 %v1226_v5, 0.0 }
 0x12d   : > { %v866_v11 = vpop.f32.mrf.mxu0  ;;  %v970_v12 = vpop.f32.mrf.mxu1 }
 0x12e   : > { %v1855_v13 = vpack.c.bf16 %v1250_v9, %v1249_v8  ;;  %v1920_v14 = vpack.c.bf16 %v1276_v10, %v1275_v2  ;;  %v1227_v15 = vadd.f32 %v2338_v4, %v970_v12  ;;  %v1201_v18 = vadd.f32 %v2338_v4, %v866_v11 }
 0x12f   : > { %v868_v16 = vpop.f32.mrf.mxu0  ;;  %v972_v17 = vpop.f32.mrf.mxu1 }
 0x130   : > { %1964 = vst [vmem:[%s2348_s8 + $0x18] sm:$0xff] %v1855_v13   ;;  %1977 = vst [vmem:[%s2348_s8 + $0x80] sm:$0xff] %v1920_v14   ;;  %v1277_v21 = vmax.f32 %v1227_v15, 0.0  ;;  %v1251_v26 = vmax.f32 %v1201_v18, 0.0 }
 0x131   : > { %v869_v19 = vpop.f32.mrf.mxu0  ;;  %v973_v20 = vpop.f32.mrf.mxu1 }
 0x132   : > { %v1202_v22 = vadd.f32 %v2338_v4, %v869_v19  ;;  %v1228_v23 = vadd.f32 %v2338_v4, %v973_v20 }
 0x133   : > { %v871_v24 = vpop.f32.mrf.mxu0  ;;  %v975_v25 = vpop.f32.mrf.mxu1 }
 0x134   : > { %v1252_v27 = vmax.f32 %v1202_v22, 0.0  ;;  %v1278_v28 = vmax.f32 %v1228_v23, 0.0 }
 0x135   : > { %v874_v29 = vpop.f32.mrf.mxu0  ;;  %v978_v30 = vpop.f32.mrf.mxu1 }
 0x136   : > { %v1860_v31 = vpack.c.bf16 %v1252_v27, %v1251_v26  ;;  %v1925_v32 = vpack.c.bf16 %v1278_v28, %v1277_v21  ;;  %v1229_v33 = vadd.f32 %v2338_v4, %v978_v30  ;;  %v1203_v36 = vadd.f32 %v2338_v4, %v874_v29 }
 0x137   : > { %v876_v34 = vpop.f32.mrf.mxu0  ;;  %v980_v35 = vpop.f32.mrf.mxu1 }
 0x138   : > { %1965 = vst [vmem:[%s2348_s8 + $0x20] sm:$0xff] %v1860_v31   ;;  %1978 = vst [vmem:[%s2348_s8 + $0x88] sm:$0xff] %v1925_v32   ;;  %v1279_v39 = vmax.f32 %v1229_v33, 0.0  ;;  %v1253_v44 = vmax.f32 %v1203_v36, 0.0 }
 0x139   : > { %v877_v37 = vpop.f32.mrf.mxu0  ;;  %v981_v38 = vpop.f32.mrf.mxu1 }
 0x13a   : > { %v1204_v40 = vadd.f32 %v2338_v4, %v877_v37  ;;  %v1230_v41 = vadd.f32 %v2338_v4, %v981_v38 }
 0x13b   : > { %v879_v42 = vpop.f32.mrf.mxu0  ;;  %v983_v43 = vpop.f32.mrf.mxu1 }
 0x13c   : > { %v1254_v45 = vmax.f32 %v1204_v40, 0.0  ;;  %v1280_v46 = vmax.f32 %v1230_v41, 0.0 }
 0x13d   : > { %v882_v47 = vpop.f32.mrf.mxu0  ;;  %v986_v48 = vpop.f32.mrf.mxu1 }
 0x13e   : > { %v1865_v49 = vpack.c.bf16 %v1254_v45, %v1253_v44  ;;  %v1930_v50 = vpack.c.bf16 %v1280_v46, %v1279_v39  ;;  %v1231_v51 = vadd.f32 %v2338_v4, %v986_v48  ;;  %v1205_v54 = vadd.f32 %v2338_v4, %v882_v47 }
 0x13f   : > { %v884_v52 = vpop.f32.mrf.mxu0  ;;  %v988_v53 = vpop.f32.mrf.mxu1 }
 0x140   : > { %1966 = vst [vmem:[%s2348_s8 + $0x28] sm:$0xff] %v1865_v49   ;;  %1979 = vst [vmem:[%s2348_s8 + $0x90] sm:$0xff] %v1930_v50   ;;  %v1281_v57 = vmax.f32 %v1231_v51, 0.0  ;;  %v1255_v62 = vmax.f32 %v1205_v54, 0.0 }
 0x141   : > { %v885_v55 = vpop.f32.mrf.mxu0  ;;  %v989_v56 = vpop.f32.mrf.mxu1 }
 0x142   : > { %v1206_v58 = vadd.f32 %v2338_v4, %v885_v55  ;;  %v1232_v59 = vadd.f32 %v2338_v4, %v989_v56 }
 0x143   : > { %v887_v60 = vpop.f32.mrf.mxu0  ;;  %v991_v61 = vpop.f32.mrf.mxu1 }
 0x144   : > { %v1256_v63 = vmax.f32 %v1206_v58, 0.0  ;;  %v1282_v0 = vmax.f32 %v1232_v59, 0.0 }
 0x145   : > { %v890_v1 = vpop.f32.mrf.mxu0  ;;  %v994_v2 = vpop.f32.mrf.mxu1 }
 0x146   : > { %v1870_v3 = vpack.c.bf16 %v1256_v63, %v1255_v62  ;;  %v1935_v5 = vpack.c.bf16 %v1282_v0, %v1281_v57  ;;  %v1233_v6 = vadd.f32 %v2338_v4, %v994_v2  ;;  %v1207_v9 = vadd.f32 %v2338_v4, %v890_v1 }
 0x147   : > { %v892_v7 = vpop.f32.mrf.mxu0  ;;  %v996_v8 = vpop.f32.mrf.mxu1 }
 0x148   : > { %1967 = vst [vmem:[%s2348_s8 + $0x30] sm:$0xff] %v1870_v3   ;;  %1980 = vst [vmem:[%s2348_s8 + $0x98] sm:$0xff] %v1935_v5   ;;  %v1283_v12 = vmax.f32 %v1233_v6, 0.0  ;;  %v1257_v17 = vmax.f32 %v1207_v9, 0.0 }
 0x149   : > { %v893_v10 = vpop.f32.mrf.mxu0  ;;  %v997_v11 = vpop.f32.mrf.mxu1 }
 0x14a   : > { %v1208_v13 = vadd.f32 %v2338_v4, %v893_v10  ;;  %v1234_v14 = vadd.f32 %v2338_v4, %v997_v11 }
 0x14b   : > { %v895_v15 = vpop.f32.mrf.mxu0  ;;  %v999_v16 = vpop.f32.mrf.mxu1 }
 0x14c   : > { %v1258_v18 = vmax.f32 %v1208_v13, 0.0  ;;  %v1284_v19 = vmax.f32 %v1234_v14, 0.0 }
 0x14d   : > { %v898_v20 = vpop.f32.mrf.mxu0  ;;  %v1002_v21 = vpop.f32.mrf.mxu1 }
 0x14e   : > { %v1875_v22 = vpack.c.bf16 %v1258_v18, %v1257_v17  ;;  %v1940_v23 = vpack.c.bf16 %v1284_v19, %v1283_v12  ;;  %v1235_v24 = vadd.f32 %v2338_v4, %v1002_v21  ;;  %v1209_v27 = vadd.f32 %v2338_v4, %v898_v20 }
 0x14f   : > { %v900_v25 = vpop.f32.mrf.mxu0  ;;  %v1004_v26 = vpop.f32.mrf.mxu1 }
 0x150   : > { %1968 = vst [vmem:[%s2348_s8 + $0x38] sm:$0xff] %v1875_v22   ;;  %1981 = vst [vmem:[%s2348_s8 + $0xa0] sm:$0xff] %v1940_v23   ;;  %v1285_v30 = vmax.f32 %v1235_v24, 0.0  ;;  %v1259_v35 = vmax.f32 %v1209_v27, 0.0 }
 0x151   : > { %v901_v28 = vpop.f32.mrf.mxu0  ;;  %v1005_v29 = vpop.f32.mrf.mxu1 }
 0x152   : > { %v1210_v31 = vadd.f32 %v2338_v4, %v901_v28  ;;  %v1236_v32 = vadd.f32 %v2338_v4, %v1005_v29 }
 0x153   : > { %v903_v33 = vpop.f32.mrf.mxu0  ;;  %v1007_v34 = vpop.f32.mrf.mxu1 }
 0x154   : > { %v1260_v36 = vmax.f32 %v1210_v31, 0.0  ;;  %v1286_v37 = vmax.f32 %v1236_v32, 0.0 }
 0x155   : > { %v906_v38 = vpop.f32.mrf.mxu0  ;;  %v1010_v39 = vpop.f32.mrf.mxu1 }
 0x156   : > { %v1880_v40 = vpack.c.bf16 %v1260_v36, %v1259_v35  ;;  %v1945_v41 = vpack.c.bf16 %v1286_v37, %v1285_v30  ;;  %v1237_v42 = vadd.f32 %v2338_v4, %v1010_v39  ;;  %v1211_v45 = vadd.f32 %v2338_v4, %v906_v38 }
 0x157   : > { %v908_v43 = vpop.f32.mrf.mxu0  ;;  %v1012_v44 = vpop.f32.mrf.mxu1 }
 0x158   : > { %1969 = vst [vmem:[%s2348_s8 + $0x40] sm:$0xff] %v1880_v40   ;;  %1982 = vst [vmem:[%s2348_s8 + $0xa8] sm:$0xff] %v1945_v41   ;;  %v1287_v48 = vmax.f32 %v1237_v42, 0.0  ;;  %v1261_v53 = vmax.f32 %v1211_v45, 0.0 }
 0x159   : > { %v909_v46 = vpop.f32.mrf.mxu0  ;;  %v1013_v47 = vpop.f32.mrf.mxu1 }
 0x15a   : > { %v1212_v49 = vadd.f32 %v2338_v4, %v909_v46  ;;  %v1238_v50 = vadd.f32 %v2338_v4, %v1013_v47 }
 0x15b   : > { %v911_v51 = vpop.f32.mrf.mxu0  ;;  %v1015_v52 = vpop.f32.mrf.mxu1 }
 0x15c   : > { %v1262_v54 = vmax.f32 %v1212_v49, 0.0  ;;  %v1288_v55 = vmax.f32 %v1238_v50, 0.0 }
 0x15d   : > { %v914_v56 = vpop.f32.mrf.mxu0  ;;  %v1018_v57 = vpop.f32.mrf.mxu1 }
 0x15e   : > { %v1885_v58 = vpack.c.bf16 %v1262_v54, %v1261_v53  ;;  %v1950_v59 = vpack.c.bf16 %v1288_v55, %v1287_v48  ;;  %v1239_v60 = vadd.f32 %v2338_v4, %v1018_v57  ;;  %v1213_v63 = vadd.f32 %v2338_v4, %v914_v56 }
 0x15f   : > { %v916_v61 = vpop.f32.mrf.mxu0  ;;  %v1020_v62 = vpop.f32.mrf.mxu1 }
 0x160   : > { %1970 = vst [vmem:[%s2348_s8 + $0x48] sm:$0xff] %v1885_v58   ;;  %1983 = vst [vmem:[%s2348_s8 + $0xb0] sm:$0xff] %v1950_v59   ;;  %v1289_v2 = vmax.f32 %v1239_v60, 0.0  ;;  %v1263_v8 = vmax.f32 %v1213_v63, 0.0 }
 0x161   : > { %v917_v0 = vpop.f32.mrf.mxu0  ;;  %v1021_v1 = vpop.f32.mrf.mxu1 }
 0x162   : > { %v1214_v3 = vadd.f32 %v2338_v4, %v917_v0  ;;  %v1240_v5 = vadd.f32 %v2338_v4, %v1021_v1 }
 0x163   : > { %v919_v6 = vpop.f32.mrf.mxu0  ;;  %v1023_v7 = vpop.f32.mrf.mxu1 }
 0x164   : > { %v1264_v9 = vmax.f32 %v1214_v3, 0.0  ;;  %v1290_v10 = vmax.f32 %v1240_v5, 0.0 }
 0x165   : > { %v922_v11 = vpop.f32.mrf.mxu0  ;;  %v1026_v12 = vpop.f32.mrf.mxu1 }
 0x166   : > { %v1890_v13 = vpack.c.bf16 %v1264_v9, %v1263_v8  ;;  %v1955_v14 = vpack.c.bf16 %v1290_v10, %v1289_v2  ;;  %v1241_v15 = vadd.f32 %v2338_v4, %v1026_v12  ;;  %v1215_v18 = vadd.f32 %v2338_v4, %v922_v11 }
 0x167   : > { %v924_v16 = vpop.f32.mrf.mxu0  ;;  %v1028_v17 = vpop.f32.mrf.mxu1 }
 0x168   : > { %1971 = vst [vmem:[%s2348_s8 + $0x50] sm:$0xff] %v1890_v13   ;;  %1984 = vst [vmem:[%s2348_s8 + $0xb8] sm:$0xff] %v1955_v14   ;;  %v1291_v21 = vmax.f32 %v1241_v15, 0.0  ;;  %v1265_v26 = vmax.f32 %v1215_v18, 0.0 }
 0x169   : > { %v925_v19 = vpop.f32.mrf.mxu0  ;;  %v1029_v20 = vpop.f32.mrf.mxu1 }
 0x16a   : > { %v1216_v22 = vadd.f32 %v2338_v4, %v925_v19  ;;  %v1242_v23 = vadd.f32 %v2338_v4, %v1029_v20 }
 0x16b   : > { %v927_v24 = vpop.f32.mrf.mxu0  ;;  %v1031_v25 = vpop.f32.mrf.mxu1 }
 0x16c   : > { %v1266_v27 = vmax.f32 %v1216_v22, 0.0  ;;  %v1292_v28 = vmax.f32 %v1242_v23, 0.0 }
 0x16d   : > { %v930_v29 = vpop.f32.mrf.mxu0 }
 0x16e   : > { %v1895_v30 = vpack.c.bf16 %v1266_v27, %v1265_v26  ;;  %v1960_v31 = vpack.c.bf16 %v1292_v28, %v1291_v21  ;;  %v1217_v33 = vadd.f32 %v2338_v4, %v930_v29 }
 0x16f   : > { %v932_v32 = vpop.f32.mrf.mxu0 }
 0x170   : > { %1972 = vst [vmem:[%s2348_s8 + $0x58] sm:$0xff] %v1895_v30   ;;  %1985 = vst [vmem:[%s2348_s8 + $0xc0] sm:$0xff] %v1960_v31   ;;  %v1267_v37 = vmax.f32 %v1217_v33, 0.0 }
 0x171   : > { %v933_v34 = vpop.f32.mrf.mxu0 }
 0x172   : > { %v1218_v35 = vadd.f32 %v2338_v4, %v933_v34 }
 0x173   : > { %v935_v36 = vpop.f32.mrf.mxu0 }
 0x174   : > { %v1268_v38 = vmax.f32 %v1218_v35, 0.0 }
 0x176   : > { %v1900_v39 = vpack.c.bf16 %v1268_v38, %v1267_v37 }
 0x178   : > { %1973 = vst [vmem:[%s2348_s8 + $0x60] sm:$0xff] %v1900_v39  }
 0x179 PF: > { %s13_s14 = sadd.s32 1, %s2156_s14   ;;  %s2434_s12 = smov %s2152_s13 }
 0x17a   : > { %p10_p5 = scmp.ge.s32.totalorder %s13_s14, 4   ;;  %s2435_s13 = smov %s2437_s15 }
 0x17c   :  { %12 = sbr.rel (!%p10_p5) target bundleno = 2 (0x2), region = 76 }

// kernel: _lambda_.6
= control target key start
LH: loop header
LB: loop body
LE: loop exit
PB: predicated region body
PF: predicated region fallthrough
CT: control target
= control target key end

     0   :  { %s1815_s1 = inlined_call_operand.vmem [shape: bf16[512,128], index: 1, kind: input, shape index: {}]   ;;  %s1816_s0 = inlined_call_operand.vmem [shape: bf16[176,512], index: 0, kind: input, shape index: {}]   ;;  %s1817_s2 = inlined_call_operand.vmem [shape: f32[1,128], index: 2, kind: input, shape index: {}]   ;;  %s1818_s3 = inlined_call_operand.vmem [shape: bf16[176,128], index: 3, kind: output, shape index: {}]  }
   0x1   :  { %v1409_v0 = vld [vmem:[%s1815_s1 + $0x78] sm:$0xff]   ;;  %v1413_v4 = vld [vmem:[%s1815_s1 + $0x70] sm:$0xff]   ;;  %v1417_v8 = vld [vmem:[%s1815_s1 + $0x68] sm:$0xff]  }
   0x2   :  { %v1410_v1 = vld [vmem:[%s1815_s1 + $0xf8] sm:$0xff]   ;;  %1245 = vmatprep.subr.bf16.mxu0 %v1409_v0  ;;  %v1414_v5 = vld [vmem:[%s1815_s1 + $0xf0] sm:$0xff]   ;;  %v1418_v9 = vld [vmem:[%s1815_s1 + $0xe8] sm:$0xff]  }
   0x3   :  { %v1411_v2 = vld [vmem:[%s1815_s1 + $0x38] sm:$0xff]   ;;  %1327 = vmatprep.subr.bf16.mxu1 %v1410_v1  ;;  %v1415_v6 = vld [vmem:[%s1815_s1 + $0x30] sm:$0xff]   ;;  %v1419_v10 = vld [vmem:[%s1815_s1 + $0x28] sm:$0xff]  }
   0x4   :  { %v1412_v3 = vld [vmem:[%s1815_s1 + $0xb8] sm:$0xff]   ;;  %1246 = vmatpush3.bf16.msra.mxu0 %v1411_v2  ;;  %v1416_v7 = vld [vmem:[%s1815_s1 + $0xb0] sm:$0xff]   ;;  %v1420_v11 = vld [vmem:[%s1815_s1 + $0xa8] sm:$0xff]  }
   0x5   :  { %1328 = vmatpush3.bf16.msra.mxu1 %v1412_v3  ;;  %1247 = vmatprep.subr.bf16.mxu0 %v1413_v4  ;;  %v1421_v12 = vld [vmem:[%s1815_s1 + $0x60] sm:$0xff]   ;;  %v1425_v16 = vld [vmem:[%s1815_s1 + $0x58] sm:$0xff]   ;;  %v1429_v20 = vld [vmem:[%s1815_s1 + $0x50] sm:$0xff]  }
   0x6   :  { %1329 = vmatprep.subr.bf16.mxu1 %v1414_v5  ;;  %v1422_v13 = vld [vmem:[%s1815_s1 + $0xe0] sm:$0xff]   ;;  %v1426_v17 = vld [vmem:[%s1815_s1 + $0xd8] sm:$0xff]   ;;  %v1430_v21 = vld [vmem:[%s1815_s1 + $0xd0] sm:$0xff]  }
   0x7   :  { %v1423_v14 = vld [vmem:[%s1815_s1 + $0x20] sm:$0xff]   ;;  %v1427_v18 = vld [vmem:[%s1815_s1 + $0x18] sm:$0xff]   ;;  %v1431_v22 = vld [vmem:[%s1815_s1 + $0x10] sm:$0xff]  }
   0x8   :  { %1248 = vmatpush3.bf16.msra.mxu0 %v1415_v6  ;;  %v1424_v15 = vld [vmem:[%s1815_s1 + $0xa0] sm:$0xff]   ;;  %v1428_v19 = vld [vmem:[%s1815_s1 + $0x98] sm:$0xff]   ;;  %v1432_v23 = vld [vmem:[%s1815_s1 + $0x90] sm:$0xff]  }
   0x9   :  { %1330 = vmatpush3.bf16.msra.mxu1 %v1416_v7  ;;  %1249 = vmatprep.subr.bf16.mxu0 %v1417_v8  ;;  %v1433_v24 = vld [vmem:[%s1815_s1 + $0x48] sm:$0xff]   ;;  %v1437_v28 = vld [vmem:[%s1815_s1 + $0x40] sm:$0xff]  }
   0xa   :  { %1331 = vmatprep.subr.bf16.mxu1 %v1418_v9  ;;  %v1434_v25 = vld [vmem:[%s1815_s1 + $0xc8] sm:$0xff]   ;;  %v1438_v29 = vld [vmem:[%s1815_s1 + $0xc0] sm:$0xff]  }
   0xb   :  { %v1435_v26 = vld [vmem:[%s1815_s1 + $0x8] sm:$0xff]   ;;  %v1439_v30 = vld [vmem:[%s1815_s1] sm:$0xff]  }
   0xc   :  { %1250 = vmatpush3.bf16.msra.mxu0 %v1419_v10  ;;  %v1436_v27 = vld [vmem:[%s1815_s1 + $0x88] sm:$0xff]   ;;  %v1440_v31 = vld [vmem:[%s1815_s1 + $0x80] sm:$0xff]  }
   0xd   :  { %1332 = vmatpush3.bf16.msra.mxu1 %v1420_v11  ;;  %1251 = vmatprep.subr.bf16.mxu0 %v1421_v12  ;;  %v1441_v32 = vld [vmem:[%s1816_s0] ss:$16 sps:$4 sm:$0xff]   ;;  %v1443_v33 = vld [vmem:[%s1816_s0 + $0x4] ss:$16 sps:$4 sm:$0xff]   ;;  %v1444_v34 = vld [vmem:[%s1816_s0 + $0x8] ss:$16 sps:$4 sm:$0xff]  }
   0xe   :  { %1333 = vmatprep.subr.bf16.mxu1 %v1422_v13  ;;  %v1446_v35 = vld [vmem:[%s1816_s0 + $0xc] ss:$16 sps:$4 sm:$0xff]   ;;  %615 = vmatprep.mubr.bf16.mxu0 %v1443_v33  ;;  %v1447_v36 = vld [vmem:[%s1816_s0 + $0x24] ss:$16 sps:$4 sm:$0xff]   ;;  %v1451_v38 = vld [vmem:[%s1816_s0 + $0x20] ss:$16 sps:$4 sm:$0xff]  }
   0xf   :  { %736 = vmatprep.mubr.bf16.mxu1 %v1446_v35  ;;  %v1449_v37 = vld [vmem:[%s1816_s0 + $0x2c] ss:$16 sps:$4 sm:$0xff]   ;;  %v1452_v39 = vld [vmem:[%s1816_s0 + $0x28] ss:$16 sps:$4 sm:$0xff]   ;;  %v1453_v40 = vld [vmem:[%s1816_s0 + $0x44] ss:$16 sps:$4 sm:$0xff]  }
  0x10   :  { %1252 = vmatpush3.bf16.msra.mxu0 %v1423_v14  ;;  %v1455_v41 = vld [vmem:[%s1816_s0 + $0x4c] ss:$16 sps:$4 sm:$0xff]   ;;  %v1457_v42 = vld [vmem:[%s1816_s0 + $0x40] ss:$16 sps:$4 sm:$0xff]   ;;  %v1458_v43 = vld [vmem:[%s1816_s0 + $0x48] ss:$16 sps:$4 sm:$0xff]  }
  0x11   :  { %1334 = vmatpush3.bf16.msra.mxu1 %v1424_v15  ;;  %1253 = vmatprep.subr.bf16.mxu0 %v1425_v16  ;;  %v1459_v44 = vld [vmem:[%s1816_s0 + $0x64] ss:$16 sps:$4 sm:$0xff]   ;;  %v1461_v45 = vld [vmem:[%s1816_s0 + $0x6c] ss:$16 sps:$4 sm:$0xff]   ;;  %v1463_v46 = vld [vmem:[%s1816_s0 + $0x60] ss:$16 sps:$4 sm:$0xff]  }
  0x12   :  { %1335 = vmatprep.subr.bf16.mxu1 %v1426_v17  ;;  %v1464_v47 = vld [vmem:[%s1816_s0 + $0x68] ss:$16 sps:$4 sm:$0xff]   ;;  %v1465_v48 = vld [vmem:[%s1816_s0 + $0x84] ss:$16 sps:$4 sm:$0xff]   ;;  %v1467_v49 = vld [vmem:[%s1816_s0 + $0x8c] ss:$16 sps:$4 sm:$0xff]  }
  0x13   :  { %v1469_v50 = vld [vmem:[%s1816_s0 + $0x80] ss:$16 sps:$4 sm:$0xff]   ;;  %v1470_v51 = vld [vmem:[%s1816_s0 + $0x88] ss:$16 sps:$4 sm:$0xff]   ;;  %v1471_v52 = vld [vmem:[%s1816_s0 + $0xa4] ss:$16 sps:$4 sm:$0xff]  }
  0x14   :  { %1254 = vmatpush3.bf16.msra.mxu0 %v1427_v18  ;;  %v1473_v53 = vld [vmem:[%s1816_s0 + $0xac] ss:$16 sps:$4 sm:$0xff]   ;;  %v1475_v54 = vld [vmem:[%s1816_s0 + $0xa0] ss:$16 sps:$4 sm:$0xff]   ;;  %v1476_v55 = vld [vmem:[%s1816_s0 + $0xa8] ss:$16 sps:$4 sm:$0xff]  }
  0x15   :  { %1336 = vmatpush3.bf16.msra.mxu1 %v1428_v19  ;;  %1255 = vmatprep.subr.bf16.mxu0 %v1429_v20  ;;  %v1477_v56 = vld [vmem:[%s1816_s0 + $0xc4] ss:$16 sps:$4 sm:$0xff]   ;;  %v1479_v57 = vld [vmem:[%s1816_s0 + $0xcc] ss:$16 sps:$4 sm:$0xff]   ;;  %v1481_v58 = vld [vmem:[%s1816_s0 + $0xc0] ss:$16 sps:$4 sm:$0xff]  }
  0x16   :  { %1337 = vmatprep.subr.bf16.mxu1 %v1430_v21  ;;  %v1482_v59 = vld [vmem:[%s1816_s0 + $0xc8] ss:$16 sps:$4 sm:$0xff]   ;;  %v1483_v60 = vld [vmem:[%s1816_s0 + $0xe4] ss:$16 sps:$4 sm:$0xff]   ;;  %v1485_v61 = vld [vmem:[%s1816_s0 + $0xec] ss:$16 sps:$4 sm:$0xff]  }
  0x17   :  { %v1487_v62 = vld [vmem:[%s1816_s0 + $0xe0] ss:$16 sps:$4 sm:$0xff]   ;;  %v1488_v63 = vld [vmem:[%s1816_s0 + $0xe8] ss:$16 sps:$4 sm:$0xff]   ;;  %v1489_v0 = vld [vmem:[%s1816_s0 + $0x104] ss:$16 sps:$4 sm:$0xff]  }
  0x18   :  { %1256 = vmatpush3.bf16.msra.mxu0 %v1431_v22  ;;  %v1491_v1 = vld [vmem:[%s1816_s0 + $0x10c] ss:$16 sps:$4 sm:$0xff]   ;;  %v1493_v2 = vld [vmem:[%s1816_s0 + $0x100] ss:$16 sps:$4 sm:$0xff]   ;;  %v1494_v3 = vld [vmem:[%s1816_s0 + $0x108] ss:$16 sps:$4 sm:$0xff]  }
  0x19   :  { %1338 = vmatpush3.bf16.msra.mxu1 %v1432_v23  ;;  %1257 = vmatprep.subr.bf16.mxu0 %v1433_v24  ;;  %v1495_v4 = vld [vmem:[%s1816_s0 + $0x124] ss:$16 sps:$4 sm:$0xff]   ;;  %v1497_v5 = vld [vmem:[%s1816_s0 + $0x12c] ss:$16 sps:$4 sm:$0xff]   ;;  %v1499_v6 = vld [vmem:[%s1816_s0 + $0x120] ss:$16 sps:$4 sm:$0xff]  }
  0x1a   :  { %1339 = vmatprep.subr.bf16.mxu1 %v1434_v25  ;;  %v1500_v7 = vld [vmem:[%s1816_s0 + $0x128] ss:$16 sps:$4 sm:$0xff]   ;;  %v1501_v8 = vld [vmem:[%s1816_s0 + $0x144] ss:$16 sps:$4 sm:$0xff]   ;;  %v1503_v9 = vld [vmem:[%s1816_s0 + $0x14c] ss:$16 sps:$4 sm:$0xff]  }
  0x1b   :  { %v1505_v10 = vld [vmem:[%s1816_s0 + $0x140] ss:$16 sps:$4 sm:$0xff]   ;;  %v1506_v11 = vld [vmem:[%s1816_s0 + $0x148] ss:$16 sps:$4 sm:$0xff]  }
  0x1c   :  { %1258 = vmatpush3.bf16.msra.mxu0 %v1435_v26  ;;  %v1758_v22 = vld [vmem:[%s1817_s2] ss:$0 sm:$0xff] }
  0x1d   :  { %1340 = vmatpush3.bf16.msra.mxu1 %v1436_v27  ;;  %1259 = vmatprep.subr.bf16.mxu0 %v1437_v28 }
  0x1e   :  { %1341 = vmatprep.subr.bf16.mxu1 %v1438_v29 }
  0x20   :  { %1260 = vmatpush3.bf16.msra.mxu0 %v1439_v30 }
  0x21   :  { %1342 = vmatpush3.bf16.msra.mxu1 %v1440_v31 }
  0x23   :  { %616 = vmatmul.mubr.bf16.vlgmr.msra.gmra.mxu0 %v1441_v32 }
  0x24   :  { %737 = vmatmul.mubr.bf16.vlgmr.msra.gmra.mxu1 %v1444_v34  ;;  %623 = vmatprep.mubr.bf16.mxu0 %v1447_v36 }
  0x25   :  { %744 = vmatprep.mubr.bf16.mxu1 %v1449_v37 }
  0x2b   :  { %624 = vmatmul.mubr.bf16.gmra.mxu0 %v1451_v38 }
  0x2c   :  { %745 = vmatmul.mubr.bf16.gmra.mxu1 %v1452_v39  ;;  %631 = vmatprep.mubr.bf16.mxu0 %v1453_v40 }
  0x2d   :  { %752 = vmatprep.mubr.bf16.mxu1 %v1455_v41 }
  0x33   :  { %632 = vmatmul.mubr.bf16.gmra.mxu0 %v1457_v42 }
  0x34   :  { %753 = vmatmul.mubr.bf16.gmra.mxu1 %v1458_v43  ;;  %639 = vmatprep.mubr.bf16.mxu0 %v1459_v44 }
  0x35   :  { %760 = vmatprep.mubr.bf16.mxu1 %v1461_v45 }
  0x3b   :  { %640 = vmatmul.mubr.bf16.gmra.mxu0 %v1463_v46 }
  0x3c   :  { %761 = vmatmul.mubr.bf16.gmra.mxu1 %v1464_v47  ;;  %647 = vmatprep.mubr.bf16.mxu0 %v1465_v48 }
  0x3d   :  { %768 = vmatprep.mubr.bf16.mxu1 %v1467_v49 }
  0x43   :  { %648 = vmatmul.mubr.bf16.gmra.mxu0 %v1469_v50 }
  0x44   :  { %769 = vmatmul.mubr.bf16.gmra.mxu1 %v1470_v51  ;;  %655 = vmatprep.mubr.bf16.mxu0 %v1471_v52 }
  0x45   :  { %776 = vmatprep.mubr.bf16.mxu1 %v1473_v53 }
  0x4b   :  { %656 = vmatmul.mubr.bf16.gmra.mxu0 %v1475_v54 }
  0x4c   :  { %777 = vmatmul.mubr.bf16.gmra.mxu1 %v1476_v55  ;;  %663 = vmatprep.mubr.bf16.mxu0 %v1477_v56 }
  0x4d   :  { %784 = vmatprep.mubr.bf16.mxu1 %v1479_v57 }
  0x53   :  { %664 = vmatmul.mubr.bf16.gmra.mxu0 %v1481_v58 }
  0x54   :  { %785 = vmatmul.mubr.bf16.gmra.mxu1 %v1482_v59  ;;  %671 = vmatprep.mubr.bf16.mxu0 %v1483_v60 }
  0x55   :  { %792 = vmatprep.mubr.bf16.mxu1 %v1485_v61 }
  0x5b   :  { %672 = vmatmul.mubr.bf16.gmra.mxu0 %v1487_v62 }
  0x5c   :  { %793 = vmatmul.mubr.bf16.gmra.mxu1 %v1488_v63  ;;  %679 = vmatprep.mubr.bf16.mxu0 %v1489_v0 }
  0x5d   :  { %800 = vmatprep.mubr.bf16.mxu1 %v1491_v1 }
  0x63   :  { %680 = vmatmul.mubr.bf16.gmra.mxu0 %v1493_v2 }
  0x64   :  { %801 = vmatmul.mubr.bf16.gmra.mxu1 %v1494_v3  ;;  %687 = vmatprep.mubr.bf16.mxu0 %v1495_v4 }
  0x65   :  { %808 = vmatprep.mubr.bf16.mxu1 %v1497_v5 }
  0x6b   :  { %688 = vmatmul.mubr.bf16.gmra.mxu0 %v1499_v6 }
  0x6c   :  { %809 = vmatmul.mubr.bf16.gmra.mxu1 %v1500_v7  ;;  %695 = vmatprep.mubr.bf16.mxu0 %v1501_v8 }
  0x6d   :  { %816 = vmatprep.mubr.bf16.mxu1 %v1503_v9 }
  0x73   :  { %696 = vmatmul.mubr.bf16.gmra.mxu0 %v1505_v10 }
  0x74   :  { %817 = vmatmul.mubr.bf16.gmra.mxu1 %v1506_v11 }
  0xe3   :  { %v1261_v12 = vpop.f32.mrf.mxu0 }
  0xe4   :  { %v1343_v13 = vpop.f32.mrf.mxu1 }
  0xe5   :  { %v1262_v14 = vpop.f32.mrf.mxu0 }
  0xe6   :  { %v1263_v15 = vadd.f32 %v1262_v14, %v1261_v12  ;;  %v1344_v16 = vpop.f32.mrf.mxu1 }
  0xe7   :  { %v1345_v17 = vadd.f32 %v1344_v16, %v1343_v13  ;;  %v1264_v18 = vpop.f32.mrf.mxu0 }
  0xe8   :  { %v1346_v19 = vpop.f32.mrf.mxu1 }
  0xe9   :  { %v739_v20 = vadd.f32 %v1345_v17, %v1263_v15  ;;  %v1265_v21 = vpop.f32.mrf.mxu0 }
  0xea   :  { %v1266_v23 = vadd.f32 %v1265_v21, %v1264_v18  ;;  %v1347_v24 = vpop.f32.mrf.mxu1 }
  0xeb   :  { %v1348_v25 = vadd.f32 %v1347_v24, %v1346_v19  ;;  %v1267_v26 = vpop.f32.mrf.mxu0  ;;  %v901_v28 = vadd.f32 %v1758_v22, %v739_v20 }
  0xec   :  { %v1349_v27 = vpop.f32.mrf.mxu1 }
  0xed   :  { %v742_v29 = vadd.f32 %v1348_v25, %v1266_v23  ;;  %v1268_v30 = vpop.f32.mrf.mxu0  ;;  %v923_v37 = vmax.f32 %v901_v28, 0.0 }
  0xee   :  { %v1269_v31 = vadd.f32 %v1268_v30, %v1267_v26  ;;  %v1350_v32 = vpop.f32.mrf.mxu1 }
  0xef   :  { %v902_v33 = vadd.f32 %v1758_v22, %v742_v29  ;;  %v1351_v34 = vadd.f32 %v1350_v32, %v1349_v27  ;;  %v1270_v35 = vpop.f32.mrf.mxu0 }
  0xf0   :  { %v1352_v36 = vpop.f32.mrf.mxu1 }
  0xf1   :  { %v924_v38 = vmax.f32 %v902_v33, 0.0  ;;  %v747_v39 = vadd.f32 %v1351_v34, %v1269_v31  ;;  %v1271_v40 = vpop.f32.mrf.mxu0 }
  0xf2   :  { %v1272_v41 = vadd.f32 %v1271_v40, %v1270_v35  ;;  %v1353_v42 = vpop.f32.mrf.mxu1 }
  0xf3   :  { %v1183_v43 = vpack.c.bf16 %v924_v38, %v923_v37  ;;  %v1354_v44 = vadd.f32 %v1353_v42, %v1352_v36  ;;  %v1273_v45 = vpop.f32.mrf.mxu0  ;;  %v903_v47 = vadd.f32 %v1758_v22, %v747_v39 }
  0xf4   :  { %v1355_v46 = vpop.f32.mrf.mxu1 }
  0xf5   :  { %1184 = vst [vmem:[%s1818_s3] sm:$0xff] %v1183_v43   ;;  %v750_v48 = vadd.f32 %v1354_v44, %v1272_v41  ;;  %v1274_v49 = vpop.f32.mrf.mxu0  ;;  %v925_v56 = vmax.f32 %v903_v47, 0.0 }
  0xf6   :  { %v1275_v50 = vadd.f32 %v1274_v49, %v1273_v45  ;;  %v1356_v51 = vpop.f32.mrf.mxu1 }
  0xf7   :  { %v904_v52 = vadd.f32 %v1758_v22, %v750_v48  ;;  %v1357_v53 = vadd.f32 %v1356_v51, %v1355_v46  ;;  %v1276_v54 = vpop.f32.mrf.mxu0 }
  0xf8   :  { %v1358_v55 = vpop.f32.mrf.mxu1 }
  0xf9   :  { %v926_v57 = vmax.f32 %v904_v52, 0.0  ;;  %v755_v58 = vadd.f32 %v1357_v53, %v1275_v50  ;;  %v1277_v59 = vpop.f32.mrf.mxu0 }
  0xfa   :  { %v1278_v60 = vadd.f32 %v1277_v59, %v1276_v54  ;;  %v1359_v61 = vpop.f32.mrf.mxu1 }
  0xfb   :  { %v1188_v62 = vpack.c.bf16 %v926_v57, %v925_v56  ;;  %v1360_v63 = vadd.f32 %v1359_v61, %v1358_v55  ;;  %v1279_v0 = vpop.f32.mrf.mxu0  ;;  %v905_v2 = vadd.f32 %v1758_v22, %v755_v58 }
  0xfc   :  { %v1361_v1 = vpop.f32.mrf.mxu1 }
  0xfd   :  { %1235 = vst [vmem:[%s1818_s3 + $0x8] sm:$0xff] %v1188_v62   ;;  %v758_v3 = vadd.f32 %v1360_v63, %v1278_v60  ;;  %v1280_v4 = vpop.f32.mrf.mxu0  ;;  %v927_v11 = vmax.f32 %v905_v2, 0.0 }
  0xfe   :  { %v1281_v5 = vadd.f32 %v1280_v4, %v1279_v0  ;;  %v1362_v6 = vpop.f32.mrf.mxu1 }
  0xff   :  { %v906_v7 = vadd.f32 %v1758_v22, %v758_v3  ;;  %v1363_v8 = vadd.f32 %v1362_v6, %v1361_v1  ;;  %v1282_v9 = vpop.f32.mrf.mxu0 }
 0x100   :  { %v1364_v10 = vpop.f32.mrf.mxu1 }
 0x101   :  { %v928_v12 = vmax.f32 %v906_v7, 0.0  ;;  %v763_v13 = vadd.f32 %v1363_v8, %v1281_v5  ;;  %v1283_v14 = vpop.f32.mrf.mxu0 }
 0x102   :  { %v1284_v15 = vadd.f32 %v1283_v14, %v1282_v9  ;;  %v1365_v16 = vpop.f32.mrf.mxu1 }
 0x103   :  { %v1193_v17 = vpack.c.bf16 %v928_v12, %v927_v11  ;;  %v1366_v18 = vadd.f32 %v1365_v16, %v1364_v10  ;;  %v1285_v19 = vpop.f32.mrf.mxu0  ;;  %v907_v21 = vadd.f32 %v1758_v22, %v763_v13 }
 0x104   :  { %v1367_v20 = vpop.f32.mrf.mxu1 }
 0x105   :  { %1236 = vst [vmem:[%s1818_s3 + $0x10] sm:$0xff] %v1193_v17   ;;  %v766_v23 = vadd.f32 %v1366_v18, %v1284_v15  ;;  %v1286_v24 = vpop.f32.mrf.mxu0  ;;  %v929_v31 = vmax.f32 %v907_v21, 0.0 }
 0x106   :  { %v1287_v25 = vadd.f32 %v1286_v24, %v1285_v19  ;;  %v1368_v26 = vpop.f32.mrf.mxu1 }
 0x107   :  { %v908_v27 = vadd.f32 %v1758_v22, %v766_v23  ;;  %v1369_v28 = vadd.f32 %v1368_v26, %v1367_v20  ;;  %v1288_v29 = vpop.f32.mrf.mxu0 }
 0x108   :  { %v1370_v30 = vpop.f32.mrf.mxu1 }
 0x109   :  { %v930_v32 = vmax.f32 %v908_v27, 0.0  ;;  %v771_v33 = vadd.f32 %v1369_v28, %v1287_v25  ;;  %v1289_v34 = vpop.f32.mrf.mxu0 }
 0x10a   :  { %v1290_v35 = vadd.f32 %v1289_v34, %v1288_v29  ;;  %v1371_v36 = vpop.f32.mrf.mxu1 }
 0x10b   :  { %v1198_v37 = vpack.c.bf16 %v930_v32, %v929_v31  ;;  %v1372_v38 = vadd.f32 %v1371_v36, %v1370_v30  ;;  %v1291_v39 = vpop.f32.mrf.mxu0  ;;  %v909_v41 = vadd.f32 %v1758_v22, %v771_v33 }
 0x10c   :  { %v1373_v40 = vpop.f32.mrf.mxu1 }
 0x10d   :  { %1237 = vst [vmem:[%s1818_s3 + $0x18] sm:$0xff] %v1198_v37   ;;  %v774_v42 = vadd.f32 %v1372_v38, %v1290_v35  ;;  %v1292_v43 = vpop.f32.mrf.mxu0  ;;  %v931_v50 = vmax.f32 %v909_v41, 0.0 }
 0x10e   :  { %v1293_v44 = vadd.f32 %v1292_v43, %v1291_v39  ;;  %v1374_v45 = vpop.f32.mrf.mxu1 }
 0x10f   :  { %v910_v46 = vadd.f32 %v1758_v22, %v774_v42  ;;  %v1375_v47 = vadd.f32 %v1374_v45, %v1373_v40  ;;  %v1294_v48 = vpop.f32.mrf.mxu0 }
 0x110   :  { %v1376_v49 = vpop.f32.mrf.mxu1 }
 0x111   :  { %v932_v51 = vmax.f32 %v910_v46, 0.0  ;;  %v779_v52 = vadd.f32 %v1375_v47, %v1293_v44  ;;  %v1295_v53 = vpop.f32.mrf.mxu0 }
 0x112   :  { %v1296_v54 = vadd.f32 %v1295_v53, %v1294_v48  ;;  %v1377_v55 = vpop.f32.mrf.mxu1 }
 0x113   :  { %v1203_v56 = vpack.c.bf16 %v932_v51, %v931_v50  ;;  %v1378_v57 = vadd.f32 %v1377_v55, %v1376_v49  ;;  %v1297_v58 = vpop.f32.mrf.mxu0  ;;  %v911_v60 = vadd.f32 %v1758_v22, %v779_v52 }
 0x114   :  { %v1379_v59 = vpop.f32.mrf.mxu1 }
 0x115   :  { %1238 = vst [vmem:[%s1818_s3 + $0x20] sm:$0xff] %v1203_v56   ;;  %v782_v61 = vadd.f32 %v1378_v57, %v1296_v54  ;;  %v1298_v62 = vpop.f32.mrf.mxu0  ;;  %v933_v5 = vmax.f32 %v911_v60, 0.0 }
 0x116   :  { %v1299_v63 = vadd.f32 %v1298_v62, %v1297_v58  ;;  %v1380_v0 = vpop.f32.mrf.mxu1 }
 0x117   :  { %v912_v1 = vadd.f32 %v1758_v22, %v782_v61  ;;  %v1381_v2 = vadd.f32 %v1380_v0, %v1379_v59  ;;  %v1300_v3 = vpop.f32.mrf.mxu0 }
 0x118   :  { %v1382_v4 = vpop.f32.mrf.mxu1 }
 0x119   :  { %v934_v6 = vmax.f32 %v912_v1, 0.0  ;;  %v787_v7 = vadd.f32 %v1381_v2, %v1299_v63  ;;  %v1301_v8 = vpop.f32.mrf.mxu0 }
 0x11a   :  { %v1302_v9 = vadd.f32 %v1301_v8, %v1300_v3  ;;  %v1383_v10 = vpop.f32.mrf.mxu1 }
 0x11b   :  { %v1208_v11 = vpack.c.bf16 %v934_v6, %v933_v5  ;;  %v1384_v12 = vadd.f32 %v1383_v10, %v1382_v4  ;;  %v1303_v13 = vpop.f32.mrf.mxu0  ;;  %v913_v15 = vadd.f32 %v1758_v22, %v787_v7 }
 0x11c   :  { %v1385_v14 = vpop.f32.mrf.mxu1 }
 0x11d   :  { %1239 = vst [vmem:[%s1818_s3 + $0x28] sm:$0xff] %v1208_v11   ;;  %v790_v16 = vadd.f32 %v1384_v12, %v1302_v9  ;;  %v1304_v17 = vpop.f32.mrf.mxu0  ;;  %v935_v25 = vmax.f32 %v913_v15, 0.0 }
 0x11e   :  { %v1305_v18 = vadd.f32 %v1304_v17, %v1303_v13  ;;  %v1386_v19 = vpop.f32.mrf.mxu1 }
 0x11f   :  { %v914_v20 = vadd.f32 %v1758_v22, %v790_v16  ;;  %v1387_v21 = vadd.f32 %v1386_v19, %v1385_v14  ;;  %v1306_v23 = vpop.f32.mrf.mxu0 }
 0x120   :  { %v1388_v24 = vpop.f32.mrf.mxu1 }
 0x121   :  { %v936_v26 = vmax.f32 %v914_v20, 0.0  ;;  %v795_v27 = vadd.f32 %v1387_v21, %v1305_v18  ;;  %v1307_v28 = vpop.f32.mrf.mxu0 }
 0x122   :  { %v1308_v29 = vadd.f32 %v1307_v28, %v1306_v23  ;;  %v1389_v30 = vpop.f32.mrf.mxu1 }
 0x123   :  { %v1213_v31 = vpack.c.bf16 %v936_v26, %v935_v25  ;;  %v1390_v32 = vadd.f32 %v1389_v30, %v1388_v24  ;;  %v1309_v33 = vpop.f32.mrf.mxu0  ;;  %v915_v35 = vadd.f32 %v1758_v22, %v795_v27 }
 0x124   :  { %v1391_v34 = vpop.f32.mrf.mxu1 }
 0x125   :  { %1240 = vst [vmem:[%s1818_s3 + $0x30] sm:$0xff] %v1213_v31   ;;  %v798_v36 = vadd.f32 %v1390_v32, %v1308_v29  ;;  %v1310_v37 = vpop.f32.mrf.mxu0  ;;  %v937_v44 = vmax.f32 %v915_v35, 0.0 }
 0x126   :  { %v1311_v38 = vadd.f32 %v1310_v37, %v1309_v33  ;;  %v1392_v39 = vpop.f32.mrf.mxu1 }
 0x127   :  { %v916_v40 = vadd.f32 %v1758_v22, %v798_v36  ;;  %v1393_v41 = vadd.f32 %v1392_v39, %v1391_v34  ;;  %v1312_v42 = vpop.f32.mrf.mxu0 }
 0x128   :  { %v1394_v43 = vpop.f32.mrf.mxu1 }
 0x129   :  { %v938_v45 = vmax.f32 %v916_v40, 0.0  ;;  %v803_v46 = vadd.f32 %v1393_v41, %v1311_v38  ;;  %v1313_v47 = vpop.f32.mrf.mxu0 }
 0x12a   :  { %v1314_v48 = vadd.f32 %v1313_v47, %v1312_v42  ;;  %v1395_v49 = vpop.f32.mrf.mxu1 }
 0x12b   :  { %v1218_v50 = vpack.c.bf16 %v938_v45, %v937_v44  ;;  %v1396_v51 = vadd.f32 %v1395_v49, %v1394_v43  ;;  %v1315_v52 = vpop.f32.mrf.mxu0  ;;  %v917_v54 = vadd.f32 %v1758_v22, %v803_v46 }
 0x12c   :  { %v1397_v53 = vpop.f32.mrf.mxu1 }
 0x12d   :  { %1241 = vst [vmem:[%s1818_s3 + $0x38] sm:$0xff] %v1218_v50   ;;  %v806_v55 = vadd.f32 %v1396_v51, %v1314_v48  ;;  %v1316_v56 = vpop.f32.mrf.mxu0  ;;  %v939_v63 = vmax.f32 %v917_v54, 0.0 }
 0x12e   :  { %v1317_v57 = vadd.f32 %v1316_v56, %v1315_v52  ;;  %v1398_v58 = vpop.f32.mrf.mxu1 }
 0x12f   :  { %v918_v59 = vadd.f32 %v1758_v22, %v806_v55  ;;  %v1399_v60 = vadd.f32 %v1398_v58, %v1397_v53  ;;  %v1318_v61 = vpop.f32.mrf.mxu0 }
 0x130   :  { %v1400_v62 = vpop.f32.mrf.mxu1 }
 0x131   :  { %v940_v0 = vmax.f32 %v918_v59, 0.0  ;;  %v811_v1 = vadd.f32 %v1399_v60, %v1317_v57  ;;  %v1319_v2 = vpop.f32.mrf.mxu0 }
 0x132   :  { %v1320_v3 = vadd.f32 %v1319_v2, %v1318_v61  ;;  %v1401_v4 = vpop.f32.mrf.mxu1 }
 0x133   :  { %v1223_v5 = vpack.c.bf16 %v940_v0, %v939_v63  ;;  %v1402_v6 = vadd.f32 %v1401_v4, %v1400_v62  ;;  %v1321_v7 = vpop.f32.mrf.mxu0  ;;  %v919_v9 = vadd.f32 %v1758_v22, %v811_v1 }
 0x134   :  { %v1403_v8 = vpop.f32.mrf.mxu1 }
 0x135   :  { %1242 = vst [vmem:[%s1818_s3 + $0x40] sm:$0xff] %v1223_v5   ;;  %v814_v10 = vadd.f32 %v1402_v6, %v1320_v3  ;;  %v1322_v11 = vpop.f32.mrf.mxu0  ;;  %v941_v18 = vmax.f32 %v919_v9, 0.0 }
 0x136   :  { %v1323_v12 = vadd.f32 %v1322_v11, %v1321_v7  ;;  %v1404_v13 = vpop.f32.mrf.mxu1 }
 0x137   :  { %v920_v14 = vadd.f32 %v1758_v22, %v814_v10  ;;  %v1405_v15 = vadd.f32 %v1404_v13, %v1403_v8  ;;  %v1324_v16 = vpop.f32.mrf.mxu0 }
 0x138   :  { %v1406_v17 = vpop.f32.mrf.mxu1 }
 0x139   :  { %v942_v19 = vmax.f32 %v920_v14, 0.0  ;;  %v819_v20 = vadd.f32 %v1405_v15, %v1323_v12  ;;  %v1325_v21 = vpop.f32.mrf.mxu0 }
 0x13a   :  { %v1326_v23 = vadd.f32 %v1325_v21, %v1324_v16  ;;  %v1407_v24 = vpop.f32.mrf.mxu1 }
 0x13b   :  { %v1228_v25 = vpack.c.bf16 %v942_v19, %v941_v18  ;;  %v1408_v26 = vadd.f32 %v1407_v24, %v1406_v17  ;;  %v921_v27 = vadd.f32 %v1758_v22, %v819_v20 }
 0x13d   :  { %1243 = vst [vmem:[%s1818_s3 + $0x48] sm:$0xff] %v1228_v25   ;;  %v822_v28 = vadd.f32 %v1408_v26, %v1326_v23  ;;  %v943_v30 = vmax.f32 %v921_v27, 0.0 }
 0x13f   :  { %v922_v29 = vadd.f32 %v1758_v22, %v822_v28 }
 0x141   :  { %v944_v31 = vmax.f32 %v922_v29, 0.0 }
 0x143   :  { %v1233_v32 = vpack.c.bf16 %v944_v31, %v943_v30 }
 0x145   :  { %1244 = vst [vmem:[%s1818_s3 + $0x50] sm:$0xff] %v1233_v32  }

// kernel: _lambda_.7
= control target key start
LH: loop header
LB: loop body
LE: loop exit
PB: predicated region body
PF: predicated region fallthrough
CT: control target
= control target key end

     0   :  { %v1439_v24 = vmov 0.0   ;;  %vm1440_vm0 = vmmov 0   ;;  %s1796_s1 = inlined_call_operand.vmem [shape: bf16[640,128], index: 1, kind: input, shape index: {}]   ;;  %s1797_s0 = inlined_call_operand.vmem [shape: bf16[112,640], index: 0, kind: input, shape index: {}]   ;;  %s1798_s2 = inlined_call_operand.vmem [shape: f32[1,128], index: 2, kind: input, shape index: {}]   ;;  %s1799_s3 = inlined_call_operand.vmem [shape: bf16[112,128], index: 3, kind: output, shape index: {}]  }
   0x1   :  { %v1350_v0 = vld [vmem:[%s1796_s1 + $0x78] sm:$0xff]   ;;  %v1352_v2 = vld [vmem:[%s1796_s1 + $0x70] sm:$0xff]   ;;  %v1354_v4 = vld [vmem:[%s1796_s1 + $0x68] sm:$0xff]  }
   0x2   :  { %v1351_v1 = vld [vmem:[%s1796_s1 + $0x38] sm:$0xff]   ;;  %1157 = vmatprep.subr.bf16.mxu0 %v1350_v0  ;;  %1332 = vmatprep.subr.bf16.mxu1 %v1350_v0  ;;  %v1353_v3 = vld [vmem:[%s1796_s1 + $0x30] sm:$0xff]   ;;  %v1355_v5 = vld [vmem:[%s1796_s1 + $0x28] sm:$0xff]  }
   0x3   :  { %1158 = vmatpush3.bf16.msra.mxu0 %v1351_v1  ;;  %1340 = vmatpush3.bf16.msra.mxu1 %v1351_v1  ;;  %v1356_v6 = vld [vmem:[%s1796_s1 + $0x60] sm:$0xff]   ;;  %v1358_v8 = vld [vmem:[%s1796_s1 + $0x58] sm:$0xff]   ;;  %v1360_v10 = vld [vmem:[%s1796_s1 + $0x50] sm:$0xff]  }
   0x4   :  { %1159 = vmatprep.subr.bf16.mxu0 %v1352_v2  ;;  %1333 = vmatprep.subr.bf16.mxu1 %v1352_v2  ;;  %v1357_v7 = vld [vmem:[%s1796_s1 + $0x20] sm:$0xff]   ;;  %v1359_v9 = vld [vmem:[%s1796_s1 + $0x18] sm:$0xff]   ;;  %v1361_v13 = vld [vmem:[%s1796_s1 + $0x10] sm:$0xff]  }
   0x5   :  { %v1368_v11 = vld [vmem:[%s1797_s0 + $0x4] ss:$20 sps:$4 sm:$0xff]   ;;  %v1362_v14 = vld [vmem:[%s1796_s1 + $0x48] sm:$0xff]   ;;  %v1366_v18 = vld [vmem:[%s1797_s0] ss:$20 sps:$4 sm:$0xff]  }
   0x6   :  { %v1371_v12 = vld [vmem:[%s1797_s0 + $0xa4] ss:$20 sps:$4 sm:$0xff]   ;;  %623 = vmatprep.mubr.bf16.mxu0 %v1368_v11  ;;  %v1363_v15 = vld [vmem:[%s1796_s1 + $0x8] sm:$0xff]   ;;  %v1369_v19 = vld [vmem:[%s1797_s0 + $0xa0] ss:$20 sps:$4 sm:$0xff]  }
   0x7   :  { %1160 = vmatpush3.bf16.msra.mxu0 %v1353_v3  ;;  %1341 = vmatpush3.bf16.msra.mxu1 %v1353_v3  ;;  %v1364_v16 = vld [vmem:[%s1796_s1 + $0x40] sm:$0xff]   ;;  %v1372_v20 = vld [vmem:[%s1796_s1 + $0xf8] sm:$0xff]   ;;  %v1375_v23 = vld [vmem:[%s1796_s1 + $0xf0] sm:$0xff]  }
   0x8   :  { %1161 = vmatprep.subr.bf16.mxu0 %v1354_v4  ;;  %1334 = vmatprep.subr.bf16.mxu1 %v1354_v4  ;;  %v1365_v17 = vld [vmem:[%s1796_s1] sm:$0xff]   ;;  %v1373_v21 = vld [vmem:[%s1796_s1 + $0xb8] sm:$0xff]   ;;  %v1376_v27 = vld [vmem:[%s1796_s1 + $0xb0] sm:$0xff]  }
   0x9   :  { %655 = vmatprep.mubr.bf16.mxu1 %v1371_v12  ;;  %v1374_v22 = vld [vmem:[%s1796_s1 + $0x138] sm:$0xff]   ;;  %v1378_v25 = vld [vmem:[%s1797_s0 + $0x2c] ss:$20 sps:$4 sm:$0xff]   ;;  %v1377_v28 = vld [vmem:[%s1796_s1 + $0x130] sm:$0xff]  }
   0xa   :  { %v1382_v26 = vld [vmem:[%s1797_s0 + $0xcc] ss:$20 sps:$4 sm:$0xff]   ;;  %v1380_v29 = vld [vmem:[%s1797_s0 + $0x28] ss:$20 sps:$4 sm:$0xff]   ;;  %v1392_v39 = vld [vmem:[%s1797_s0 + $0x50] ss:$20 sps:$4 sm:$0xff]  }
   0xb   :  { %1162 = vmatpush3.bf16.msra.mxu0 %v1355_v5  ;;  %1342 = vmatpush3.bf16.msra.mxu1 %v1355_v5  ;;  %v1381_v30 = vld [vmem:[%s1796_s1 + $0xe8] sm:$0xff]   ;;  %v1387_v34 = vld [vmem:[%s1796_s1 + $0xe0] sm:$0xff]   ;;  %v1393_v40 = vld [vmem:[%s1796_s1 + $0xd8] sm:$0xff]  }
   0xc   :  { %1163 = vmatprep.subr.bf16.mxu0 %v1356_v6  ;;  %1335 = vmatprep.subr.bf16.mxu1 %v1356_v6  ;;  %v1384_v31 = vld [vmem:[%s1796_s1 + $0xa8] sm:$0xff]   ;;  %v1388_v37 = vld [vmem:[%s1796_s1 + $0xa0] sm:$0xff]   ;;  %v1396_v41 = vld [vmem:[%s1796_s1 + $0x98] sm:$0xff]  }
   0xd   :  { %v1385_v32 = vld [vmem:[%s1796_s1 + $0x128] sm:$0xff]   ;;  %v1389_v38 = vld [vmem:[%s1796_s1 + $0x120] sm:$0xff]   ;;  %v1397_v43 = vld [vmem:[%s1796_s1 + $0x118] sm:$0xff]  }
   0xe   :  { %v1386_v33 = vld [vmem:[%s1797_s0 + $0xc8] ss:$20 sps:$4 sm:$0xff]   ;;  %v1398_v42 = vld [vmem:[%s1797_s0 + $0xf0] ss:$20 sps:$4 sm:$0xff]   ;;  %v1413_v47 = vld [vmem:[%s1797_s0 + $0xc] ss:$20 sps:$4 sm:$0xff]  }
   0xf   :  { %1164 = vmatpush3.bf16.msra.mxu0 %v1357_v7  ;;  %1343 = vmatpush3.bf16.msra.mxu1 %v1357_v7  ;;  %v1390_v35 = vld [vmem:[%s1797_s0 + $0x54] ss:$20 sps:$4 sm:$0xff]   ;;  %v1402_v45 = vld [vmem:[%s1797_s0 + $0x7c] ss:$20 sps:$4 sm:$0xff]   ;;  %v1404_v50 = vld [vmem:[%s1797_s0 + $0x78] ss:$20 sps:$4 sm:$0xff]  }
  0x10   :  { %1165 = vmatprep.subr.bf16.mxu0 %v1358_v8  ;;  %1336 = vmatprep.subr.bf16.mxu1 %v1358_v8  ;;  %v1394_v36 = vld [vmem:[%s1797_s0 + $0xf4] ss:$20 sps:$4 sm:$0xff]   ;;  %v1408_v53 = vld [vmem:[%s1796_s1 + $0xc0] sm:$0xff]   ;;  %v1418_v60 = vld [vmem:[%s1797_s0 + $0x38] ss:$20 sps:$4 sm:$0xff]  }
  0x11   :  { %v1399_v44 = vld [vmem:[%s1796_s1 + $0xd0] sm:$0xff]   ;;  %v1405_v49 = vld [vmem:[%s1796_s1 + $0xc8] sm:$0xff]   ;;  %v1409_v54 = vld [vmem:[%s1796_s1 + $0x80] sm:$0xff]  }
  0x12   :  { %v1400_v46 = vld [vmem:[%s1796_s1 + $0x90] sm:$0xff]   ;;  %v1406_v51 = vld [vmem:[%s1796_s1 + $0x88] sm:$0xff]   ;;  %v1410_v55 = vld [vmem:[%s1796_s1 + $0x100] sm:$0xff]  }
  0x13   :  { %1166 = vmatpush3.bf16.msra.mxu0 %v1359_v9  ;;  %1344 = vmatpush3.bf16.msra.mxu1 %v1359_v9  ;;  %v1401_v48 = vld [vmem:[%s1796_s1 + $0x110] sm:$0xff]   ;;  %v1407_v52 = vld [vmem:[%s1796_s1 + $0x108] sm:$0xff]   ;;  %v1423_v0 = vld [vmem:[%s1797_s0 + $0x84] ss:$20 sps:$4 sm:$0xff]  }
  0x14   :  { %1167 = vmatprep.subr.bf16.mxu0 %v1360_v10  ;;  %1337 = vmatprep.subr.bf16.mxu1 %v1360_v10  ;;  %v1411_v56 = vld [vmem:[%s1797_s0 + $0x8] ss:$20 sps:$4 sm:$0xff]   ;;  %v1414_v57 = vld [vmem:[%s1797_s0 + $0x10] ss:$20 sps:$4 sm:$0xff]   ;;  %v1421_v62 = vld [vmem:[%s1797_s0 + $0x58] ss:$20 sps:$4 sm:$0xff]  }
  0x15   :  { %v1415_v58 = vld [vmem:[%s1797_s0 + $0x34] ss:$20 sps:$4 sm:$0xff]   ;;  %v1417_v59 = vld [vmem:[%s1797_s0 + $0x30] ss:$20 sps:$4 sm:$0xff]   ;;  %v1427_v3 = vld [vmem:[%s1797_s0 + $0xac] ss:$20 sps:$4 sm:$0xff]  }
  0x16   :  { %v1419_v61 = vld [vmem:[%s1797_s0 + $0x5c] ss:$20 sps:$4 sm:$0xff]   ;;  %v1422_v63 = vld [vmem:[%s1797_s0 + $0x60] ss:$20 sps:$4 sm:$0xff]   ;;  %v1434_v8 = vld [vmem:[%s1797_s0 + $0xd8] ss:$20 sps:$4 sm:$0xff]  }
  0x17   :  { %1168 = vmatpush3.bf16.msra.mxu0 %v1361_v13  ;;  %1345 = vmatpush3.bf16.msra.mxu1 %v1361_v13  ;;  %v1425_v1 = vld [vmem:[%s1797_s0 + $0x80] ss:$20 sps:$4 sm:$0xff]   ;;  %v1426_v2 = vld [vmem:[%s1797_s0 + $0x88] ss:$20 sps:$4 sm:$0xff]   ;;  %v1430_v5 = vld [vmem:[%s1797_s0 + $0xb0] ss:$20 sps:$4 sm:$0xff]  }
  0x18   :  { %1169 = vmatprep.subr.bf16.mxu0 %v1362_v14  ;;  %1338 = vmatprep.subr.bf16.mxu1 %v1362_v14  ;;  %v1429_v4 = vld [vmem:[%s1797_s0 + $0xa8] ss:$20 sps:$4 sm:$0xff]   ;;  %v1433_v7 = vld [vmem:[%s1797_s0 + $0xd0] ss:$20 sps:$4 sm:$0xff]   ;;  %v1437_v10 = vld [vmem:[%s1797_s0 + $0xf8] ss:$20 sps:$4 sm:$0xff]  }
  0x19   :  { %v1431_v6 = vld [vmem:[%s1797_s0 + $0xd4] ss:$20 sps:$4 sm:$0xff]   ;;  %v1435_v9 = vld [vmem:[%s1797_s0 + $0xfc] ss:$20 sps:$4 sm:$0xff]  }
  0x1a   :  { %v1438_v11 = vld [vmem:[%s1797_s0 + $0x100] ss:$20 sps:$4 sm:$0xff]  }
  0x1b   :  { %1170 = vmatpush3.bf16.msra.mxu0 %v1363_v15  ;;  %1346 = vmatpush3.bf16.msra.mxu1 %v1363_v15 }
  0x1c   :  { %1171 = vmatprep.subr.bf16.mxu0 %v1364_v16  ;;  %1339 = vmatprep.subr.bf16.mxu1 %v1364_v16 }
  0x1f   :  { %1172 = vmatpush3.bf16.msra.mxu0 %v1365_v17  ;;  %1347 = vmatpush3.bf16.msra.mxu1 %v1365_v17 }
  0x20   :  { %1215 = vmatprep.subr.bf16.mxu1 %v1372_v20  ;;  %1288 = vmatprep.subr.bf16.mxu0 %v1439_v24 }
  0x22   :  { %624 = vmatmul.mubr.bf16.vlgmr.msra.gmra.mxu0 %v1366_v18  ;;  %656 = vmatmul.mubr.bf16.vlgmr.msra.gmra.mxu1 %v1369_v19 }
  0x23   :  { %1216 = vmatpush3.bf16.msra.mxu1 %v1373_v21  ;;  %1289 = vmatpush3.bf16.msra.mxu0 %v1374_v22 }
  0x24   :  { %1217 = vmatprep.subr.bf16.mxu1 %v1375_v23  ;;  %1290 = vmatprep.subr.bf16.mxu0 %v1439_v24 }
  0x25   :  { %631 = vmatprep.mubr.bf16.mxu0 %v1378_v25  ;;  %663 = vmatprep.mubr.bf16.mxu1 %v1382_v26 }
  0x27   :  { %1218 = vmatpush3.bf16.msra.mxu1 %v1376_v27  ;;  %1291 = vmatpush3.bf16.msra.mxu0 %v1377_v28 }
  0x28   :  { %1219 = vmatprep.subr.bf16.mxu1 %v1381_v30  ;;  %1292 = vmatprep.subr.bf16.mxu0 %v1439_v24 }
  0x2a   :  { %632 = vmatmul.mubr.bf16.gmra.mxu0 %v1380_v29  ;;  %664 = vmatmul.mubr.bf16.gmra.mxu1 %v1386_v33 }
  0x2b   :  { %1220 = vmatpush3.bf16.msra.mxu1 %v1384_v31  ;;  %1293 = vmatpush3.bf16.msra.mxu0 %v1385_v32 }
  0x2c   :  { %1221 = vmatprep.subr.bf16.mxu1 %v1387_v34  ;;  %1294 = vmatprep.subr.bf16.mxu0 %v1439_v24 }
  0x2d   :  { %639 = vmatprep.mubr.bf16.mxu0 %v1390_v35  ;;  %671 = vmatprep.mubr.bf16.mxu1 %v1394_v36 }
  0x2f   :  { %1222 = vmatpush3.bf16.msra.mxu1 %v1388_v37  ;;  %1295 = vmatpush3.bf16.msra.mxu0 %v1389_v38 }
  0x30   :  { %1223 = vmatprep.subr.bf16.mxu1 %v1393_v40  ;;  %1296 = vmatprep.subr.bf16.mxu0 %v1439_v24 }
  0x32   :  { %640 = vmatmul.mubr.bf16.gmra.mxu0 %v1392_v39  ;;  %672 = vmatmul.mubr.bf16.gmra.mxu1 %v1398_v42 }
  0x33   :  { %1224 = vmatpush3.bf16.msra.mxu1 %v1396_v41  ;;  %1297 = vmatpush3.bf16.msra.mxu0 %v1397_v43 }
  0x34   :  { %1225 = vmatprep.subr.bf16.mxu1 %v1399_v44  ;;  %1298 = vmatprep.subr.bf16.mxu0 %v1439_v24 }
  0x35   :  { %647 = vmatprep.mubr.bf16.mxu0 %v1402_v45  ;;  %712 = vmatprep.mubr.bf16.mxu1 %v1413_v47 }
  0x37   :  { %1226 = vmatpush3.bf16.msra.mxu1 %v1400_v46  ;;  %1299 = vmatpush3.bf16.msra.mxu0 %v1401_v48 }
  0x38   :  { %1227 = vmatprep.subr.bf16.mxu1 %v1405_v49  ;;  %1300 = vmatprep.subr.bf16.mxu0 %v1439_v24 }
  0x3a   :  { %648 = vmatmul.mubr.bf16.gmra.mxu0 %v1404_v50 }
  0x3b   :  { %1228 = vmatpush3.bf16.msra.mxu1 %v1406_v51  ;;  %1301 = vmatpush3.bf16.msra.mxu0 %v1407_v52 }
  0x3c   :  { %1229 = vmatprep.subr.bf16.mxu1 %v1408_v53  ;;  %1302 = vmatprep.subr.bf16.mxu0 %v1439_v24 }
  0x3d   :  { %1304 = vmatprep.mubr.msk.bf16.mxu0 %vm1440_vm0, %v1439_v24 }
  0x3f   :  { %1230 = vmatpush3.bf16.msra.mxu1 %v1409_v54  ;;  %1303 = vmatpush3.bf16.msra.mxu0 %v1410_v55  ;;  %v1743_v54 = vld [vmem:[%s1798_s2] ss:$0 sm:$0xff] }
  0x42   :  { %713 = vmatmul.mubr.bf16.vlgmr.msra.gmra.mxu1 %v1411_v56  ;;  %1305 = vmatmul.mubr.bf16.vlgmr.msra.gmra.mxu0 %v1414_v57 }
  0x43   :  { %720 = vmatprep.mubr.bf16.mxu1 %v1415_v58  ;;  %1308 = vmatprep.mubr.msk.bf16.mxu0 %vm1440_vm0, %v1439_v24 }
  0x4a   :  { %721 = vmatmul.mubr.bf16.gmra.mxu1 %v1417_v59  ;;  %1309 = vmatmul.mubr.bf16.gmra.mxu0 %v1418_v60 }
  0x4b   :  { %728 = vmatprep.mubr.bf16.mxu1 %v1419_v61  ;;  %1312 = vmatprep.mubr.msk.bf16.mxu0 %vm1440_vm0, %v1439_v24 }
  0x52   :  { %729 = vmatmul.mubr.bf16.gmra.mxu1 %v1421_v62  ;;  %1313 = vmatmul.mubr.bf16.gmra.mxu0 %v1422_v63 }
  0x53   :  { %736 = vmatprep.mubr.bf16.mxu1 %v1423_v0  ;;  %1316 = vmatprep.mubr.msk.bf16.mxu0 %vm1440_vm0, %v1439_v24 }
  0x5a   :  { %737 = vmatmul.mubr.bf16.gmra.mxu1 %v1425_v1  ;;  %1317 = vmatmul.mubr.bf16.gmra.mxu0 %v1426_v2 }
  0x5b   :  { %744 = vmatprep.mubr.bf16.mxu1 %v1427_v3  ;;  %1320 = vmatprep.mubr.msk.bf16.mxu0 %vm1440_vm0, %v1439_v24 }
  0x62   :  { %745 = vmatmul.mubr.bf16.gmra.mxu1 %v1429_v4  ;;  %1321 = vmatmul.mubr.bf16.gmra.mxu0 %v1430_v5 }
  0x63   :  { %752 = vmatprep.mubr.bf16.mxu1 %v1431_v6  ;;  %1324 = vmatprep.mubr.msk.bf16.mxu0 %vm1440_vm0, %v1439_v24 }
  0x6a   :  { %753 = vmatmul.mubr.bf16.gmra.mxu1 %v1433_v7  ;;  %1325 = vmatmul.mubr.bf16.gmra.mxu0 %v1434_v8 }
  0x6b   :  { %760 = vmatprep.mubr.bf16.mxu1 %v1435_v9  ;;  %1328 = vmatprep.mubr.msk.bf16.mxu0 %vm1440_vm0, %v1439_v24 }
  0x72   :  { %761 = vmatmul.mubr.bf16.gmra.mxu1 %v1437_v10  ;;  %1329 = vmatmul.mubr.bf16.gmra.mxu0 %v1438_v11 }
  0xe2   :  { %v1173_v12 = vpop.f32.mrf.mxu0  ;;  %v1708_v13 = vpop.f32.mrf.mxu1 }
  0xe4   :  { %v1174_v14 = vpop.f32.mrf.mxu0  ;;  %v1710_v15 = vpop.f32.mrf.mxu1 }
  0xe5   :  { %v1175_v44 = vadd.f32 %v1174_v14, %v1173_v12 }
  0xe6   :  { %v1176_v16 = vpop.f32.mrf.mxu0  ;;  %v1712_v17 = vpop.f32.mrf.mxu1 }
  0xe8   :  { %v1177_v18 = vpop.f32.mrf.mxu0  ;;  %v1714_v19 = vpop.f32.mrf.mxu1 }
  0xe9   :  { %v1178_v51 = vadd.f32 %v1177_v18, %v1176_v16 }
  0xea   :  { %v1179_v20 = vpop.f32.mrf.mxu0  ;;  %v1716_v21 = vpop.f32.mrf.mxu1 }
  0xec   :  { %v1180_v22 = vpop.f32.mrf.mxu0  ;;  %v1718_v23 = vpop.f32.mrf.mxu1 }
  0xed   :  { %v1181_v60 = vadd.f32 %v1180_v22, %v1179_v20 }
  0xee   :  { %v1182_v24 = vpop.f32.mrf.mxu0  ;;  %v1720_v25 = vpop.f32.mrf.mxu1 }
  0xf0   :  { %v1183_v26 = vpop.f32.mrf.mxu0  ;;  %v1722_v27 = vpop.f32.mrf.mxu1 }
  0xf1   :  { %v1184_v4 = vadd.f32 %v1183_v26, %v1182_v24 }
  0xf2   :  { %v1185_v28 = vpop.f32.mrf.mxu0  ;;  %v1724_v30 = vpop.f32.mrf.mxu1 }
  0xf4   :  { %v1186_v29 = vpop.f32.mrf.mxu0  ;;  %v1726_v32 = vpop.f32.mrf.mxu1 }
  0xf5   :  { %v1187_v22 = vadd.f32 %v1186_v29, %v1185_v28 }
  0xf6   :  { %v1188_v31 = vpop.f32.mrf.mxu0  ;;  %v1730_v35 = vpop.f32.mrf.mxu1 }
  0xf8   :  { %v1189_v33 = vpop.f32.mrf.mxu0  ;;  %v1736_v38 = vpop.f32.mrf.mxu1 }
  0xfa   :  { %v1728_v34 = vpop.f32.mrf.mxu0 }
  0xfc   :  { %v1732_v36 = vpop.f32.mrf.mxu0 }
  0xfe   :  { %v1734_v37 = vpop.f32.mrf.mxu0 }
 0x100   :  { %v1738_v39 = vpop.f32.mrf.mxu0 }
 0x102   :  { %v1231_v40 = vpop.f32.mrf.mxu1  ;;  %v803_v41 = vpop.f32.mrf.mxu0 }
 0x104   :  { %v1232_v42 = vpop.f32.mrf.mxu1  ;;  %v1306_v43 = vpop.f32.mrf.mxu0 }
 0x105   :  { %v1233_v45 = vadd.f32 %v1232_v42, %v1231_v40 }
 0x106   :  { %v1234_v46 = vpop.f32.mrf.mxu1  ;;  %v806_v47 = vpop.f32.mrf.mxu0 }
 0x107   :  { %v715_v48 = vadd.f32 %v1233_v45, %v1175_v44  ;;  %v1190_v45 = vadd.f32 %v1189_v33, %v1188_v31 }
 0x108   :  { %v1235_v49 = vpop.f32.mrf.mxu1  ;;  %v1307_v50 = vpop.f32.mrf.mxu0 }
 0x109   :  { %v804_v52 = vadd.f32 %v803_v41, %v715_v48  ;;  %v1236_v53 = vadd.f32 %v1235_v49, %v1234_v46 }
 0x10a   :  { %v1237_v55 = vpop.f32.mrf.mxu1  ;;  %v811_v56 = vpop.f32.mrf.mxu0 }
 0x10b   :  { %v718_v57 = vadd.f32 %v1236_v53, %v1178_v51  ;;  %v910_v61 = vadd.f32 %v1743_v54, %v804_v52 }
 0x10c   :  { %v1238_v58 = vpop.f32.mrf.mxu1  ;;  %v1310_v59 = vpop.f32.mrf.mxu0 }
 0x10d   :  { %v807_v62 = vadd.f32 %v806_v47, %v718_v57  ;;  %v1239_v63 = vadd.f32 %v1238_v58, %v1237_v55  ;;  %v924_v7 = vmax.f32 %v910_v61, 0.0  ;;  %v1193_v57 = vadd.f32 %v1732_v36, %v1728_v34 }
 0x10e   :  { %v1240_v0 = vpop.f32.mrf.mxu1  ;;  %v814_v1 = vpop.f32.mrf.mxu0 }
 0x10f   :  { %v911_v2 = vadd.f32 %v1743_v54, %v807_v62  ;;  %v723_v3 = vadd.f32 %v1239_v63, %v1181_v60  ;;  %v1196_v63 = vadd.f32 %v1738_v39, %v1734_v37 }
 0x110   :  { %v1241_v5 = vpop.f32.mrf.mxu1  ;;  %v1311_v6 = vpop.f32.mrf.mxu0 }
 0x111   :  { %v925_v8 = vmax.f32 %v911_v2, 0.0  ;;  %v812_v9 = vadd.f32 %v811_v56, %v723_v3  ;;  %v1242_v10 = vadd.f32 %v1241_v5, %v1240_v0 }
 0x112   :  { %v1243_v11 = vpop.f32.mrf.mxu1  ;;  %v819_v12 = vpop.f32.mrf.mxu0 }
 0x113   :  { %v1119_v14 = vpack.c.bf16 %v925_v8, %v924_v7  ;;  %v726_v16 = vadd.f32 %v1242_v10, %v1184_v4  ;;  %v912_v40 = vadd.f32 %v1743_v54, %v812_v9  ;;  %v1199_v10 = vadd.f32 %v1710_v15, %v1708_v13 }
 0x114   :  { %v1244_v18 = vpop.f32.mrf.mxu1  ;;  %v1314_v20 = vpop.f32.mrf.mxu0 }
 0x115   :  { %1120 = vst [vmem:[%s1799_s3] sm:$0xff] %v1119_v14   ;;  %v815_v24 = vadd.f32 %v814_v1, %v726_v16  ;;  %v1245_v26 = vadd.f32 %v1244_v18, %v1243_v11  ;;  %v926_v48 = vmax.f32 %v912_v40, 0.0  ;;  %v1202_v20 = vadd.f32 %v1714_v19, %v1712_v17 }
 0x116   :  { %v1246_v41 = vpop.f32.mrf.mxu1  ;;  %v822_v42 = vpop.f32.mrf.mxu0 }
 0x117   :  { %v913_v43 = vadd.f32 %v1743_v54, %v815_v24  ;;  %v731_v44 = vadd.f32 %v1245_v26, %v1187_v22 }
 0x118   :  { %v1247_v46 = vpop.f32.mrf.mxu1  ;;  %v1315_v47 = vpop.f32.mrf.mxu0 }
 0x119   :  { %v927_v49 = vmax.f32 %v913_v43, 0.0  ;;  %v820_v50 = vadd.f32 %v819_v12, %v731_v44  ;;  %v1248_v28 = vadd.f32 %v1247_v46, %v1246_v41  ;;  %v1205_v47 = vadd.f32 %v1718_v23, %v1716_v21 }
 0x11a   :  { %v1249_v29 = vpop.f32.mrf.mxu1  ;;  %v827_v51 = vpop.f32.mrf.mxu0 }
 0x11b   :  { %v1124_v52 = vpack.c.bf16 %v927_v49, %v926_v48  ;;  %v734_v53 = vadd.f32 %v1248_v28, %v1190_v45  ;;  %v914_v31 = vadd.f32 %v1743_v54, %v820_v50 }
 0x11c   :  { %v1250_v55 = vpop.f32.mrf.mxu1  ;;  %v1318_v56 = vpop.f32.mrf.mxu0 }
 0x11d   :  { %1151 = vst [vmem:[%s1799_s3 + $0x8] sm:$0xff] %v1124_v52   ;;  %v823_v33 = vadd.f32 %v822_v42, %v734_v53  ;;  %v1251_v58 = vadd.f32 %v1250_v55, %v1249_v29  ;;  %v928_v2 = vmax.f32 %v914_v31, 0.0 }
 0x11e   :  { %v1252_v59 = vpop.f32.mrf.mxu1  ;;  %v830_v60 = vpop.f32.mrf.mxu0 }
 0x11f   :  { %v915_v61 = vadd.f32 %v1743_v54, %v823_v33  ;;  %v739_v62 = vadd.f32 %v1251_v58, %v1193_v57 }
 0x120   :  { %v1253_v0 = vpop.f32.mrf.mxu1  ;;  %v1319_v1 = vpop.f32.mrf.mxu0 }
 0x121   :  { %v929_v34 = vmax.f32 %v915_v61, 0.0  ;;  %v828_v36 = vadd.f32 %v827_v51, %v739_v62  ;;  %v1254_v3 = vadd.f32 %v1253_v0, %v1252_v59  ;;  %v1208_v51 = vadd.f32 %v1722_v27, %v1720_v25 }
 0x122   :  { %v1255_v4 = vpop.f32.mrf.mxu1  ;;  %v835_v5 = vpop.f32.mrf.mxu0  ;;  %v1211_v61 = vadd.f32 %v1726_v32, %v1724_v30 }
 0x123   :  { %v1129_v6 = vpack.c.bf16 %v929_v34, %v928_v2  ;;  %v742_v7 = vadd.f32 %v1254_v3, %v1196_v63  ;;  %v916_v37 = vadd.f32 %v1743_v54, %v828_v36  ;;  %v1214_v34 = vadd.f32 %v1736_v38, %v1730_v35 }
 0x124   :  { %v1256_v8 = vpop.f32.mrf.mxu1  ;;  %v1322_v9 = vpop.f32.mrf.mxu0 }
 0x125   :  { %1152 = vst [vmem:[%s1799_s3 + $0x10] sm:$0xff] %v1129_v6   ;;  %v831_v39 = vadd.f32 %v830_v60, %v742_v7  ;;  %v1257_v11 = vadd.f32 %v1256_v8, %v1255_v4  ;;  %v930_v24 = vmax.f32 %v916_v37, 0.0 }
 0x126   :  { %v1258_v12 = vpop.f32.mrf.mxu1  ;;  %v838_v14 = vpop.f32.mrf.mxu0 }
 0x127   :  { %v917_v16 = vadd.f32 %v1743_v54, %v831_v39  ;;  %v747_v18 = vadd.f32 %v1257_v11, %v1199_v10 }
 0x128   :  { %v1259_v22 = vpop.f32.mrf.mxu1  ;;  %v1323_v40 = vpop.f32.mrf.mxu0 }
 0x129   :  { %v931_v13 = vmax.f32 %v917_v16, 0.0  ;;  %v836_v15 = vadd.f32 %v835_v5, %v747_v18  ;;  %v1260_v26 = vadd.f32 %v1259_v22, %v1258_v12 }
 0x12a   :  { %v1261_v41 = vpop.f32.mrf.mxu1  ;;  %v843_v42 = vpop.f32.mrf.mxu0 }
 0x12b   :  { %v1134_v43 = vpack.c.bf16 %v931_v13, %v930_v24  ;;  %v750_v44 = vadd.f32 %v1260_v26, %v1202_v20  ;;  %v918_v17 = vadd.f32 %v1743_v54, %v836_v15 }
 0x12c   :  { %v1262_v45 = vpop.f32.mrf.mxu1  ;;  %v1326_v46 = vpop.f32.mrf.mxu0 }
 0x12d   :  { %1153 = vst [vmem:[%s1799_s3 + $0x18] sm:$0xff] %v1134_v43   ;;  %v839_v19 = vadd.f32 %v838_v14, %v750_v44  ;;  %v1263_v48 = vadd.f32 %v1262_v45, %v1261_v41  ;;  %v932_v55 = vmax.f32 %v918_v17, 0.0 }
 0x12e   :  { %v1264_v49 = vpop.f32.mrf.mxu1  ;;  %v846_v50 = vpop.f32.mrf.mxu0 }
 0x12f   :  { %v919_v28 = vadd.f32 %v1743_v54, %v839_v19  ;;  %v755_v29 = vadd.f32 %v1263_v48, %v1205_v47 }
 0x130   :  { %v1265_v52 = vpop.f32.mrf.mxu1  ;;  %v1327_v53 = vpop.f32.mrf.mxu0 }
 0x131   :  { %v933_v21 = vmax.f32 %v919_v28, 0.0  ;;  %v844_v23 = vadd.f32 %v843_v42, %v755_v29  ;;  %v1266_v56 = vadd.f32 %v1265_v52, %v1264_v49 }
 0x132   :  { %v1267_v57 = vpop.f32.mrf.mxu1  ;;  %v851_v31 = vpop.f32.mrf.mxu0 }
 0x133   :  { %v1139_v33 = vpack.c.bf16 %v933_v21, %v932_v55  ;;  %v758_v58 = vadd.f32 %v1266_v56, %v1208_v51  ;;  %v920_v25 = vadd.f32 %v1743_v54, %v844_v23 }
 0x134   :  { %v1268_v59 = vpop.f32.mrf.mxu1  ;;  %v1330_v60 = vpop.f32.mrf.mxu0 }
 0x135   :  { %1154 = vst [vmem:[%s1799_s3 + $0x20] sm:$0xff] %v1139_v33   ;;  %v847_v27 = vadd.f32 %v846_v50, %v758_v58  ;;  %v1269_v62 = vadd.f32 %v1268_v59, %v1267_v57  ;;  %v934_v4 = vmax.f32 %v920_v25, 0.0 }
 0x136   :  { %v1270_v63 = vpop.f32.mrf.mxu1  ;;  %v854_v0 = vpop.f32.mrf.mxu0 }
 0x137   :  { %v921_v1 = vadd.f32 %v1743_v54, %v847_v27  ;;  %v763_v2 = vadd.f32 %v1269_v62, %v1211_v61 }
 0x138   :  { %v1271_v36 = vpop.f32.mrf.mxu1  ;;  %v1331_v3 = vpop.f32.mrf.mxu0 }
 0x139   :  { %v935_v30 = vmax.f32 %v921_v1, 0.0  ;;  %v852_v32 = vadd.f32 %v851_v31, %v763_v2  ;;  %v1272_v5 = vadd.f32 %v1271_v36, %v1270_v63 }
 0x13b   :  { %v1144_v6 = vpack.c.bf16 %v935_v30, %v934_v4  ;;  %v766_v7 = vadd.f32 %v1272_v5, %v1214_v34  ;;  %v922_v8 = vadd.f32 %v1743_v54, %v852_v32 }
 0x13d   :  { %1155 = vst [vmem:[%s1799_s3 + $0x28] sm:$0xff] %v1144_v6   ;;  %v855_v9 = vadd.f32 %v854_v0, %v766_v7  ;;  %v936_v37 = vmax.f32 %v922_v8, 0.0 }
 0x13f   :  { %v923_v10 = vadd.f32 %v1743_v54, %v855_v9 }
 0x141   :  { %v937_v39 = vmax.f32 %v923_v10, 0.0 }
 0x143   :  { %v1149_v35 = vpack.c.bf16 %v937_v39, %v936_v37 }
 0x145   :  { %1156 = vst [vmem:[%s1799_s3 + $0x30] sm:$0xff] %v1149_v35  }

// kernel: _lambda_.8
= control target key start
LH: loop header
LB: loop body
LE: loop exit
PB: predicated region body
PF: predicated region fallthrough
CT: control target
= control target key end

     0   :  { %s2374_s0 = inlined_call_operand.vmem [shape: bf16[16,3200], index: 0, kind: input, shape index: {}]   ;;  %s2375_s1 = inlined_call_operand.vmem [shape: bf16[3200,512], index: 1, kind: input, shape index: {}]   ;;  %s2376_s2 = inlined_call_operand.vmem [shape: f32[1,512], index: 2, kind: input, shape index: {}]   ;;  %s2377_s3 = inlined_call_operand.vmem [shape: bf16[16,512], index: 3, kind: output, shape index: {}]  }
   0x1   :  { %2379 = sst [smem:[#allocation7_spill]] %s2374_s0 }
   0x2   :  { %2380 = sst [smem:[#allocation8_spill]] %s2375_s1 }
   0x3   :  { %s1943_s12 = smov 0   ;;  %s1945_s13 = smov 0  }
   0x4   :  { %s1947_s14 = smov 0   ;;  %s1949_s15 = smov 0  }
   0x5   :  { %s1951_s16 = smov 0   ;;  %s1953_s17 = smov 0  }
   0x6   :  { %s1955_s18 = smov 0   ;;  %s1957_s19 = smov 0  }
   0x7   :  { %s1959_s20 = smov 0   ;;  %s1961_s21 = smov 0  }
   0x8   :  { %s1963_s22 = smov 0  }
   0x9 LB: > { %s1498_s23 = sadd.s32 4294967295, %s1919_s22   ;;  %s25_s24 = sadd.s32 1, %s1911_s20  ;;  %s1919_s22 = sphi %s1963_s22, %s13_s22   ;;  %s1915_s21 = sphi %s1961_s21, %s2397_s21   ;;  %s1911_s20 = sphi %s1959_s20, %s2396_s20   ;;  %s1907_s19 = sphi %s1957_s19, %s2395_s19   ;;  %s1903_s18 = sphi %s1955_s18, %s2394_s18   ;;  %s1899_s17 = sphi %s1953_s17, %s2393_s17   ;;  %s1895_s16 = sphi %s1951_s16, %s2392_s16   ;;  %s1891_s15 = sphi %s1949_s15, %s2391_s15   ;;  %s1887_s14 = sphi %s1947_s14, %s2390_s14   ;;  %s1883_s13 = sphi %s1945_s13, %s2389_s13   ;;  %s1879_s12 = sphi %s1943_s12, %s2388_s12  }
   0xa   : > { %p26_p0 = scmp.ge.s32.totalorder %s25_s24, 5  ;;  %s28_s25 = sadd.s32 1, %s1915_s21 }
   0xb   : > { %s41_s26 = sadd.s32 1, %s1899_s17  ;;  %p48_p1 = scmp.ne.s32.totalorder %s1899_s17, %s1895_s16 }
   0xc   : > { %s2399_s24 = smov (%p26_p0, %s25_s24), 0  ;;  %s2401_s25 = smov (!%p26_p0, %s28_s25), %s1915_s21 }
   0xd   : > { %s37_s27 = ssub.s32 %s1911_s20, %s2399_s24  ;;  %p49_p2 = scmp.eq.s32.totalorder %s1919_s22, 0 }
   0xe   : > { %p30_p3 = scmp.ge.s32.totalorder %s2401_s25, 2  ;;  %p39_p4 = scmp.eq.s32.totalorder %s37_s27, 0 }
   0xf   : > { %p2010_p5 = por %p49_p2, %p48_p1  ;;  %s69_s29 = sadd.s32 1, %s1891_s15 }
  0x10   : > { %s2403_s25 = smov (%p30_p3, %s2401_s25), 0  ;;  %p76_p6 = scmp.ne.s32.totalorder %s1891_s15, %s1887_s14 }
  0x11   : > { %2382 = sst [smem:[#allocation6_spill]] %s2403_s25  ;;  %s65_s4 = ssub.s32 %s1915_s21, %s2403_s25 }
  0x12   : > { %s2018_s30 = scalar_select %p39_p4, %s1899_s17, %s41_s26  }
  0x13   : > { %s66_s5 = sor.u32 %s65_s4, %s37_s27  ;;  %p121_p7 = scmp.eq.s32.totalorder %s65_s4, 0 }
  0x14   : > { %p67_p8 = scmp.eq.s32.totalorder %s66_s5, 0  ;;  %p2024_p9 = por %p76_p6, %p49_p2 }
  0x15   : > { %s123_s7 = sadd.s32 1, %s1883_s13  ;;  %p133_p10 = scmp.ne.s32.totalorder %s1883_s13, %s1879_s12 }
  0x16   : > { %s2032_s8 = scalar_select %p67_p8, %s1891_s15, %s69_s29  }
  0x17   : > { %s2035_s9 = scalar_select %p121_p7, %s1883_s13, %s123_s7  }
  0x18   : > { %p134_p11 = scmp.eq.s32.totalorder %s1498_s23, 9  ;;  %p1501_p13 = scmp.ge.s32.totalorder %s1919_s22, 10 }
  0x1a   : > { %p2037_p12 = por %p134_p11, %p133_p10  ;;  %156 = sbr.rel (%p1501_p13) target bundleno = 93 (0x5d), region = 16 }
  0x1f   : > { %159 = sbr.rel (!%p2010_p5) target bundleno = 43 (0x2b), region = 20  ;;  %s161_s11 = sand.u32 (%p2010_p5), 1, %s1899_s17  }
  0x20   : > { %s1607_s26 = smul.u32 (%p2010_p5), 20, %s1911_s20  ;;  %s2385_s0 = sld [smem:[#allocation7_spill]] (%p2010_p5) }
  0x21   : > { %s1612_s27 = smul.u32 (%p2010_p5), 40, %s161_s11 }
  0x23   : > { %s163_s23 = scalar_lea.vmem (%p2010_p5), [#allocation3], %s1612_s27 }
  0x26   : > { %s169_s5 = scalar_lea.vmem %s2385_s0, %s1607_s26 }
  0x27   : > { %v184_v0 = vld [vmem:[%s169_s5] sm:$0xff]  ;;  %v186_v1 = vld [vmem:[%s169_s5 + $0x8] sm:$0xff]  ;;  %v1503_v4 = vld [vmem:[%s169_s5 + $0x10] sm:$0xf] }
  0x28   : > { %v188_v2 = vld [vmem:[%s169_s5 + $0x64] sm:$0xff]  ;;  %185 = vst [vmem:[%s163_s23] sm:$0xff] %v184_v0  ;;  %187 = vst [vmem:[%s163_s23 + $0x8] sm:$0xff] %v186_v1  ;;  %v190_v3 = vld [vmem:[%s169_s5 + $0x6c] sm:$0xff] }
  0x29   : > { %189 = vst [vmem:[%s163_s23 + $0x14] sm:$0xff] %v188_v2  ;;  %v1505_v5 = vld [vmem:[%s169_s5 + $0x74] sm:$0xf]  ;;  %191 = vst [vmem:[%s163_s23 + $0x1c] sm:$0xff] %v190_v3 }
  0x2a   : > { %1504 = vst [vmem:[%s163_s23 + $0x10] sm:$0xf] %v1503_v4  ;;  %1506 = vst [vmem:[%s163_s23 + $0x24] sm:$0xf] %v1505_v5 }
  0x2b PF: > { %209 = sbr.rel (!%p2024_p9) target bundleno = 93 (0x5d), region = 46  ;;  %s211_s28 = sand.u32 (%p2024_p9), 1, %s1891_s15  }
  0x2c   : > { %s1613_s7 = smul.u32 (%p2024_p9), 640, %s211_s28  ;;  %s1507_s11 = sshll.u32 (%p2024_p9), %s1915_s21, 1 }
  0x2d   : > { %s1608_s26 = smul.u32 (%p2024_p9), 320, %s1911_s20  ;;  %s2386_s1 = sld [smem:[#allocation8_spill]] (%p2024_p9) }
  0x2e   : > { %s2062_s6 = scalar_lea.vmem (%p2024_p9), [#allocation4], %s1613_s7 }
  0x2f   : > { %s217_s27 = sadd.s32 (%p2024_p9), %s1608_s26, %s1507_s11 }
  0x30   : > { %s1509_s29 = sshll.u32 %s217_s27, 2 }
  0x33   : > { %s2057_s5 = scalar_lea.vmem %s2386_s1, %s1509_s29 }
  0x34   : > { %v406_v6 = vld [vmem:[%s2057_s5] sm:$0xff]  ;;  %v408_v7 = vld [vmem:[%s2057_s5 + $0x10] sm:$0xff] }
  0x35   : > { %v410_v8 = vld [vmem:[%s2057_s5 + $0x20] sm:$0xff]  ;;  %407 = vst [vmem:[%s2062_s6] sm:$0xff] %v406_v6  ;;  %409 = vst [vmem:[%s2062_s6 + $0x8] sm:$0xff] %v408_v7  ;;  %v412_v9 = vld [vmem:[%s2057_s5 + $0x30] sm:$0xff] }
  0x36   : > { %411 = vst [vmem:[%s2062_s6 + $0x10] sm:$0xff] %v410_v8  ;;  %v414_v10 = vld [vmem:[%s2057_s5 + $0x40] sm:$0xff]  ;;  %v416_v11 = vld [vmem:[%s2057_s5 + $0x50] sm:$0xff]  ;;  %413 = vst [vmem:[%s2062_s6 + $0x18] sm:$0xff] %v412_v9 }
  0x37   : > { %415 = vst [vmem:[%s2062_s6 + $0x20] sm:$0xff] %v414_v10  ;;  %417 = vst [vmem:[%s2062_s6 + $0x28] sm:$0xff] %v416_v11  ;;  %v418_v12 = vld [vmem:[%s2057_s5 + $0x60] sm:$0xff]  ;;  %v420_v13 = vld [vmem:[%s2057_s5 + $0x70] sm:$0xff] }
  0x38   : > { %v422_v14 = vld [vmem:[%s2057_s5 + $0x80] sm:$0xff]  ;;  %419 = vst [vmem:[%s2062_s6 + $0x30] sm:$0xff] %v418_v12  ;;  %421 = vst [vmem:[%s2062_s6 + $0x38] sm:$0xff] %v420_v13  ;;  %v424_v15 = vld [vmem:[%s2057_s5 + $0x90] sm:$0xff] }
  0x39   : > { %423 = vst [vmem:[%s2062_s6 + $0x40] sm:$0xff] %v422_v14  ;;  %v426_v16 = vld [vmem:[%s2057_s5 + $0xa0] sm:$0xff]  ;;  %v428_v17 = vld [vmem:[%s2057_s5 + $0xb0] sm:$0xff]  ;;  %425 = vst [vmem:[%s2062_s6 + $0x48] sm:$0xff] %v424_v15 }
  0x3a   : > { %427 = vst [vmem:[%s2062_s6 + $0x50] sm:$0xff] %v426_v16  ;;  %429 = vst [vmem:[%s2062_s6 + $0x58] sm:$0xff] %v428_v17  ;;  %v430_v18 = vld [vmem:[%s2057_s5 + $0xc0] sm:$0xff]  ;;  %v432_v19 = vld [vmem:[%s2057_s5 + $0xd0] sm:$0xff] }
  0x3b   : > { %v434_v20 = vld [vmem:[%s2057_s5 + $0xe0] sm:$0xff]  ;;  %431 = vst [vmem:[%s2062_s6 + $0x60] sm:$0xff] %v430_v18  ;;  %433 = vst [vmem:[%s2062_s6 + $0x68] sm:$0xff] %v432_v19  ;;  %v436_v21 = vld [vmem:[%s2057_s5 + $0xf0] sm:$0xff] }
  0x3c   : > { %435 = vst [vmem:[%s2062_s6 + $0x70] sm:$0xff] %v434_v20  ;;  %v438_v22 = vld [vmem:[%s2057_s5 + $0x100] sm:$0xff]  ;;  %v440_v23 = vld [vmem:[%s2057_s5 + $0x110] sm:$0xff]  ;;  %437 = vst [vmem:[%s2062_s6 + $0x78] sm:$0xff] %v436_v21 }
  0x3d   : > { %439 = vst [vmem:[%s2062_s6 + $0x80] sm:$0xff] %v438_v22  ;;  %441 = vst [vmem:[%s2062_s6 + $0x88] sm:$0xff] %v440_v23  ;;  %v442_v24 = vld [vmem:[%s2057_s5 + $0x120] sm:$0xff]  ;;  %v444_v25 = vld [vmem:[%s2057_s5 + $0x130] sm:$0xff] }
  0x3e   : > { %v446_v26 = vld [vmem:[%s2057_s5 + $0x140] sm:$0xff]  ;;  %443 = vst [vmem:[%s2062_s6 + $0x90] sm:$0xff] %v442_v24  ;;  %445 = vst [vmem:[%s2062_s6 + $0x98] sm:$0xff] %v444_v25  ;;  %v448_v27 = vld [vmem:[%s2057_s5 + $0x150] sm:$0xff] }
  0x3f   : > { %447 = vst [vmem:[%s2062_s6 + $0xa0] sm:$0xff] %v446_v26  ;;  %v450_v28 = vld [vmem:[%s2057_s5 + $0x160] sm:$0xff]  ;;  %v452_v29 = vld [vmem:[%s2057_s5 + $0x170] sm:$0xff]  ;;  %449 = vst [vmem:[%s2062_s6 + $0xa8] sm:$0xff] %v448_v27 }
  0x40   : > { %451 = vst [vmem:[%s2062_s6 + $0xb0] sm:$0xff] %v450_v28  ;;  %453 = vst [vmem:[%s2062_s6 + $0xb8] sm:$0xff] %v452_v29  ;;  %v454_v30 = vld [vmem:[%s2057_s5 + $0x180] sm:$0xff]  ;;  %v456_v31 = vld [vmem:[%s2057_s5 + $0x190] sm:$0xff] }
  0x41   : > { %v458_v32 = vld [vmem:[%s2057_s5 + $0x1a0] sm:$0xff]  ;;  %455 = vst [vmem:[%s2062_s6 + $0xc0] sm:$0xff] %v454_v30  ;;  %457 = vst [vmem:[%s2062_s6 + $0xc8] sm:$0xff] %v456_v31  ;;  %v460_v33 = vld [vmem:[%s2057_s5 + $0x1b0] sm:$0xff] }
  0x42   : > { %459 = vst [vmem:[%s2062_s6 + $0xd0] sm:$0xff] %v458_v32  ;;  %v462_v34 = vld [vmem:[%s2057_s5 + $0x1c0] sm:$0xff]  ;;  %v464_v35 = vld [vmem:[%s2057_s5 + $0x1d0] sm:$0xff]  ;;  %461 = vst [vmem:[%s2062_s6 + $0xd8] sm:$0xff] %v460_v33 }
  0x43   : > { %463 = vst [vmem:[%s2062_s6 + $0xe0] sm:$0xff] %v462_v34  ;;  %465 = vst [vmem:[%s2062_s6 + $0xe8] sm:$0xff] %v464_v35  ;;  %v466_v36 = vld [vmem:[%s2057_s5 + $0x1e0] sm:$0xff]  ;;  %v468_v37 = vld [vmem:[%s2057_s5 + $0x1f0] sm:$0xff] }
  0x44   : > { %v470_v38 = vld [vmem:[%s2057_s5 + $0x200] sm:$0xff]  ;;  %467 = vst [vmem:[%s2062_s6 + $0xf0] sm:$0xff] %v466_v36  ;;  %469 = vst [vmem:[%s2062_s6 + $0xf8] sm:$0xff] %v468_v37  ;;  %v472_v39 = vld [vmem:[%s2057_s5 + $0x210] sm:$0xff] }
  0x45   : > { %471 = vst [vmem:[%s2062_s6 + $0x100] sm:$0xff] %v470_v38  ;;  %v474_v40 = vld [vmem:[%s2057_s5 + $0x220] sm:$0xff]  ;;  %v476_v41 = vld [vmem:[%s2057_s5 + $0x230] sm:$0xff]  ;;  %473 = vst [vmem:[%s2062_s6 + $0x108] sm:$0xff] %v472_v39 }
  0x46   : > { %475 = vst [vmem:[%s2062_s6 + $0x110] sm:$0xff] %v474_v40  ;;  %477 = vst [vmem:[%s2062_s6 + $0x118] sm:$0xff] %v476_v41  ;;  %v478_v42 = vld [vmem:[%s2057_s5 + $0x240] sm:$0xff]  ;;  %v480_v43 = vld [vmem:[%s2057_s5 + $0x250] sm:$0xff] }
  0x47   : > { %v482_v44 = vld [vmem:[%s2057_s5 + $0x260] sm:$0xff]  ;;  %479 = vst [vmem:[%s2062_s6 + $0x120] sm:$0xff] %v478_v42  ;;  %481 = vst [vmem:[%s2062_s6 + $0x128] sm:$0xff] %v480_v43  ;;  %v484_v45 = vld [vmem:[%s2057_s5 + $0x270] sm:$0xff] }
  0x48   : > { %483 = vst [vmem:[%s2062_s6 + $0x130] sm:$0xff] %v482_v44  ;;  %v486_v46 = vld [vmem:[%s2057_s5 + $0x280] sm:$0xff]  ;;  %v488_v47 = vld [vmem:[%s2057_s5 + $0x290] sm:$0xff]  ;;  %485 = vst [vmem:[%s2062_s6 + $0x138] sm:$0xff] %v484_v45 }
  0x49   : > { %487 = vst [vmem:[%s2062_s6 + $0x140] sm:$0xff] %v486_v46  ;;  %489 = vst [vmem:[%s2062_s6 + $0x148] sm:$0xff] %v488_v47  ;;  %v490_v48 = vld [vmem:[%s2057_s5 + $0x2a0] sm:$0xff]  ;;  %v492_v49 = vld [vmem:[%s2057_s5 + $0x2b0] sm:$0xff] }
  0x4a   : > { %v494_v50 = vld [vmem:[%s2057_s5 + $0x2c0] sm:$0xff]  ;;  %491 = vst [vmem:[%s2062_s6 + $0x150] sm:$0xff] %v490_v48  ;;  %493 = vst [vmem:[%s2062_s6 + $0x158] sm:$0xff] %v492_v49  ;;  %v496_v51 = vld [vmem:[%s2057_s5 + $0x2d0] sm:$0xff] }
  0x4b   : > { %495 = vst [vmem:[%s2062_s6 + $0x160] sm:$0xff] %v494_v50  ;;  %v498_v52 = vld [vmem:[%s2057_s5 + $0x2e0] sm:$0xff]  ;;  %v500_v53 = vld [vmem:[%s2057_s5 + $0x2f0] sm:$0xff]  ;;  %497 = vst [vmem:[%s2062_s6 + $0x168] sm:$0xff] %v496_v51 }
  0x4c   : > { %499 = vst [vmem:[%s2062_s6 + $0x170] sm:$0xff] %v498_v52  ;;  %501 = vst [vmem:[%s2062_s6 + $0x178] sm:$0xff] %v500_v53  ;;  %v502_v54 = vld [vmem:[%s2057_s5 + $0x300] sm:$0xff]  ;;  %v504_v55 = vld [vmem:[%s2057_s5 + $0x310] sm:$0xff] }
  0x4d   : > { %v506_v56 = vld [vmem:[%s2057_s5 + $0x320] sm:$0xff]  ;;  %503 = vst [vmem:[%s2062_s6 + $0x180] sm:$0xff] %v502_v54  ;;  %505 = vst [vmem:[%s2062_s6 + $0x188] sm:$0xff] %v504_v55  ;;  %v508_v57 = vld [vmem:[%s2057_s5 + $0x330] sm:$0xff] }
  0x4e   : > { %507 = vst [vmem:[%s2062_s6 + $0x190] sm:$0xff] %v506_v56  ;;  %v510_v58 = vld [vmem:[%s2057_s5 + $0x340] sm:$0xff]  ;;  %v512_v59 = vld [vmem:[%s2057_s5 + $0x350] sm:$0xff]  ;;  %509 = vst [vmem:[%s2062_s6 + $0x198] sm:$0xff] %v508_v57 }
  0x4f   : > { %511 = vst [vmem:[%s2062_s6 + $0x1a0] sm:$0xff] %v510_v58  ;;  %513 = vst [vmem:[%s2062_s6 + $0x1a8] sm:$0xff] %v512_v59  ;;  %v514_v60 = vld [vmem:[%s2057_s5 + $0x360] sm:$0xff]  ;;  %v516_v61 = vld [vmem:[%s2057_s5 + $0x370] sm:$0xff] }
  0x50   : > { %v518_v62 = vld [vmem:[%s2057_s5 + $0x380] sm:$0xff]  ;;  %515 = vst [vmem:[%s2062_s6 + $0x1b0] sm:$0xff] %v514_v60  ;;  %517 = vst [vmem:[%s2062_s6 + $0x1b8] sm:$0xff] %v516_v61  ;;  %v520_v63 = vld [vmem:[%s2057_s5 + $0x390] sm:$0xff] }
  0x51   : > { %519 = vst [vmem:[%s2062_s6 + $0x1c0] sm:$0xff] %v518_v62  ;;  %v522_v0 = vld [vmem:[%s2057_s5 + $0x3a0] sm:$0xff]  ;;  %v524_v1 = vld [vmem:[%s2057_s5 + $0x3b0] sm:$0xff]  ;;  %521 = vst [vmem:[%s2062_s6 + $0x1c8] sm:$0xff] %v520_v63 }
  0x52   : > { %523 = vst [vmem:[%s2062_s6 + $0x1d0] sm:$0xff] %v522_v0  ;;  %525 = vst [vmem:[%s2062_s6 + $0x1d8] sm:$0xff] %v524_v1  ;;  %v526_v2 = vld [vmem:[%s2057_s5 + $0x3c0] sm:$0xff]  ;;  %v528_v3 = vld [vmem:[%s2057_s5 + $0x3d0] sm:$0xff] }
  0x53   : > { %v530_v4 = vld [vmem:[%s2057_s5 + $0x3e0] sm:$0xff]  ;;  %527 = vst [vmem:[%s2062_s6 + $0x1e0] sm:$0xff] %v526_v2  ;;  %529 = vst [vmem:[%s2062_s6 + $0x1e8] sm:$0xff] %v528_v3  ;;  %v532_v5 = vld [vmem:[%s2057_s5 + $0x3f0] sm:$0xff] }
  0x54   : > { %531 = vst [vmem:[%s2062_s6 + $0x1f0] sm:$0xff] %v530_v4  ;;  %v534_v6 = vld [vmem:[%s2057_s5 + $0x400] sm:$0xff]  ;;  %v536_v7 = vld [vmem:[%s2057_s5 + $0x410] sm:$0xff]  ;;  %533 = vst [vmem:[%s2062_s6 + $0x1f8] sm:$0xff] %v532_v5 }
  0x55   : > { %535 = vst [vmem:[%s2062_s6 + $0x200] sm:$0xff] %v534_v6  ;;  %537 = vst [vmem:[%s2062_s6 + $0x208] sm:$0xff] %v536_v7  ;;  %v538_v8 = vld [vmem:[%s2057_s5 + $0x420] sm:$0xff]  ;;  %v540_v9 = vld [vmem:[%s2057_s5 + $0x430] sm:$0xff] }
  0x56   : > { %v542_v10 = vld [vmem:[%s2057_s5 + $0x440] sm:$0xff]  ;;  %539 = vst [vmem:[%s2062_s6 + $0x210] sm:$0xff] %v538_v8  ;;  %541 = vst [vmem:[%s2062_s6 + $0x218] sm:$0xff] %v540_v9  ;;  %v544_v11 = vld [vmem:[%s2057_s5 + $0x450] sm:$0xff] }
  0x57   : > { %543 = vst [vmem:[%s2062_s6 + $0x220] sm:$0xff] %v542_v10  ;;  %v546_v12 = vld [vmem:[%s2057_s5 + $0x460] sm:$0xff]  ;;  %v548_v13 = vld [vmem:[%s2057_s5 + $0x470] sm:$0xff]  ;;  %545 = vst [vmem:[%s2062_s6 + $0x228] sm:$0xff] %v544_v11 }
  0x58   : > { %547 = vst [vmem:[%s2062_s6 + $0x230] sm:$0xff] %v546_v12  ;;  %549 = vst [vmem:[%s2062_s6 + $0x238] sm:$0xff] %v548_v13  ;;  %v550_v14 = vld [vmem:[%s2057_s5 + $0x480] sm:$0xff]  ;;  %v552_v15 = vld [vmem:[%s2057_s5 + $0x490] sm:$0xff] }
  0x59   : > { %v554_v16 = vld [vmem:[%s2057_s5 + $0x4a0] sm:$0xff]  ;;  %551 = vst [vmem:[%s2062_s6 + $0x240] sm:$0xff] %v550_v14  ;;  %553 = vst [vmem:[%s2062_s6 + $0x248] sm:$0xff] %v552_v15  ;;  %v556_v17 = vld [vmem:[%s2057_s5 + $0x4b0] sm:$0xff] }
  0x5a   : > { %555 = vst [vmem:[%s2062_s6 + $0x250] sm:$0xff] %v554_v16  ;;  %v558_v18 = vld [vmem:[%s2057_s5 + $0x4c0] sm:$0xff]  ;;  %v560_v19 = vld [vmem:[%s2057_s5 + $0x4d0] sm:$0xff]  ;;  %557 = vst [vmem:[%s2062_s6 + $0x258] sm:$0xff] %v556_v17 }
  0x5b   : > { %559 = vst [vmem:[%s2062_s6 + $0x260] sm:$0xff] %v558_v18  ;;  %561 = vst [vmem:[%s2062_s6 + $0x268] sm:$0xff] %v560_v19  ;;  %v562_v20 = vld [vmem:[%s2057_s5 + $0x4e0] sm:$0xff]  ;;  %v564_v21 = vld [vmem:[%s2057_s5 + $0x4f0] sm:$0xff] }
  0x5c   : > { %563 = vst [vmem:[%s2062_s6 + $0x270] sm:$0xff] %v562_v20  ;;  %565 = vst [vmem:[%s2062_s6 + $0x278] sm:$0xff] %v564_v21 }
  0x5d PF: > { %p1510_p0 = scmp.ge.s32.totalorder %s1919_s22, 1  ;;  %p578_p1 = scmp.lt.s32.totalorder %s1919_s22, 11 }
  0x5f   : > { %p579_p2 = pnand %p1510_p0, %p578_p1 }
  0x60   : > { %s585_s0 = sand.u32 (!%p579_p2), 1, %s1895_s16   ;;  %s592_s23 = sand.u32 (!%p579_p2), 1, %s1887_s14  }
  0x61   : > { %582 = sbr.rel (%p579_p2) target bundleno = 436 (0x1b4), region = 88  ;;  %s619_s7 = sand.u32 (!%p579_p2), 1, %s1879_s12  }
  0x62   : > { %s1614_s28 = smul.u32 (!%p579_p2), 40, %s585_s0  ;;  %s1511_s26 = sshll.u32 (!%p579_p2), %s619_s7, 4 }
  0x63   : > { %s1615_s11 = smul.u32 (!%p579_p2), 640, %s592_s23  ;;  %s1512_s27 = sshll.u32 (!%p579_p2), %s1907_s19, 1 }
  0x64   : > { %p627_p3 = scmp.lt.s32.totalorder (!%p579_p2), %s1512_s27, 3  ;;  %s2233_s6 = scalar_lea.vmem (!%p579_p2), [#allocation3], %s1614_s28 }
  0x65   : > { %s2235_s1 = scalar_lea.vmem (!%p579_p2), [#allocation4], %s1615_s11  ;;  %s2237_s25 = scalar_lea.vmem (!%p579_p2), [#allocation5], %s1511_s26 }
  0x66   : > { %s2405_s27 = smov (!%p627_p3, %s1512_s27), 3  ;;  %p1513_p4 = scmp.ne.s32.totalorder %s1903_s18, 0 }
  0x67   : > { %s629_s5 = scalar_lea.vmem %s2376_s2, %s2405_s27 }
  0x68   : > { %637 = sbr.rel (%p1513_p4) target bundleno = 112 (0x70), region = 100 }
  0x6d   : > { %v1921_v22 = vmov 0.0  }
  0x6e   : > { %638 = vst [vmem:[#allocation2 + $0x10] sm:$0xff] %v1921_v22  ;;  %639 = vst [vmem:[#allocation2] sm:$0xff] %v1921_v22 }
  0x6f   : > { %640 = vst [vmem:[#allocation2 + $0x18] sm:$0xff] %v1921_v22  ;;  %641 = vst [vmem:[#allocation2 + $0x8] sm:$0xff] %v1921_v22 }
  0x70 PF: > { %v1706_v23 = vld [vmem:[%s2235_s1 + $0x74] ss:$8 sps:$4 sm:$0xff]   ;;  %v1710_v25 = vld [vmem:[%s2235_s1 + $0x70] ss:$8 sps:$4 sm:$0xff]   ;;  %v1712_v27 = vld [vmem:[%s2235_s1 + $0x64] ss:$8 sps:$4 sm:$0xff]  }
  0x71   : > { %v1708_v24 = vld [vmem:[%s2235_s1 + $0x174] ss:$8 sps:$4 sm:$0xff]   ;;  %1158 = vmatprep.subr.bf16.mxu0 %v1706_v23  ;;  %v1711_v26 = vld [vmem:[%s2235_s1 + $0x170] ss:$8 sps:$4 sm:$0xff]   ;;  %v1714_v28 = vld [vmem:[%s2235_s1 + $0x164] ss:$8 sps:$4 sm:$0xff]  }
  0x72   : > { %1201 = vmatprep.subr.bf16.mxu1 %v1708_v24  ;;  %1159 = vmatpush1.bf16.msra.mxu0 %v1710_v25  ;;  %v1716_v29 = vld [vmem:[%s2235_s1 + $0x60] ss:$8 sps:$4 sm:$0xff]   ;;  %v1718_v31 = vld [vmem:[%s2235_s1 + $0x54] ss:$8 sps:$4 sm:$0xff]   ;;  %v1722_v33 = vld [vmem:[%s2235_s1 + $0x50] ss:$8 sps:$4 sm:$0xff]  }
  0x73   : > { %1202 = vmatpush1.bf16.msra.mxu1 %v1711_v26  ;;  %1160 = vmatprep.subr.bf16.mxu0 %v1712_v27  ;;  %v1717_v30 = vld [vmem:[%s2235_s1 + $0x160] ss:$8 sps:$4 sm:$0xff]   ;;  %v1720_v32 = vld [vmem:[%s2235_s1 + $0x154] ss:$8 sps:$4 sm:$0xff]   ;;  %v1723_v34 = vld [vmem:[%s2235_s1 + $0x150] ss:$8 sps:$4 sm:$0xff]  }
  0x74   : > { %1203 = vmatprep.subr.bf16.mxu1 %v1714_v28  ;;  %v1724_v35 = vld [vmem:[%s2235_s1 + $0x44] ss:$8 sps:$4 sm:$0xff]   ;;  %v1728_v37 = vld [vmem:[%s2235_s1 + $0x40] ss:$8 sps:$4 sm:$0xff]   ;;  %v1730_v39 = vld [vmem:[%s2235_s1 + $0x34] ss:$8 sps:$4 sm:$0xff]  }
  0x75   : > { %v1726_v36 = vld [vmem:[%s2235_s1 + $0x144] ss:$8 sps:$4 sm:$0xff]   ;;  %v1729_v38 = vld [vmem:[%s2235_s1 + $0x140] ss:$8 sps:$4 sm:$0xff]   ;;  %v1732_v40 = vld [vmem:[%s2235_s1 + $0x134] ss:$8 sps:$4 sm:$0xff]  }
  0x76   : > { %1161 = vmatpush1.bf16.msra.mxu0 %v1716_v29  ;;  %v1734_v41 = vld [vmem:[%s2235_s1 + $0x30] ss:$8 sps:$4 sm:$0xff]   ;;  %v1736_v43 = vld [vmem:[%s2235_s1 + $0x24] ss:$8 sps:$4 sm:$0xff]   ;;  %v1740_v45 = vld [vmem:[%s2235_s1 + $0x20] ss:$8 sps:$4 sm:$0xff]  }
  0x77   : > { %1204 = vmatpush1.bf16.msra.mxu1 %v1717_v30  ;;  %1162 = vmatprep.subr.bf16.mxu0 %v1718_v31  ;;  %v1735_v42 = vld [vmem:[%s2235_s1 + $0x130] ss:$8 sps:$4 sm:$0xff]   ;;  %v1738_v44 = vld [vmem:[%s2235_s1 + $0x124] ss:$8 sps:$4 sm:$0xff]   ;;  %v1741_v46 = vld [vmem:[%s2235_s1 + $0x120] ss:$8 sps:$4 sm:$0xff]  }
  0x78   : > { %1205 = vmatprep.subr.bf16.mxu1 %v1720_v32  ;;  %v1742_v47 = vld [vmem:[%s2235_s1 + $0x14] ss:$8 sps:$4 sm:$0xff]   ;;  %v1746_v49 = vld [vmem:[%s2235_s1 + $0x10] ss:$8 sps:$4 sm:$0xff]   ;;  %v1748_v51 = vld [vmem:[%s2235_s1 + $0x4] ss:$8 sps:$4 sm:$0xff]  }
  0x79   : > { %v1744_v48 = vld [vmem:[%s2235_s1 + $0x114] ss:$8 sps:$4 sm:$0xff]   ;;  %v1747_v50 = vld [vmem:[%s2235_s1 + $0x110] ss:$8 sps:$4 sm:$0xff]   ;;  %v1750_v52 = vld [vmem:[%s2235_s1 + $0x104] ss:$8 sps:$4 sm:$0xff]  }
  0x7a   : > { %1163 = vmatpush1.bf16.msra.mxu0 %v1722_v33  ;;  %v1752_v53 = vld [vmem:[%s2235_s1] ss:$8 sps:$4 sm:$0xff]   ;;  %v1754_v55 = vld [vmem:[%s2235_s1 + $0xf4] ss:$8 sps:$4 sm:$0xff]   ;;  %v1758_v57 = vld [vmem:[%s2235_s1 + $0xf0] ss:$8 sps:$4 sm:$0xff]  }
  0x7b   : > { %1206 = vmatpush1.bf16.msra.mxu1 %v1723_v34  ;;  %1164 = vmatprep.subr.bf16.mxu0 %v1724_v35  ;;  %v1753_v54 = vld [vmem:[%s2235_s1 + $0x100] ss:$8 sps:$4 sm:$0xff]   ;;  %v1756_v56 = vld [vmem:[%s2235_s1 + $0x1f4] ss:$8 sps:$4 sm:$0xff]   ;;  %v1759_v58 = vld [vmem:[%s2235_s1 + $0x1f0] ss:$8 sps:$4 sm:$0xff]  }
  0x7c   : > { %1207 = vmatprep.subr.bf16.mxu1 %v1726_v36  ;;  %v1760_v59 = vld [vmem:[%s2235_s1 + $0xe4] ss:$8 sps:$4 sm:$0xff]   ;;  %v1764_v61 = vld [vmem:[%s2235_s1 + $0xe0] ss:$8 sps:$4 sm:$0xff]   ;;  %v1766_v63 = vld [vmem:[%s2235_s1 + $0xd4] ss:$8 sps:$4 sm:$0xff]  }
  0x7d   : > { %v1762_v60 = vld [vmem:[%s2235_s1 + $0x1e4] ss:$8 sps:$4 sm:$0xff]   ;;  %v1765_v62 = vld [vmem:[%s2235_s1 + $0x1e0] ss:$8 sps:$4 sm:$0xff]   ;;  %v1768_v0 = vld [vmem:[%s2235_s1 + $0x1d4] ss:$8 sps:$4 sm:$0xff]  }
  0x7e   : > { %1165 = vmatpush1.bf16.msra.mxu0 %v1728_v37  ;;  %v1770_v1 = vld [vmem:[%s2235_s1 + $0xd0] ss:$8 sps:$4 sm:$0xff]   ;;  %v1772_v3 = vld [vmem:[%s2235_s1 + $0xc4] ss:$8 sps:$4 sm:$0xff]   ;;  %v1776_v5 = vld [vmem:[%s2235_s1 + $0xc0] ss:$8 sps:$4 sm:$0xff]  }
  0x7f   : > { %1208 = vmatpush1.bf16.msra.mxu1 %v1729_v38  ;;  %1166 = vmatprep.subr.bf16.mxu0 %v1730_v39  ;;  %v1771_v2 = vld [vmem:[%s2235_s1 + $0x1d0] ss:$8 sps:$4 sm:$0xff]   ;;  %v1774_v4 = vld [vmem:[%s2235_s1 + $0x1c4] ss:$8 sps:$4 sm:$0xff]   ;;  %v1777_v6 = vld [vmem:[%s2235_s1 + $0x1c0] ss:$8 sps:$4 sm:$0xff]  }
  0x80   : > { %1209 = vmatprep.subr.bf16.mxu1 %v1732_v40  ;;  %v1778_v7 = vld [vmem:[%s2235_s1 + $0xb4] ss:$8 sps:$4 sm:$0xff]   ;;  %v1782_v11 = vld [vmem:[%s2235_s1 + $0xb0] ss:$8 sps:$4 sm:$0xff]   ;;  %v1784_v13 = vld [vmem:[%s2235_s1 + $0xa4] ss:$8 sps:$4 sm:$0xff]  }
  0x81   : > { %v1804_v8 = vld [vmem:[%s2233_s6 + $0x4] ss:$20 sps:$4 sm:$0xff]   ;;  %v1807_v10 = vld [vmem:[%s2233_s6 + $0xc] ss:$20 sps:$4 sm:$0xff]   ;;  %v1805_v27 = vld [vmem:[%s2233_s6 + $0x8] ss:$20 sps:$4 sm:$0xff]  }
  0x82   : > { %1167 = vmatpush1.bf16.msra.mxu0 %v1734_v41  ;;  %v1780_v9 = vld [vmem:[%s2235_s1 + $0x1b4] ss:$8 sps:$4 sm:$0xff]   ;;  %1190 = vmatprep.mubr.bf16.mxu0 %v1804_v8  ;;  %v1783_v12 = vld [vmem:[%s2235_s1 + $0x1b0] ss:$8 sps:$4 sm:$0xff]   ;;  %v1786_v14 = vld [vmem:[%s2235_s1 + $0x1a4] ss:$8 sps:$4 sm:$0xff]  }
  0x83   : > { %1210 = vmatpush1.bf16.msra.mxu1 %v1735_v42  ;;  %1168 = vmatprep.subr.bf16.mxu0 %v1736_v43  ;;  %v1788_v15 = vld [vmem:[%s2235_s1 + $0xa0] ss:$8 sps:$4 sm:$0xff]   ;;  %v1790_v17 = vld [vmem:[%s2235_s1 + $0x94] ss:$8 sps:$4 sm:$0xff]   ;;  %v1794_v19 = vld [vmem:[%s2235_s1 + $0x90] ss:$8 sps:$4 sm:$0xff]  }
  0x84   : > { %1211 = vmatprep.subr.bf16.mxu1 %v1738_v44  ;;  %1233 = vmatprep.mubr.bf16.mxu1 %v1807_v10  ;;  %v1789_v16 = vld [vmem:[%s2235_s1 + $0x1a0] ss:$8 sps:$4 sm:$0xff]   ;;  %v1792_v18 = vld [vmem:[%s2235_s1 + $0x194] ss:$8 sps:$4 sm:$0xff]   ;;  %v1795_v20 = vld [vmem:[%s2235_s1 + $0x190] ss:$8 sps:$4 sm:$0xff]  }
  0x85   : > { %v1796_v21 = vld [vmem:[%s2235_s1 + $0x84] ss:$8 sps:$4 sm:$0xff]   ;;  %v1800_v23 = vld [vmem:[%s2235_s1 + $0x80] ss:$8 sps:$4 sm:$0xff]   ;;  %v1810_v25 = vld [vmem:[%s2235_s1 + $0x274] ss:$8 sps:$4 sm:$0xff]  }
  0x86   : > { %1169 = vmatpush1.bf16.msra.mxu0 %v1740_v45  ;;  %v1798_v22 = vld [vmem:[%s2235_s1 + $0x184] ss:$8 sps:$4 sm:$0xff]   ;;  %v1801_v24 = vld [vmem:[%s2235_s1 + $0x180] ss:$8 sps:$4 sm:$0xff]   ;;  %v1808_v28 = vld [vmem:[%s2235_s1 + $0x270] ss:$8 sps:$4 sm:$0xff]  }
  0x87   : > { %1212 = vmatpush1.bf16.msra.mxu1 %v1741_v46  ;;  %1170 = vmatprep.subr.bf16.mxu0 %v1742_v47  ;;  %v1802_v26 = vld [vmem:[%s2233_s6] ss:$20 sps:$4 sm:$0xff]   ;;  %v1811_v30 = vld [vmem:[%s2235_s1 + $0x260] ss:$8 sps:$4 sm:$0xff]   ;;  %v1922_v31 = vmov 0   ;;  %p1599_p5 = scmp.ne.s32.totalorder %s1903_s18, 4 }
  0x88   : > { %1213 = vmatprep.subr.bf16.mxu1 %v1744_v48  ;;  %v1813_v29 = vld [vmem:[%s2235_s1 + $0x264] ss:$8 sps:$4 sm:$0xff]   ;;  %v1816_v32 = vld [vmem:[%s2235_s1 + $0x254] ss:$8 sps:$4 sm:$0xff]   ;;  %v1814_v33 = vld [vmem:[%s2235_s1 + $0x250] ss:$8 sps:$4 sm:$0xff]  }
  0x89   : > { %v1819_v34 = vld [vmem:[%s2235_s1 + $0x244] ss:$8 sps:$4 sm:$0xff]   ;;  %v1817_v35 = vld [vmem:[%s2235_s1 + $0x240] ss:$8 sps:$4 sm:$0xff]   ;;  %v1822_v36 = vld [vmem:[%s2235_s1 + $0x234] ss:$8 sps:$4 sm:$0xff]  }
  0x8a   : > { %1171 = vmatpush1.bf16.msra.mxu0 %v1746_v49  ;;  %v1820_v37 = vld [vmem:[%s2235_s1 + $0x230] ss:$8 sps:$4 sm:$0xff]   ;;  %v1825_v38 = vld [vmem:[%s2235_s1 + $0x224] ss:$8 sps:$4 sm:$0xff]   ;;  %v1823_v39 = vld [vmem:[%s2235_s1 + $0x220] ss:$8 sps:$4 sm:$0xff]  }
  0x8b   : > { %1214 = vmatpush1.bf16.msra.mxu1 %v1747_v50  ;;  %1172 = vmatprep.subr.bf16.mxu0 %v1748_v51  ;;  %v1828_v40 = vld [vmem:[%s2235_s1 + $0x214] ss:$8 sps:$4 sm:$0xff]   ;;  %v1826_v41 = vld [vmem:[%s2235_s1 + $0x210] ss:$8 sps:$4 sm:$0xff]   ;;  %v1831_v42 = vld [vmem:[%s2235_s1 + $0x204] ss:$8 sps:$4 sm:$0xff]  }
  0x8c   : > { %1215 = vmatprep.subr.bf16.mxu1 %v1750_v52  ;;  %v1829_v43 = vld [vmem:[%s2235_s1 + $0x200] ss:$8 sps:$4 sm:$0xff]  }
  0x8d   : > { %v1832_v44 = vld [vmem:[%s2233_s6 + $0x10] ss:$20 sps:$4 sm:$0xff]  }
  0x8e   : > { %1173 = vmatpush1.bf16.msra.mxu0 %v1752_v53  ;;  %v642_v53 = vld [vmem:[#allocation2 + $0x10] sm:$0xff] }
  0x8f   : > { %1216 = vmatpush1.bf16.msra.mxu1 %v1753_v54  ;;  %1174 = vmatprep.subr.bf16.mxu0 %v1754_v55 }
  0x90   : > { %1217 = vmatprep.subr.bf16.mxu1 %v1756_v56 }
  0x92   : > { %1175 = vmatpush2.bf16.msra.mxu0 %v1758_v57 }
  0x93   : > { %1218 = vmatpush2.bf16.msra.mxu1 %v1759_v58  ;;  %1176 = vmatprep.subr.bf16.mxu0 %v1760_v59  ;;  %v643_v58 = vld [vmem:[#allocation2] sm:$0xff] }
  0x94   : > { %1219 = vmatprep.subr.bf16.mxu1 %v1762_v60 }
  0x96   : > { %1177 = vmatpush2.bf16.msra.mxu0 %v1764_v61 }
  0x97   : > { %1220 = vmatpush2.bf16.msra.mxu1 %v1765_v62  ;;  %1178 = vmatprep.subr.bf16.mxu0 %v1766_v63  ;;  %v644_v63 = vld [vmem:[#allocation2 + $0x18] sm:$0xff] }
  0x98   : > { %1221 = vmatprep.subr.bf16.mxu1 %v1768_v0 }
  0x9a   : > { %1179 = vmatpush2.bf16.msra.mxu0 %v1770_v1 }
  0x9b   : > { %1222 = vmatpush2.bf16.msra.mxu1 %v1771_v2  ;;  %1180 = vmatprep.subr.bf16.mxu0 %v1772_v3 }
  0x9c   : > { %1223 = vmatprep.subr.bf16.mxu1 %v1774_v4  ;;  %v645_v4 = vld [vmem:[#allocation2 + $0x8] sm:$0xff] }
  0x9e   : > { %1181 = vmatpush2.bf16.msra.mxu0 %v1776_v5 }
  0x9f   : > { %1224 = vmatpush2.bf16.msra.mxu1 %v1777_v6  ;;  %1182 = vmatprep.subr.bf16.mxu0 %v1778_v7 }
  0xa0   : > { %1225 = vmatprep.subr.bf16.mxu1 %v1780_v9 }
  0xa2   : > { %1183 = vmatpush2.bf16.msra.mxu0 %v1782_v11 }
  0xa3   : > { %1226 = vmatpush2.bf16.msra.mxu1 %v1783_v12  ;;  %1184 = vmatprep.subr.bf16.mxu0 %v1784_v13 }
  0xa4   : > { %1227 = vmatprep.subr.bf16.mxu1 %v1786_v14 }
  0xa6   : > { %1185 = vmatpush2.bf16.msra.mxu0 %v1788_v15 }
  0xa7   : > { %1228 = vmatpush2.bf16.msra.mxu1 %v1789_v16  ;;  %1186 = vmatprep.subr.bf16.mxu0 %v1790_v17 }
  0xa8   : > { %1229 = vmatprep.subr.bf16.mxu1 %v1792_v18 }
  0xaa   : > { %1187 = vmatpush2.bf16.msra.mxu0 %v1794_v19 }
  0xab   : > { %1230 = vmatpush2.bf16.msra.mxu1 %v1795_v20  ;;  %1188 = vmatprep.subr.bf16.mxu0 %v1796_v21 }
  0xac   : > { %1231 = vmatprep.subr.bf16.mxu1 %v1798_v22 }
  0xae   : > { %1189 = vmatpush2.bf16.msra.mxu0 %v1800_v23 }
  0xaf   : > { %1232 = vmatpush2.bf16.msra.mxu1 %v1801_v24  ;;  %1244 = vmatprep.subr.bf16.mxu0 %v1810_v25 }
  0xb1   : > { %1191 = vmatmul.mubr.bf16.vlgmr.msra.gmra.mxu0 %v1802_v26 }
  0xb2   : > { %1234 = vmatmul.mubr.bf16.vlgmr.msra.gmra.mxu1 %v1805_v27  ;;  %1245 = vmatpush1.bf16.msra.mxu0 %v1808_v28 }
  0xb3   : > { %1276 = vmatprep.mubr.bf16.mxu0 %v1922_v31  ;;  %1246 = vmatprep.subr.bf16.mxu0 %v1813_v29 }
  0xb6   : > { %1247 = vmatpush1.bf16.msra.mxu0 %v1811_v30 }
  0xb7   : > { %1248 = vmatprep.subr.bf16.mxu0 %v1816_v32 }
  0xba   : > { %1249 = vmatpush1.bf16.msra.mxu0 %v1814_v33 }
  0xbb   : > { %1250 = vmatprep.subr.bf16.mxu0 %v1819_v34 }
  0xbe   : > { %1251 = vmatpush1.bf16.msra.mxu0 %v1817_v35 }
  0xbf   : > { %1252 = vmatprep.subr.bf16.mxu0 %v1822_v36 }
  0xc2   : > { %1253 = vmatpush1.bf16.msra.mxu0 %v1820_v37 }
  0xc3   : > { %1254 = vmatprep.subr.bf16.mxu0 %v1825_v38 }
  0xc6   : > { %1255 = vmatpush1.bf16.msra.mxu0 %v1823_v39 }
  0xc7   : > { %1256 = vmatprep.subr.bf16.mxu0 %v1828_v40 }
  0xca   : > { %1257 = vmatpush1.bf16.msra.mxu0 %v1826_v41 }
  0xcb   : > { %1258 = vmatprep.subr.bf16.mxu0 %v1831_v42 }
  0xce   : > { %1259 = vmatpush1.bf16.msra.mxu0 %v1829_v43 }
  0xd1   : > { %1277 = vmatmul.mubr.bf16.vlgmr.msra.gmra.mxu0 %v1832_v44 }
 0x171   : > { %v1192_v45 = vpop.f32.mrf.mxu0 }
 0x172   : > { %v1235_v46 = vpop.f32.mrf.mxu1 }
 0x173   : > { %v1194_v47 = vpop.f32.mrf.mxu0  ;;  %v1236_v52 = vadd.f32 %v1235_v46, %v1192_v45 }
 0x174   : > { %v1237_v48 = vpop.f32.mrf.mxu1 }
 0x175   : > { %v1196_v49 = vpop.f32.mrf.mxu0  ;;  %v1238_v55 = vadd.f32 %v1237_v48, %v1194_v47 }
 0x176   : > { %v1239_v50 = vpop.f32.mrf.mxu1 }
 0x177   : > { %v1198_v51 = vpop.f32.mrf.mxu0  ;;  %v1240_v60 = vadd.f32 %v1239_v50, %v1196_v49 }
 0x178   : > { %v1241_v57 = vpop.f32.mrf.mxu1 }
 0x179   : > { %v1242_v1 = vadd.f32 %v1241_v57, %v1198_v51 }
 0x191   : > { %v1278_v54 = vpop.f32.mrf.mxu0 }
 0x192   : > { %v1279_v56 = vadd.f32 %v1278_v54, %v1236_v52 }
 0x193   : > { %v1280_v59 = vpop.f32.mrf.mxu0 }
 0x194   : > { %v1287_v61 = vadd.f32 %v1279_v56, %v642_v53  ;;  %v1281_v62 = vadd.f32 %v1280_v59, %v1238_v55 }
 0x195   : > { %v1282_v0 = vpop.f32.mrf.mxu0 }
 0x196   : > { %1291 = vst [vmem:[#allocation2 + $0x10] sm:$0xff] %v1287_v61  ;;  %v1288_v2 = vadd.f32 %v1281_v62, %v643_v58  ;;  %v1283_v3 = vadd.f32 %v1282_v0, %v1240_v60 }
 0x197   : > { %v1284_v5 = vpop.f32.mrf.mxu0 }
 0x198   : > { %1292 = vst [vmem:[#allocation2] sm:$0xff] %v1288_v2  ;;  %v1289_v6 = vadd.f32 %v1283_v3, %v644_v63  ;;  %v1285_v7 = vadd.f32 %v1284_v5, %v1242_v1  ;;  %1298 = sbr.rel (%p1599_p5) target bundleno = 428 (0x1ac), region = 104 }
 0x19a   : > { %1293 = vst [vmem:[#allocation2 + $0x18] sm:$0xff] %v1289_v6  ;;  %v1290_v8 = vadd.f32 %v1285_v7, %v645_v4 }
 0x19c   : > { %1294 = vst [vmem:[#allocation2 + $0x8] sm:$0xff] %v1290_v8 }
 0x19d   : > { %v1305_v9 = vlaneseq  ;;  %v1303_v11 = vld [vmem:[%s629_s5] sm:$0x3] }
 0x19e   : > { %v1299_v12 = vld [vmem:[#allocation2 + $0x10] sm:$0xff] }
 0x19f   : > { %v1306_v10 = vshrl.u32 %v1305_v9, 7  ;;  %v1300_v15 = vld [vmem:[#allocation2] sm:$0xff] }
 0x1a1   : > { %v1307_v13 = vsub.s32 0, %v1306_v10  ;;  %v1311_v14 = vsub.s32 1, %v1306_v10  ;;  %v1301_v16 = vld [vmem:[#allocation2 + $0x18] sm:$0xff] }
 0x1a3   : > { %v1302_v17 = vld [vmem:[#allocation2 + $0x8] sm:$0xff]  ;;  %v1308_v18 = vrot.slane %v1303_v11, %v1307_v13  ;;  %v1312_v19 = vrot.slane %v1303_v11, %v1311_v14 }
 0x1a5   : > { %v1315_v20 = vadd.f32 %v1308_v18, %v1299_v12  ;;  %v1316_v21 = vadd.f32 %v1312_v19, %v1300_v15  ;;  %v1317_v22 = vadd.f32 %v1308_v18, %v1301_v16  ;;  %v1318_v23 = vadd.f32 %v1312_v19, %v1302_v17 }
 0x1a7   : > { %v1319_v24 = vmax.f32 %v1315_v20, 0.0  ;;  %v1320_v25 = vmax.f32 %v1316_v21, 0.0  ;;  %v1321_v26 = vmax.f32 %v1317_v22, 0.0  ;;  %v1322_v27 = vmax.f32 %v1318_v23, 0.0 }
 0x1a9   : > { %v1609_v28 = vpack.c.bf16 %v1320_v25, %v1319_v24  ;;  %v1610_v29 = vpack.c.bf16 %v1322_v27, %v1321_v26 }
 0x1ab   : > { %1335 = vst [vmem:[%s2237_s25] sm:$0xff] %v1609_v28  ;;  %1336 = vst [vmem:[%s2237_s25 + $0x8] sm:$0xff] %v1610_v29 }
 0x1ac PF: > { %1343 = sbr.rel (!%p2037_p12) target bundleno = 436 (0x1b4), region = 108  ;;  %s1611_s14 = sshll.u32 (%p2037_p12), %s1907_s19, 3 }
 0x1ad   : > { %s1349_s0 = scalar_lea.vmem (%p2037_p12), %s2377_s3, %s1611_s14 }
 0x1b2   : > { %v1380_v30 = vld [vmem:[%s2237_s25] sm:$0xff]  ;;  %v1382_v31 = vld [vmem:[%s2237_s25 + $0x8] sm:$0xff] }
 0x1b3   : > { %1381 = vst [vmem:[%s1349_s0] sm:$0xff] %v1380_v30  ;;  %1383 = vst [vmem:[%s1349_s0 + $0x10] sm:$0xff] %v1382_v31 }
 0x1b4 PF: > { %s13_s22 = sadd.s32 1, %s1919_s22   ;;  %s2387_s25 = sld [smem:[#allocation6_spill]] }
 0x1b5   : > { %p10_p6 = scmp.ge.s32.totalorder %s13_s22, 12   ;;  %s2388_s12 = smov %s1883_s13 }
 0x1b6   : > { %s2389_s13 = smov %s2035_s9  ;;  %s2390_s14 = smov %s1891_s15 }
 0x1b7   : > { %s2391_s15 = smov %s2032_s8  ;;  %s2392_s16 = smov %s1899_s17 }
 0x1b8   : > { %s2393_s17 = smov %s2018_s30  ;;  %s2394_s18 = smov %s1911_s20 }
 0x1b9   : > { %s2395_s19 = smov %s1915_s21  ;;  %s2396_s20 = smov %s2399_s24 }
 0x1ba   : > { %s2397_s21 = smov %s2387_s25  ;;  %12 = sbr.rel (!%p10_p6) target bundleno = 9 (0x9), region = 194 }

// kernel: _lambda_.9
= control target key start
LH: loop header
LB: loop body
LE: loop exit
PB: predicated region body
PF: predicated region fallthrough
CT: control target
= control target key end

     0   :  { %s665_s1 = inlined_call_operand.vmem [shape: bf16[512,128], index: 1, kind: input, shape index: {}]   ;;  %s666_s0 = inlined_call_operand.vmem [shape: bf16[16,512], index: 0, kind: input, shape index: {}]   ;;  %s667_s2 = inlined_call_operand.vmem [shape: f32[1,128], index: 2, kind: input, shape index: {}]   ;;  %s668_s3 = inlined_call_operand.vmem [shape: f32[16,128], index: 3, kind: output, shape index: {}]  }
   0x1   :  { %v490_v0 = vld [vmem:[%s665_s1 + $0x78] sm:$0xff]   ;;  %v494_v4 = vld [vmem:[%s665_s1 + $0x70] sm:$0xff]   ;;  %v498_v8 = vld [vmem:[%s665_s1 + $0x68] sm:$0xff]  }
   0x2   :  { %v491_v1 = vld [vmem:[%s665_s1 + $0xf8] sm:$0xff]   ;;  %446 = vmatprep.subr.bf16.mxu0 %v490_v0  ;;  %v495_v5 = vld [vmem:[%s665_s1 + $0xf0] sm:$0xff]   ;;  %v499_v9 = vld [vmem:[%s665_s1 + $0xe8] sm:$0xff]  }
   0x3   :  { %v492_v2 = vld [vmem:[%s665_s1 + $0x38] sm:$0xff]   ;;  %468 = vmatprep.subr.bf16.mxu1 %v491_v1  ;;  %v496_v6 = vld [vmem:[%s665_s1 + $0x30] sm:$0xff]   ;;  %v500_v10 = vld [vmem:[%s665_s1 + $0x28] sm:$0xff]  }
   0x4   :  { %v493_v3 = vld [vmem:[%s665_s1 + $0xb8] sm:$0xff]   ;;  %447 = vmatpush3.bf16.msra.mxu0 %v492_v2  ;;  %v497_v7 = vld [vmem:[%s665_s1 + $0xb0] sm:$0xff]   ;;  %v501_v11 = vld [vmem:[%s665_s1 + $0xa8] sm:$0xff]  }
   0x5   :  { %469 = vmatpush3.bf16.msra.mxu1 %v493_v3  ;;  %448 = vmatprep.subr.bf16.mxu0 %v494_v4  ;;  %v502_v12 = vld [vmem:[%s665_s1 + $0x60] sm:$0xff]   ;;  %v506_v16 = vld [vmem:[%s665_s1 + $0x58] sm:$0xff]   ;;  %v510_v20 = vld [vmem:[%s665_s1 + $0x50] sm:$0xff]  }
   0x6   :  { %470 = vmatprep.subr.bf16.mxu1 %v495_v5  ;;  %v503_v13 = vld [vmem:[%s665_s1 + $0xe0] sm:$0xff]   ;;  %v507_v17 = vld [vmem:[%s665_s1 + $0xd8] sm:$0xff]   ;;  %v511_v21 = vld [vmem:[%s665_s1 + $0xd0] sm:$0xff]  }
   0x7   :  { %v504_v14 = vld [vmem:[%s665_s1 + $0x20] sm:$0xff]   ;;  %v508_v18 = vld [vmem:[%s665_s1 + $0x18] sm:$0xff]   ;;  %v512_v22 = vld [vmem:[%s665_s1 + $0x10] sm:$0xff]  }
   0x8   :  { %449 = vmatpush3.bf16.msra.mxu0 %v496_v6  ;;  %v505_v15 = vld [vmem:[%s665_s1 + $0xa0] sm:$0xff]   ;;  %v509_v19 = vld [vmem:[%s665_s1 + $0x98] sm:$0xff]   ;;  %v513_v23 = vld [vmem:[%s665_s1 + $0x90] sm:$0xff]  }
   0x9   :  { %471 = vmatpush3.bf16.msra.mxu1 %v497_v7  ;;  %450 = vmatprep.subr.bf16.mxu0 %v498_v8  ;;  %v514_v24 = vld [vmem:[%s665_s1 + $0x48] sm:$0xff]   ;;  %v518_v28 = vld [vmem:[%s665_s1 + $0x40] sm:$0xff]  }
   0xa   :  { %472 = vmatprep.subr.bf16.mxu1 %v499_v9  ;;  %v515_v25 = vld [vmem:[%s665_s1 + $0xc8] sm:$0xff]   ;;  %v519_v29 = vld [vmem:[%s665_s1 + $0xc0] sm:$0xff]  }
   0xb   :  { %v516_v26 = vld [vmem:[%s665_s1 + $0x8] sm:$0xff]   ;;  %v520_v30 = vld [vmem:[%s665_s1] sm:$0xff]  }
   0xc   :  { %451 = vmatpush3.bf16.msra.mxu0 %v500_v10  ;;  %v517_v27 = vld [vmem:[%s665_s1 + $0x88] sm:$0xff]   ;;  %v521_v31 = vld [vmem:[%s665_s1 + $0x80] sm:$0xff]  }
   0xd   :  { %473 = vmatpush3.bf16.msra.mxu1 %v501_v11  ;;  %452 = vmatprep.subr.bf16.mxu0 %v502_v12  ;;  %v522_v32 = vld [vmem:[%s666_s0] ss:$16 sps:$4 sm:$0xff]   ;;  %v524_v33 = vld [vmem:[%s666_s0 + $0x4] ss:$16 sps:$4 sm:$0xff]   ;;  %v525_v34 = vld [vmem:[%s666_s0 + $0x8] ss:$16 sps:$4 sm:$0xff]  }
   0xe   :  { %474 = vmatprep.subr.bf16.mxu1 %v503_v13  ;;  %v527_v35 = vld [vmem:[%s666_s0 + $0xc] ss:$16 sps:$4 sm:$0xff]   ;;  %335 = vmatprep.mubr.bf16.mxu0 %v524_v33  ;;  %v445_v43 = vld [vmem:[%s667_s2] ss:$0 sm:$0xff] }
   0xf   :  { %376 = vmatprep.mubr.bf16.mxu1 %v527_v35 }
  0x10   :  { %453 = vmatpush3.bf16.msra.mxu0 %v504_v14 }
  0x11   :  { %475 = vmatpush3.bf16.msra.mxu1 %v505_v15  ;;  %454 = vmatprep.subr.bf16.mxu0 %v506_v16 }
  0x12   :  { %476 = vmatprep.subr.bf16.mxu1 %v507_v17 }
  0x14   :  { %455 = vmatpush3.bf16.msra.mxu0 %v508_v18 }
  0x15   :  { %477 = vmatpush3.bf16.msra.mxu1 %v509_v19  ;;  %456 = vmatprep.subr.bf16.mxu0 %v510_v20 }
  0x16   :  { %478 = vmatprep.subr.bf16.mxu1 %v511_v21 }
  0x18   :  { %457 = vmatpush3.bf16.msra.mxu0 %v512_v22 }
  0x19   :  { %479 = vmatpush3.bf16.msra.mxu1 %v513_v23  ;;  %458 = vmatprep.subr.bf16.mxu0 %v514_v24 }
  0x1a   :  { %480 = vmatprep.subr.bf16.mxu1 %v515_v25 }
  0x1c   :  { %459 = vmatpush3.bf16.msra.mxu0 %v516_v26 }
  0x1d   :  { %481 = vmatpush3.bf16.msra.mxu1 %v517_v27  ;;  %460 = vmatprep.subr.bf16.mxu0 %v518_v28 }
  0x1e   :  { %482 = vmatprep.subr.bf16.mxu1 %v519_v29 }
  0x20   :  { %461 = vmatpush3.bf16.msra.mxu0 %v520_v30 }
  0x21   :  { %483 = vmatpush3.bf16.msra.mxu1 %v521_v31 }
  0x23   :  { %336 = vmatmul.mubr.bf16.vlgmr.msra.gmra.mxu0 %v522_v32 }
  0x24   :  { %377 = vmatmul.mubr.bf16.vlgmr.msra.gmra.mxu1 %v525_v34 }
  0xe3   :  { %v462_v36 = vpop.f32.mrf.mxu0 }
  0xe4   :  { %v484_v37 = vpop.f32.mrf.mxu1 }
  0xe5   :  { %v463_v38 = vpop.f32.mrf.mxu0 }
  0xe6   :  { %v464_v39 = vadd.f32 %v463_v38, %v462_v36  ;;  %v485_v40 = vpop.f32.mrf.mxu1 }
  0xe7   :  { %v486_v41 = vadd.f32 %v485_v40, %v484_v37  ;;  %v465_v42 = vpop.f32.mrf.mxu0 }
  0xe8   :  { %v487_v44 = vpop.f32.mrf.mxu1 }
  0xe9   :  { %v379_v45 = vadd.f32 %v486_v41, %v464_v39  ;;  %v466_v46 = vpop.f32.mrf.mxu0 }
  0xea   :  { %v467_v47 = vadd.f32 %v466_v46, %v465_v42  ;;  %v488_v48 = vpop.f32.mrf.mxu1 }
  0xeb   :  { %v401_v49 = vadd.f32 %v445_v43, %v379_v45  ;;  %v489_v50 = vadd.f32 %v488_v48, %v487_v44 }
  0xed   :  { %403 = vst [vmem:[%s668_s3] sm:$0xff] %v401_v49  ;;  %v382_v51 = vadd.f32 %v489_v50, %v467_v47 }
  0xef   :  { %v402_v52 = vadd.f32 %v445_v43, %v382_v51 }
  0xf1   :  { %404 = vst [vmem:[%s668_s3 + $0x8] sm:$0xff] %v402_v52 }

</bundles_post_ra>
